<compile_context>
chip_gen: v5e
topology: v5e:2x2
jax: 0.10.0
libtpu: 0.0.40
codegen_flags: <defaults>
</compile_context>

<pallas_src>
import jax
import jax.numpy as jnp
from jax import lax
from jax.experimental import pallas as pl
from jax.experimental.pallas import tpu as pltpu


# ---------------------------------------------------------------------------
# Kernel-body helpers.
# ---------------------------------------------------------------------------

def _l2_normalize_cols(v):
    """Normalize each column (point) of a (C, P) tile over the channel axis.

    Matches torch.nn.functional.normalize(x, p=2, dim=1) with eps=1e-12
    (x / max(||x||, 1e-12) == x * rsqrt(max(||x||^2, 1e-24))).
    """
    ssq = jnp.sum(v * v, axis=0, keepdims=True)                 # (1, P) sublane reduce
    return v * lax.rsqrt(jnp.maximum(ssq, 1e-24))


def _neg_scores(yk, xq):
    """-<y, x> for all (key, query) pairs, keys-major.

    yk: (C, Mc), xq: (C, TN) -> (Mc, TN).  The channel axis is contracted as
    axis 0 of BOTH operands via dot_general, so no in-kernel transpose /
    relayout of the key tile is materialized.
    """
    return -lax.dot_general(yk, xq, (((0,), (0,)), ((), ())),
                            preferred_element_type=jnp.float32)


def _extract_rounds(neg, row_idx, num_rounds, invalid_idx, store_fn):
    """Extract `num_rounds` smallest (value, index) entries per column, ascending.

    neg:        (M, TN) f32 scores (smaller = closer).
    row_idx:    int32 key index of each row: either an (M, 1) column (lane
                broadcast on use; no resident (M, TN) index matrix) or a full
                (M, TN) matrix (merge phase).
    store_fn:   callable(round, best_idx_row, best_val_row); rows are (1, TN).
    invalid_idx: sentinel strictly larger than every valid key index.

    Tie-break is "lowest key index" (deterministic stand-in for torch.topk's
    backend-dependent tie order).  Winner-masking is fused into the NEXT
    round's min sweep: one pass over the matrix per round instead of two, and
    no dead masking pass after the final round.

    TODO(synk): optional bf16 score-compare path for v6e/v7x (~2x VALU / half
    the VMEM traffic) is intentionally not taken: v5e has no bf16 VPU and
    near-tie distances could reorder vs. the f32 reference.
    """
    inf = jnp.float32(jnp.inf)
    best = None
    for i in range(num_rounds):
        if i > 0:
            neg = jnp.where(row_idx == best, inf, neg)          # mask prev winner
        mn = jnp.min(neg, axis=0, keepdims=True)                # (1, TN)
        best = jnp.min(jnp.where(neg == mn, row_idx, invalid_idx),
                       axis=0, keepdims=True).astype(jnp.int32)  # (1, TN)
        store_fn(i, best, mn)


# ---------------------------------------------------------------------------
# Kernel bodies.
# ---------------------------------------------------------------------------

def _make_direct_kernel(dilation, k_carry, m, self_knn):
    """Single-key-chunk kernel: k_carry extraction rounds over the full
    (M, TN) score block, storing only the dilation-kept ranks."""

    def _topk(xq, yk, o_ref):
        neg = _neg_scores(yk, xq)                                # (M, TN)
        idx_col = lax.broadcasted_iota(jnp.int32, (m, 1), 0)     # (M, 1) only

        def store(i, best, _mn):
            if i % dilation == 0:                                # kept ranks only
                o_ref[pl.ds(i // dilation, 1), :] = best
        _extract_rounds(neg, idx_col, k_carry, m, store)

    if self_knn:
        def kernel(x_ref, o_ref):                  # x is both queries and keys
            xn = _l2_normalize_cols(x_ref[...].astype(jnp.float32))
            _topk(xn, xn, o_ref)
    else:
        def kernel(x_ref, y_ref, o_ref):
            xq = _l2_normalize_cols(x_ref[...].astype(jnp.float32))
            yk = _l2_normalize_cols(y_ref[...].astype(jnp.float32))
            _topk(xq, yk, o_ref)
    return kernel


def _make_stream_kernel(k_keep, dilation, k_carry, mc, m):
    """Key-streaming kernel.

    Per key chunk: (A) extract the chunk-local top-k_carry into the upper half
    of a (2*k_carry, TN) best-value / best-index scratch, (B) merge it with the
    running global top-k_carry held in the lower half (key indices are globally
    unique, so the same lexicographic (value, index) extraction applies).  The
    final chunk copies the dilation-kept rows into the lane-dense output block.
    """

    def kernel(x_ref, y_ref, o_ref, bv_ref, bi_ref):
        ki = pl.program_id(2)
        last = pl.num_programs(2) - 1

        @pl.when(ki == 0)
        def _init():
            bv_ref[...] = jnp.full(bv_ref.shape, jnp.inf, jnp.float32)
            bi_ref[...] = jnp.full(bi_ref.shape, m, jnp.int32)

        # Per-chunk scores.  (The tiny (C, TN) query normalization is redone
        # per chunk; negligible next to the top-k rounds.)
        xq = _l2_normalize_cols(x_ref[...].astype(jnp.float32))  # (C, TN)
        yk = _l2_normalize_cols(y_ref[...].astype(jnp.float32))  # (C, Mc)
        neg = _neg_scores(yk, xq)                                # (Mc, TN)
        idx_col = (ki * mc
                   + lax.broadcasted_iota(jnp.int32, (mc, 1), 0))  # global ids

        # Phase A: chunk-local top-k_carry -> upper half of the scratch.
        def store_chunk(i, best, mn):
            bi_ref[pl.ds(k_carry + i, 1), :] = best
            bv_ref[pl.ds(k_carry + i, 1), :] = mn
        _extract_rounds(neg, idx_col, k_carry, m, store_chunk)

        # Phase B: merge running best (lower half) with chunk best (upper half).
        cv = bv_ref[...]                                         # (2K, TN) snapshot
        ci = bi_ref[...]

        def store_best(i, best, mn):
            bi_ref[pl.ds(i, 1), :] = best
            bv_ref[pl.ds(i, 1), :] = mn
        _extract_rounds(cv, ci, k_carry, m, store_best)

        # Final chunk: emit only the dilation-kept ranks, lane-dense.
        @pl.when(ki == last)
        def _finalize():
            for i in range(k_keep):
                o_ref[pl.ds(i, 1), :] = bi_ref[pl.ds(i * dilation, 1), :]

    return kernel


# ---------------------------------------------------------------------------
# VMEM budgeting and tile selection (shared formula -> consistent).
# ---------------------------------------------------------------------------

def _round_up(v, mult):
    return -(-v // mult) * mult


def _vmem_capacity_bytes():
    """Per-TensorCore VMEM capacity; conservative 64 MiB (v7x) if unknown."""
    try:
        cap = int(pltpu.get_tpu_info().vmem_capacity_bytes)
        if cap > 0:
            return cap
    except Exception:                       # query is best-effort only
        pass
    return 64 << 20


def _vmem_limits():
    cap = _vmem_capacity_bytes()
    # (planning budget for tile picking, ceiling for the vmem_limit request)
    return int(cap * 0.70), int(cap * 0.85)


def _vmem_need_bytes(c, tn, mc, k_keep, k_carry, streaming):
    """Working-set estimate, used by BOTH the tile picker and the vmem request."""
    f32 = 4
    c_pad = _round_up(max(c, 8), 8)
    kk_pad = _round_up(k_keep, 8)
    need = 2 * c_pad * tn * f32              # query block, double-buffered
    need += 2 * c_pad * mc * f32             # key block / chunk, double-buffered
    need += 2 * kk_pad * tn * f32            # int32 output block, double-buffered
    need += 3 * mc * tn * f32                # (Mc, TN) scores + ~2 live temps
    if streaming:
        kc_pad = _round_up(2 * k_carry, 8)
        need += 2 * kc_pad * tn * f32        # best-val / best-idx scratch
        need += 2 * kc_pad * tn * f32        # merge-phase snapshots + temps
    need += 2 << 20                          # Mosaic internal scratch slack
    return need


def _pick_key_chunk(m, k_carry):
    """Key-chunk length Mc: a multiple of 128 (lane constraint) or the full M."""
    if m <= 2048:
        return m
    for cand in list(range(1024, 127, -128)) + [2048, 4096]:
        if m % cand == 0 and cand >= k_carry:
            return cand
    # TODO(synk): ragged key counts (no 128-multiple divisor) would need a
    # masked last chunk; fall back to a single full-size chunk for now.
    return m


def _pick_query_tile(n, c, mc, k_keep, k_carry, streaming, budget, batch):
    """Largest query tile whose working set fits the planning budget."""

    def fits(tn):
        return _vmem_need_bytes(c, tn, mc, k_keep, k_carry, streaming) <= budget

    candidates = [n] + [t for t in (8192, 4096, 2048, 1024, 512, 256, 128)
                        if t < n and n % t == 0]
    tn = None
    for cand in candidates:
        if fits(cand):
            tn = cand
            break
    if tn is None:
        # TODO(synk): ragged N with a huge working set would need a masked
        # query tile; take the smallest legal tile and let vmem_limit stretch.
        tn = candidates[-1]
    # v7x has 2 TensorCores per chip; make sure the 'parallel' grid axes expose
    # >= 2 steps so both get work (nearly free on single-core chips).
    if batch == 1 and tn == n and n % 256 == 0 and fits(n // 2):
        tn = n // 2
    return tn


# ---------------------------------------------------------------------------
# Host wrapper.
# ---------------------------------------------------------------------------

def _knn_indices(x_bcn, k_keep, dilation, y_bcn=None, key_chunk=None):
    """Dilation-kept KNN indices, lane-dense layout.

    x_bcn: (B, C, N) queries; y_bcn: (B, C, M) keys (None => self-KNN).
    Returns (B, k_keep, N) int32 where [b, i, q] is the index of the
    (i*dilation)-th nearest key of query q (only the ranks the dilation slice
    keeps are ever computed / stored).
    """
    b, c, n = x_bcn.shape
    m = n if y_bcn is None else y_bcn.shape[2]
    k_total = k_keep * dilation
    if k_total > m:
        raise ValueError(
            f"k*dilation={k_total} exceeds the number of key points ({m}).")
    k_carry = (k_keep - 1) * dilation + 1    # largest rank we need to extract

    budget, ceiling = _vmem_limits()

    mc = key_chunk if key_chunk is not None else _pick_key_chunk(m, k_carry)
    if mc >= m or m % mc != 0 or mc < k_carry or mc % 128 != 0:
        mc = m                               # single chunk => direct path
    streaming = mc < m
    n_kchunks = m // mc

    tn = _pick_query_tile(n, c, mc, k_keep, k_carry, streaming, budget, b)
    n_tiles = n // tn

    need = _vmem_need_bytes(c, tn, mc, k_keep, k_carry, streaming)
    vmem_limit = int(min(max(need, 32 << 20), ceiling))

    out_shape = jax.ShapeDtypeStruct((b, k_keep, n), jnp.int32)

    if streaming:
        grid = (b, n_tiles, n_kchunks)
        in_specs = [pl.BlockSpec((None, c, tn), lambda bi, qi, ki: (bi, 0, qi)),
                    pl.BlockSpec((None, c, mc), lambda bi, qi, ki: (bi, 0, ki))]
        out_spec = pl.BlockSpec((None, k_keep, tn), lambda bi, qi, ki: (bi, 0, qi))
        scratch = [pltpu.VMEM((2 * k_carry, tn), jnp.float32),
                   pltpu.VMEM((2 * k_carry, tn), jnp.int32)]
        semantics = ("parallel", "parallel", "arbitrary")
        kernel = _make_stream_kernel(k_keep, dilation, k_carry, mc, m)
        operands = (x_bcn, x_bcn if y_bcn is None else y_bcn)
    else:
        grid = (b, n_tiles)
        q_spec = pl.BlockSpec((None, c, tn), lambda bi, qi: (bi, 0, qi))
        k_spec = pl.BlockSpec((None, c, m), lambda bi, qi: (bi, 0, 0))
        out_spec = pl.BlockSpec((None, k_keep, tn), lambda bi, qi: (bi, 0, qi))
        scratch = []
        semantics = ("parallel", "parallel")
        self_knn = y_bcn is None and n_tiles == 1
        kernel = _make_direct_kernel(dilation, k_carry, m, self_knn)
        if self_knn:
            in_specs = [q_spec]              # feed x once: halves input DMA
            operands = (x_bcn,)
        else:
            in_specs = [q_spec, k_spec]
            operands = (x_bcn, x_bcn if y_bcn is None else y_bcn)

    return pl.pallas_call(
        kernel,
        out_shape=out_shape,
        grid_spec=pltpu.PrefetchScalarGridSpec(
            num_scalar_prefetch=0,
            grid=grid,
            in_specs=in_specs,
            out_specs=out_spec,
            scratch_shapes=scratch,
        ),
        compiler_params=pltpu.CompilerParams(
            dimension_semantics=semantics,
            vmem_limit_bytes=vmem_limit),
    )(*operands)


class DenseDilatedKnnGraph:
    """JAX/Pallas port of gcn_lib.torch_edge.DenseDilatedKnnGraph (eval path)."""

    def __init__(self, k=9, dilation=1, stochastic=False, epsilon=0.0):
        self.k = k
        self.dilation = dilation
        self.stochastic = stochastic
        self.epsilon = epsilon
        # TODO(synk): stochastic dilation (training-time torch.randperm branch)
        # is a host-side RNG path over all k*dilation neighbors; only the
        # deterministic eval path (module default stochastic=False) is
        # implemented, and the kernel materializes only the kept ranks.

    def __call__(self, x, y=None, relative_pos=None):
        # x: (B, C, N, 1) NCHW-like, same as the PyTorch module.
        b, c, n, _ = x.shape

        if relative_pos is not None:
            # TODO(synk): relative_pos additive distance bias not wired into
            # the kernel (default forward call passes relative_pos=None).
            raise NotImplementedError("relative_pos not supported")

        x_bcn = x[..., 0]                                    # (B, C, N)
        y_bcn = None if y is None else y[..., 0]             # (B, C, M)

        idx_kn = _knn_indices(x_bcn, self.k, self.dilation, y_bcn)  # (B, k, N)
        nn_idx = jnp.transpose(idx_kn, (0, 2, 1))            # (B, N, k)

        center_idx = jnp.broadcast_to(
            jnp.arange(n, dtype=nn_idx.dtype)[None, :, None], (b, n, self.k))

        # Dilation slice is already applied inside the kernel (kept ranks only).
        return jnp.stack((nn_idx, center_idx), axis=0)        # (2, B, N, k)


if __name__ == "__main__":
    key = jax.random.PRNGKey(0)
    kx, ky = jax.random.split(key)

    # --- Test 1: self-KNN, single key chunk (direct path). -----------------
    B, C, N = 2, 4, 64
    k, dilation = 9, 2

    x = jax.random.normal(kx, (B, C, N, 1), dtype=jnp.float32)
    graph = DenseDilatedKnnGraph(k=k, dilation=dilation)
    edge_index = jax.block_until_ready(graph(x))

    assert edge_index.shape == (2, B, N, k), edge_index.shape
    assert edge_index.dtype == jnp.int32
    nn_idx, center_idx = edge_index[0], edge_index[1]
    assert int(jnp.min(nn_idx)) >= 0 and int(jnp.max(nn_idx)) < N
    assert bool(jnp.all(center_idx == jnp.arange(N)[None, :, None]))
    assert bool(jnp.all(nn_idx[:, :, 0] == jnp.arange(N)[None, :]))

    # Tie-order-agnostic distance check against a pure-JAX reference.
    xn = x[..., 0]
    xn = xn / jnp.maximum(
        jnp.sqrt(jnp.sum(xn * xn, axis=1, keepdims=True)), 1e-12)     # (B, C, N)
    dist = 2.0 - 2.0 * jnp.einsum("bcn,bcm->bnm", xn, xn,
                                  precision=lax.Precision.HIGHEST)    # (B, N, N)
    kept = jnp.sort(dist, axis=-1)[:, :, : (k - 1) * dilation + 1 : dilation]
    got = jnp.take_along_axis(dist, nn_idx, axis=-1)
    assert bool(jnp.all(jnp.abs(got - kept) < 1e-4)), "neighbor distance mismatch"

    # --- Test 2: xy-KNN; forced key streaming must match the direct path. --
    Nq, Mk = 128, 256
    xq4 = jax.random.normal(ky, (1, C, Nq, 1), dtype=jnp.float32)
    yk4 = jax.random.normal(jax.random.PRNGKey(1), (1, C, Mk, 1), dtype=jnp.float32)

    idx_direct = _knn_indices(xq4[..., 0], k, dilation, yk4[..., 0])
    idx_stream = _knn_indices(xq4[..., 0], k, dilation, yk4[..., 0], key_chunk=128)
    idx_direct, idx_stream = jax.block_until_ready((idx_direct, idx_stream))
    assert idx_direct.shape == (1, k, Nq)
    assert bool(jnp.all(idx_direct == idx_stream)), "key-streaming path mismatch"

    # Module-level xy path agrees with the direct kernel call.
    edge_xy = jax.block_until_ready(
        DenseDilatedKnnGraph(k=k, dilation=dilation)(xq4, yk4))
    assert edge_xy.shape == (2, 1, Nq, k)
    assert bool(jnp.all(edge_xy[0] == jnp.transpose(idx_direct, (0, 2, 1))))

    print("KERNEL_OK")
</pallas_src>

<mosaic_0001>
module attributes {stable_mosaic.version = 11 : i64} {
  func.func @kernel(%arg0: i32, %arg1: i32, %arg2: memref<1x4x64xf32, #tpu.memory_space<vmem>>, %arg3: memref<1x9x64xi32, #tpu.memory_space<vmem>>) attributes {dimension_semantics = [#tpu.dimension_semantics<parallel>, #tpu.dimension_semantics<parallel>], iteration_bounds = array<i64: 2, 1>, scalar_prefetch = 0 : i64, scratch_operands = 0 : i64, tpu.core_type = #tpu.core_type<tc>, window_params = [{transform_indices = @transform_0, window_bounds = array<i64: 1, 4, 64>}, {transform_indices = @transform_1, window_bounds = array<i64: 1, 9, 64>}]} {
    %c0 = arith.constant 0 : index
    %c0_0 = arith.constant 0 : index
    %c0_1 = arith.constant 0 : index
    %0 = vector.load %arg2[%c0, %c0_0, %c0_1] : memref<1x4x64xf32, #tpu.memory_space<vmem>>, vector<1x4x64xf32>
    %1 = vector.shape_cast %0 : vector<1x4x64xf32> to vector<4x64xf32>
    %2 = arith.mulf %1, %1 : vector<4x64xf32>
    %cst = arith.constant dense<0.000000e+00> : vector<64xf32>
    %3 = vector.multi_reduction <add>, %2, %cst [0] : vector<4x64xf32> to vector<64xf32>
    %4 = vector.shape_cast %3 : vector<64xf32> to vector<1x64xf32>
    %cst_2 = arith.constant 1.000000e-24 : f32
    %5 = vector.broadcast %cst_2 : f32 to vector<1x64xf32>
    %6 = arith.maximumf %4, %5 : vector<1x64xf32>
    %7 = math.rsqrt %6 : vector<1x64xf32>
    %8 = vector.broadcast %7 : vector<1x64xf32> to vector<4x64xf32>
    %9 = arith.mulf %1, %8 : vector<4x64xf32>
    %cst_3 = arith.constant dense<0.000000e+00> : vector<64x64xf32>
    %10 = tpu.matmul %9, %9, %cst_3 {dimension_numbers = #tpu.dot_dimension_numbers<[0], [0], [1], [1], [0, 1, 1, 1], [], []>} : vector<4x64xf32>, vector<4x64xf32>, vector<64x64xf32> -> vector<64x64xf32>
    %cst_4 = arith.constant 0.000000e+00 : f32
    %11 = vector.broadcast %cst_4 : f32 to vector<64x64xf32>
    %12 = arith.subf %11, %10 : vector<64x64xf32>
    %13 = tpu.iota {dimensions = array<i32: 0>} : vector<64x1xi32>
    %cst_5 = arith.constant dense<0x7F800000> : vector<64xf32>
    %14 = vector.multi_reduction <minimumf>, %12, %cst_5 [0] : vector<64x64xf32> to vector<64xf32>
    %15 = vector.shape_cast %14 : vector<64xf32> to vector<1x64xf32>
    %16 = vector.broadcast %15 : vector<1x64xf32> to vector<64x64xf32>
    %17 = arith.cmpf oeq, %12, %16 : vector<64x64xf32>
    %c64_i32 = arith.constant 64 : i32
    %18 = vector.shape_cast %13 : vector<64x1xi32> to vector<64x1xi32>
    %19 = vector.broadcast %18 : vector<64x1xi32> to vector<64x64xi32>
    %20 = vector.broadcast %c64_i32 : i32 to vector<64x64xi32>
    %21 = arith.select %17, %19, %20 : vector<64x64xi1>, vector<64x64xi32>
    %cst_6 = arith.constant dense<2147483647> : vector<64xi32>
    %22 = vector.multi_reduction <minsi>, %21, %cst_6 [0] : vector<64x64xi32> to vector<64xi32>
    %23 = vector.shape_cast %22 : vector<64xi32> to vector<1x64xi32>
    %c0_7 = arith.constant 0 : index
    %c0_8 = arith.constant 0 : index
    %c0_9 = arith.constant 0 : index
    %24 = vector.load %arg3[%c0_7, %c0_8, %c0_9] : memref<1x9x64xi32, #tpu.memory_space<vmem>>, vector<1x1x64xi32>
    %25 = vector.shape_cast %24 : vector<1x1x64xi32> to vector<1x64xi32>
    %26 = vector.shape_cast %23 : vector<1x64xi32> to vector<1x1x64xi32>
    tpu.vector_store %arg3[%c0_7, %c0_8, %c0_9], %26 {strides = array<i32>} : memref<1x9x64xi32, #tpu.memory_space<vmem>>, vector<1x1x64xi32>,
    %27 = vector.broadcast %13 : vector<64x1xi32> to vector<64x64xi32>
    %28 = vector.broadcast %23 : vector<1x64xi32> to vector<64x64xi32>
    %29 = arith.cmpi eq, %27, %28 : vector<64x64xi32>
    %cst_10 = arith.constant 0x7F800000 : f32
    %30 = vector.broadcast %cst_10 : f32 to vector<64x64xf32>
    %31 = arith.select %29, %30, %12 : vector<64x64xi1>, vector<64x64xf32>
    %cst_11 = arith.constant dense<0x7F800000> : vector<64xf32>
    %32 = vector.multi_reduction <minimumf>, %31, %cst_11 [0] : vector<64x64xf32> to vector<64xf32>
    %33 = vector.shape_cast %32 : vector<64xf32> to vector<1x64xf32>
    %34 = vector.broadcast %33 : vector<1x64xf32> to vector<64x64xf32>
    %35 = arith.cmpf oeq, %31, %34 : vector<64x64xf32>
    %c64_i32_12 = arith.constant 64 : i32
    %36 = vector.shape_cast %13 : vector<64x1xi32> to vector<64x1xi32>
    %37 = vector.broadcast %36 : vector<64x1xi32> to vector<64x64xi32>
    %38 = vector.broadcast %c64_i32_12 : i32 to vector<64x64xi32>
    %39 = arith.select %35, %37, %38 : vector<64x64xi1>, vector<64x64xi32>
    %cst_13 = arith.constant dense<2147483647> : vector<64xi32>
    %40 = vector.multi_reduction <minsi>, %39, %cst_13 [0] : vector<64x64xi32> to vector<64xi32>
    %41 = vector.shape_cast %40 : vector<64xi32> to vector<1x64xi32>
    %42 = vector.broadcast %13 : vector<64x1xi32> to vector<64x64xi32>
    %43 = vector.broadcast %41 : vector<1x64xi32> to vector<64x64xi32>
    %44 = arith.cmpi eq, %42, %43 : vector<64x64xi32>
    %cst_14 = arith.constant 0x7F800000 : f32
    %45 = vector.broadcast %cst_14 : f32 to vector<64x64xf32>
    %46 = arith.select %44, %45, %31 : vector<64x64xi1>, vector<64x64xf32>
    %cst_15 = arith.constant dense<0x7F800000> : vector<64xf32>
    %47 = vector.multi_reduction <minimumf>, %46, %cst_15 [0] : vector<64x64xf32> to vector<64xf32>
    %48 = vector.shape_cast %47 : vector<64xf32> to vector<1x64xf32>
    %49 = vector.broadcast %48 : vector<1x64xf32> to vector<64x64xf32>
    %50 = arith.cmpf oeq, %46, %49 : vector<64x64xf32>
    %c64_i32_16 = arith.constant 64 : i32
    %51 = vector.shape_cast %13 : vector<64x1xi32> to vector<64x1xi32>
    %52 = vector.broadcast %51 : vector<64x1xi32> to vector<64x64xi32>
    %53 = vector.broadcast %c64_i32_16 : i32 to vector<64x64xi32>
    %54 = arith.select %50, %52, %53 : vector<64x64xi1>, vector<64x64xi32>
    %cst_17 = arith.constant dense<2147483647> : vector<64xi32>
    %55 = vector.multi_reduction <minsi>, %54, %cst_17 [0] : vector<64x64xi32> to vector<64xi32>
    %56 = vector.shape_cast %55 : vector<64xi32> to vector<1x64xi32>
    %c0_18 = arith.constant 0 : index
    %c1 = arith.constant 1 : index
    %c0_19 = arith.constant 0 : index
    %57 = vector.load %arg3[%c0_18, %c1, %c0_19] : memref<1x9x64xi32, #tpu.memory_space<vmem>>, vector<1x1x64xi32>
    %58 = vector.shape_cast %57 : vector<1x1x64xi32> to vector<1x64xi32>
    %59 = vector.shape_cast %56 : vector<1x64xi32> to vector<1x1x64xi32>
    tpu.vector_store %arg3[%c0_18, %c1, %c0_19], %59 {strides = array<i32>} : memref<1x9x64xi32, #tpu.memory_space<vmem>>, vector<1x1x64xi32>,
    %60 = vector.broadcast %13 : vector<64x1xi32> to vector<64x64xi32>
    %61 = vector.broadcast %56 : vector<1x64xi32> to vector<64x64xi32>
    %62 = arith.cmpi eq, %60, %61 : vector<64x64xi32>
    %cst_20 = arith.constant 0x7F800000 : f32
    %63 = vector.broadcast %cst_20 : f32 to vector<64x64xf32>
    %64 = arith.select %62, %63, %46 : vector<64x64xi1>, vector<64x64xf32>
    %cst_21 = arith.constant dense<0x7F800000> : vector<64xf32>
    %65 = vector.multi_reduction <minimumf>, %64, %cst_21 [0] : vector<64x64xf32> to vector<64xf32>
    %66 = vector.shape_cast %65 : vector<64xf32> to vector<1x64xf32>
    %67 = vector.broadcast %66 : vector<1x64xf32> to vector<64x64xf32>
    %68 = arith.cmpf oeq, %64, %67 : vector<64x64xf32>
    %c64_i32_22 = arith.constant 64 : i32
    %69 = vector.shape_cast %13 : vector<64x1xi32> to vector<64x1xi32>
    %70 = vector.broadcast %69 : vector<64x1xi32> to vector<64x64xi32>
    %71 = vector.broadcast %c64_i32_22 : i32 to vector<64x64xi32>
    %72 = arith.select %68, %70, %71 : vector<64x64xi1>, vector<64x64xi32>
    %cst_23 = arith.constant dense<2147483647> : vector<64xi32>
    %73 = vector.multi_reduction <minsi>, %72, %cst_23 [0] : vector<64x64xi32> to vector<64xi32>
    %74 = vector.shape_cast %73 : vector<64xi32> to vector<1x64xi32>
    %75 = vector.broadcast %13 : vector<64x1xi32> to vector<64x64xi32>
    %76 = vector.broadcast %74 : vector<1x64xi32> to vector<64x64xi32>
    %77 = arith.cmpi eq, %75, %76 : vector<64x64xi32>
    %cst_24 = arith.constant 0x7F800000 : f32
    %78 = vector.broadcast %cst_24 : f32 to vector<64x64xf32>
    %79 = arith.select %77, %78, %64 : vector<64x64xi1>, vector<64x64xf32>
    %cst_25 = arith.constant dense<0x7F800000> : vector<64xf32>
    %80 = vector.multi_reduction <minimumf>, %79, %cst_25 [0] : vector<64x64xf32> to vector<64xf32>
    %81 = vector.shape_cast %80 : vector<64xf32> to vector<1x64xf32>
    %82 = vector.broadcast %81 : vector<1x64xf32> to vector<64x64xf32>
    %83 = arith.cmpf oeq, %79, %82 : vector<64x64xf32>
    %c64_i32_26 = arith.constant 64 : i32
    %84 = vector.shape_cast %13 : vector<64x1xi32> to vector<64x1xi32>
    %85 = vector.broadcast %84 : vector<64x1xi32> to vector<64x64xi32>
    %86 = vector.broadcast %c64_i32_26 : i32 to vector<64x64xi32>
    %87 = arith.select %83, %85, %86 : vector<64x64xi1>, vector<64x64xi32>
    %cst_27 = arith.constant dense<2147483647> : vector<64xi32>
    %88 = vector.multi_reduction <minsi>, %87, %cst_27 [0] : vector<64x64xi32> to vector<64xi32>
    %89 = vector.shape_cast %88 : vector<64xi32> to vector<1x64xi32>
    %c0_28 = arith.constant 0 : index
    %c2 = arith.constant 2 : index
    %c0_29 = arith.constant 0 : index
    %90 = vector.load %arg3[%c0_28, %c2, %c0_29] : memref<1x9x64xi32, #tpu.memory_space<vmem>>, vector<1x1x64xi32>
    %91 = vector.shape_cast %90 : vector<1x1x64xi32> to vector<1x64xi32>
    %92 = vector.shape_cast %89 : vector<1x64xi32> to vector<1x1x64xi32>
    tpu.vector_store %arg3[%c0_28, %c2, %c0_29], %92 {strides = array<i32>} : memref<1x9x64xi32, #tpu.memory_space<vmem>>, vector<1x1x64xi32>,
    %93 = vector.broadcast %13 : vector<64x1xi32> to vector<64x64xi32>
    %94 = vector.broadcast %89 : vector<1x64xi32> to vector<64x64xi32>
    %95 = arith.cmpi eq, %93, %94 : vector<64x64xi32>
    %cst_30 = arith.constant 0x7F800000 : f32
    %96 = vector.broadcast %cst_30 : f32 to vector<64x64xf32>
    %97 = arith.select %95, %96, %79 : vector<64x64xi1>, vector<64x64xf32>
    %cst_31 = arith.constant dense<0x7F800000> : vector<64xf32>
    %98 = vector.multi_reduction <minimumf>, %97, %cst_31 [0] : vector<64x64xf32> to vector<64xf32>
    %99 = vector.shape_cast %98 : vector<64xf32> to vector<1x64xf32>
    %100 = vector.broadcast %99 : vector<1x64xf32> to vector<64x64xf32>
    %101 = arith.cmpf oeq, %97, %100 : vector<64x64xf32>
    %c64_i32_32 = arith.constant 64 : i32
    %102 = vector.shape_cast %13 : vector<64x1xi32> to vector<64x1xi32>
    %103 = vector.broadcast %102 : vector<64x1xi32> to vector<64x64xi32>
    %104 = vector.broadcast %c64_i32_32 : i32 to vector<64x64xi32>
    %105 = arith.select %101, %103, %104 : vector<64x64xi1>, vector<64x64xi32>
    %cst_33 = arith.constant dense<2147483647> : vector<64xi32>
    %106 = vector.multi_reduction <minsi>, %105, %cst_33 [0] : vector<64x64xi32> to vector<64xi32>
    %107 = vector.shape_cast %106 : vector<64xi32> to vector<1x64xi32>
    %108 = vector.broadcast %13 : vector<64x1xi32> to vector<64x64xi32>
    %109 = vector.broadcast %107 : vector<1x64xi32> to vector<64x64xi32>
    %110 = arith.cmpi eq, %108, %109 : vector<64x64xi32>
    %cst_34 = arith.constant 0x7F800000 : f32
    %111 = vector.broadcast %cst_34 : f32 to vector<64x64xf32>
    %112 = arith.select %110, %111, %97 : vector<64x64xi1>, vector<64x64xf32>
    %cst_35 = arith.constant dense<0x7F800000> : vector<64xf32>
    %113 = vector.multi_reduction <minimumf>, %112, %cst_35 [0] : vector<64x64xf32> to vector<64xf32>
    %114 = vector.shape_cast %113 : vector<64xf32> to vector<1x64xf32>
    %115 = vector.broadcast %114 : vector<1x64xf32> to vector<64x64xf32>
    %116 = arith.cmpf oeq, %112, %115 : vector<64x64xf32>
    %c64_i32_36 = arith.constant 64 : i32
    %117 = vector.shape_cast %13 : vector<64x1xi32> to vector<64x1xi32>
    %118 = vector.broadcast %117 : vector<64x1xi32> to vector<64x64xi32>
    %119 = vector.broadcast %c64_i32_36 : i32 to vector<64x64xi32>
    %120 = arith.select %116, %118, %119 : vector<64x64xi1>, vector<64x64xi32>
    %cst_37 = arith.constant dense<2147483647> : vector<64xi32>
    %121 = vector.multi_reduction <minsi>, %120, %cst_37 [0] : vector<64x64xi32> to vector<64xi32>
    %122 = vector.shape_cast %121 : vector<64xi32> to vector<1x64xi32>
    %c0_38 = arith.constant 0 : index
    %c3 = arith.constant 3 : index
    %c0_39 = arith.constant 0 : index
    %123 = vector.load %arg3[%c0_38, %c3, %c0_39] : memref<1x9x64xi32, #tpu.memory_space<vmem>>, vector<1x1x64xi32>
    %124 = vector.shape_cast %123 : vector<1x1x64xi32> to vector<1x64xi32>
    %125 = vector.shape_cast %122 : vector<1x64xi32> to vector<1x1x64xi32>
    tpu.vector_store %arg3[%c0_38, %c3, %c0_39], %125 {strides = array<i32>} : memref<1x9x64xi32, #tpu.memory_space<vmem>>, vector<1x1x64xi32>,
    %126 = vector.broadcast %13 : vector<64x1xi32> to vector<64x64xi32>
    %127 = vector.broadcast %122 : vector<1x64xi32> to vector<64x64xi32>
    %128 = arith.cmpi eq, %126, %127 : vector<64x64xi32>
    %cst_40 = arith.constant 0x7F800000 : f32
    %129 = vector.broadcast %cst_40 : f32 to vector<64x64xf32>
    %130 = arith.select %128, %129, %112 : vector<64x64xi1>, vector<64x64xf32>
    %cst_41 = arith.constant dense<0x7F800000> : vector<64xf32>
    %131 = vector.multi_reduction <minimumf>, %130, %cst_41 [0] : vector<64x64xf32> to vector<64xf32>
    %132 = vector.shape_cast %131 : vector<64xf32> to vector<1x64xf32>
    %133 = vector.broadcast %132 : vector<1x64xf32> to vector<64x64xf32>
    %134 = arith.cmpf oeq, %130, %133 : vector<64x64xf32>
    %c64_i32_42 = arith.constant 64 : i32
    %135 = vector.shape_cast %13 : vector<64x1xi32> to vector<64x1xi32>
    %136 = vector.broadcast %135 : vector<64x1xi32> to vector<64x64xi32>
    %137 = vector.broadcast %c64_i32_42 : i32 to vector<64x64xi32>
    %138 = arith.select %134, %136, %137 : vector<64x64xi1>, vector<64x64xi32>
    %cst_43 = arith.constant dense<2147483647> : vector<64xi32>
    %139 = vector.multi_reduction <minsi>, %138, %cst_43 [0] : vector<64x64xi32> to vector<64xi32>
    %140 = vector.shape_cast %139 : vector<64xi32> to vector<1x64xi32>
    %141 = vector.broadcast %13 : vector<64x1xi32> to vector<64x64xi32>
    %142 = vector.broadcast %140 : vector<1x64xi32> to vector<64x64xi32>
    %143 = arith.cmpi eq, %141, %142 : vector<64x64xi32>
    %cst_44 = arith.constant 0x7F800000 : f32
    %144 = vector.broadcast %cst_44 : f32 to vector<64x64xf32>
    %145 = arith.select %143, %144, %130 : vector<64x64xi1>, vector<64x64xf32>
    %cst_45 = arith.constant dense<0x7F800000> : vector<64xf32>
    %146 = vector.multi_reduction <minimumf>, %145, %cst_45 [0] : vector<64x64xf32> to vector<64xf32>
    %147 = vector.shape_cast %146 : vector<64xf32> to vector<1x64xf32>
    %148 = vector.broadcast %147 : vector<1x64xf32> to vector<64x64xf32>
    %149 = arith.cmpf oeq, %145, %148 : vector<64x64xf32>
    %c64_i32_46 = arith.constant 64 : i32
    %150 = vector.shape_cast %13 : vector<64x1xi32> to vector<64x1xi32>
    %151 = vector.broadcast %150 : vector<64x1xi32> to vector<64x64xi32>
    %152 = vector.broadcast %c64_i32_46 : i32 to vector<64x64xi32>
    %153 = arith.select %149, %151, %152 : vector<64x64xi1>, vector<64x64xi32>
    %cst_47 = arith.constant dense<2147483647> : vector<64xi32>
    %154 = vector.multi_reduction <minsi>, %153, %cst_47 [0] : vector<64x64xi32> to vector<64xi32>
    %155 = vector.shape_cast %154 : vector<64xi32> to vector<1x64xi32>
    %c0_48 = arith.constant 0 : index
    %c4 = arith.constant 4 : index
    %c0_49 = arith.constant 0 : index
    %156 = vector.load %arg3[%c0_48, %c4, %c0_49] : memref<1x9x64xi32, #tpu.memory_space<vmem>>, vector<1x1x64xi32>
    %157 = vector.shape_cast %156 : vector<1x1x64xi32> to vector<1x64xi32>
    %158 = vector.shape_cast %155 : vector<1x64xi32> to vector<1x1x64xi32>
    tpu.vector_store %arg3[%c0_48, %c4, %c0_49], %158 {strides = array<i32>} : memref<1x9x64xi32, #tpu.memory_space<vmem>>, vector<1x1x64xi32>,
    %159 = vector.broadcast %13 : vector<64x1xi32> to vector<64x64xi32>
    %160 = vector.broadcast %155 : vector<1x64xi32> to vector<64x64xi32>
    %161 = arith.cmpi eq, %159, %160 : vector<64x64xi32>
    %cst_50 = arith.constant 0x7F800000 : f32
    %162 = vector.broadcast %cst_50 : f32 to vector<64x64xf32>
    %163 = arith.select %161, %162, %145 : vector<64x64xi1>, vector<64x64xf32>
    %cst_51 = arith.constant dense<0x7F800000> : vector<64xf32>
    %164 = vector.multi_reduction <minimumf>, %163, %cst_51 [0] : vector<64x64xf32> to vector<64xf32>
    %165 = vector.shape_cast %164 : vector<64xf32> to vector<1x64xf32>
    %166 = vector.broadcast %165 : vector<1x64xf32> to vector<64x64xf32>
    %167 = arith.cmpf oeq, %163, %166 : vector<64x64xf32>
    %c64_i32_52 = arith.constant 64 : i32
    %168 = vector.shape_cast %13 : vector<64x1xi32> to vector<64x1xi32>
    %169 = vector.broadcast %168 : vector<64x1xi32> to vector<64x64xi32>
    %170 = vector.broadcast %c64_i32_52 : i32 to vector<64x64xi32>
    %171 = arith.select %167, %169, %170 : vector<64x64xi1>, vector<64x64xi32>
    %cst_53 = arith.constant dense<2147483647> : vector<64xi32>
    %172 = vector.multi_reduction <minsi>, %171, %cst_53 [0] : vector<64x64xi32> to vector<64xi32>
    %173 = vector.shape_cast %172 : vector<64xi32> to vector<1x64xi32>
    %174 = vector.broadcast %13 : vector<64x1xi32> to vector<64x64xi32>
    %175 = vector.broadcast %173 : vector<1x64xi32> to vector<64x64xi32>
    %176 = arith.cmpi eq, %174, %175 : vector<64x64xi32>
    %cst_54 = arith.constant 0x7F800000 : f32
    %177 = vector.broadcast %cst_54 : f32 to vector<64x64xf32>
    %178 = arith.select %176, %177, %163 : vector<64x64xi1>, vector<64x64xf32>
    %cst_55 = arith.constant dense<0x7F800000> : vector<64xf32>
    %179 = vector.multi_reduction <minimumf>, %178, %cst_55 [0] : vector<64x64xf32> to vector<64xf32>
    %180 = vector.shape_cast %179 : vector<64xf32> to vector<1x64xf32>
    %181 = vector.broadcast %180 : vector<1x64xf32> to vector<64x64xf32>
    %182 = arith.cmpf oeq, %178, %181 : vector<64x64xf32>
    %c64_i32_56 = arith.constant 64 : i32
    %183 = vector.shape_cast %13 : vector<64x1xi32> to vector<64x1xi32>
    %184 = vector.broadcast %183 : vector<64x1xi32> to vector<64x64xi32>
    %185 = vector.broadcast %c64_i32_56 : i32 to vector<64x64xi32>
    %186 = arith.select %182, %184, %185 : vector<64x64xi1>, vector<64x64xi32>
    %cst_57 = arith.constant dense<2147483647> : vector<64xi32>
    %187 = vector.multi_reduction <minsi>, %186, %cst_57 [0] : vector<64x64xi32> to vector<64xi32>
    %188 = vector.shape_cast %187 : vector<64xi32> to vector<1x64xi32>
    %c0_58 = arith.constant 0 : index
    %c5 = arith.constant 5 : index
    %c0_59 = arith.constant 0 : index
    %189 = vector.load %arg3[%c0_58, %c5, %c0_59] : memref<1x9x64xi32, #tpu.memory_space<vmem>>, vector<1x1x64xi32>
    %190 = vector.shape_cast %189 : vector<1x1x64xi32> to vector<1x64xi32>
    %191 = vector.shape_cast %188 : vector<1x64xi32> to vector<1x1x64xi32>
    tpu.vector_store %arg3[%c0_58, %c5, %c0_59], %191 {strides = array<i32>} : memref<1x9x64xi32, #tpu.memory_space<vmem>>, vector<1x1x64xi32>,
    %192 = vector.broadcast %13 : vector<64x1xi32> to vector<64x64xi32>
    %193 = vector.broadcast %188 : vector<1x64xi32> to vector<64x64xi32>
    %194 = arith.cmpi eq, %192, %193 : vector<64x64xi32>
    %cst_60 = arith.constant 0x7F800000 : f32
    %195 = vector.broadcast %cst_60 : f32 to vector<64x64xf32>
    %196 = arith.select %194, %195, %178 : vector<64x64xi1>, vector<64x64xf32>
    %cst_61 = arith.constant dense<0x7F800000> : vector<64xf32>
    %197 = vector.multi_reduction <minimumf>, %196, %cst_61 [0] : vector<64x64xf32> to vector<64xf32>
    %198 = vector.shape_cast %197 : vector<64xf32> to vector<1x64xf32>
    %199 = vector.broadcast %198 : vector<1x64xf32> to vector<64x64xf32>
    %200 = arith.cmpf oeq, %196, %199 : vector<64x64xf32>
    %c64_i32_62 = arith.constant 64 : i32
    %201 = vector.shape_cast %13 : vector<64x1xi32> to vector<64x1xi32>
    %202 = vector.broadcast %201 : vector<64x1xi32> to vector<64x64xi32>
    %203 = vector.broadcast %c64_i32_62 : i32 to vector<64x64xi32>
    %204 = arith.select %200, %202, %203 : vector<64x64xi1>, vector<64x64xi32>
    %cst_63 = arith.constant dense<2147483647> : vector<64xi32>
    %205 = vector.multi_reduction <minsi>, %204, %cst_63 [0] : vector<64x64xi32> to vector<64xi32>
    %206 = vector.shape_cast %205 : vector<64xi32> to vector<1x64xi32>
    %207 = vector.broadcast %13 : vector<64x1xi32> to vector<64x64xi32>
    %208 = vector.broadcast %206 : vector<1x64xi32> to vector<64x64xi32>
    %209 = arith.cmpi eq, %207, %208 : vector<64x64xi32>
    %cst_64 = arith.constant 0x7F800000 : f32
    %210 = vector.broadcast %cst_64 : f32 to vector<64x64xf32>
    %211 = arith.select %209, %210, %196 : vector<64x64xi1>, vector<64x64xf32>
    %cst_65 = arith.constant dense<0x7F800000> : vector<64xf32>
    %212 = vector.multi_reduction <minimumf>, %211, %cst_65 [0] : vector<64x64xf32> to vector<64xf32>
    %213 = vector.shape_cast %212 : vector<64xf32> to vector<1x64xf32>
    %214 = vector.broadcast %213 : vector<1x64xf32> to vector<64x64xf32>
    %215 = arith.cmpf oeq, %211, %214 : vector<64x64xf32>
    %c64_i32_66 = arith.constant 64 : i32
    %216 = vector.shape_cast %13 : vector<64x1xi32> to vector<64x1xi32>
    %217 = vector.broadcast %216 : vector<64x1xi32> to vector<64x64xi32>
    %218 = vector.broadcast %c64_i32_66 : i32 to vector<64x64xi32>
    %219 = arith.select %215, %217, %218 : vector<64x64xi1>, vector<64x64xi32>
    %cst_67 = arith.constant dense<2147483647> : vector<64xi32>
    %220 = vector.multi_reduction <minsi>, %219, %cst_67 [0] : vector<64x64xi32> to vector<64xi32>
    %221 = vector.shape_cast %220 : vector<64xi32> to vector<1x64xi32>
    %c0_68 = arith.constant 0 : index
    %c6 = arith.constant 6 : index
    %c0_69 = arith.constant 0 : index
    %222 = vector.load %arg3[%c0_68, %c6, %c0_69] : memref<1x9x64xi32, #tpu.memory_space<vmem>>, vector<1x1x64xi32>
    %223 = vector.shape_cast %222 : vector<1x1x64xi32> to vector<1x64xi32>
    %224 = vector.shape_cast %221 : vector<1x64xi32> to vector<1x1x64xi32>
    tpu.vector_store %arg3[%c0_68, %c6, %c0_69], %224 {strides = array<i32>} : memref<1x9x64xi32, #tpu.memory_space<vmem>>, vector<1x1x64xi32>,
    %225 = vector.broadcast %13 : vector<64x1xi32> to vector<64x64xi32>
    %226 = vector.broadcast %221 : vector<1x64xi32> to vector<64x64xi32>
    %227 = arith.cmpi eq, %225, %226 : vector<64x64xi32>
    %cst_70 = arith.constant 0x7F800000 : f32
    %228 = vector.broadcast %cst_70 : f32 to vector<64x64xf32>
    %229 = arith.select %227, %228, %211 : vector<64x64xi1>, vector<64x64xf32>
    %cst_71 = arith.constant dense<0x7F800000> : vector<64xf32>
    %230 = vector.multi_reduction <minimumf>, %229, %cst_71 [0] : vector<64x64xf32> to vector<64xf32>
    %231 = vector.shape_cast %230 : vector<64xf32> to vector<1x64xf32>
    %232 = vector.broadcast %231 : vector<1x64xf32> to vector<64x64xf32>
    %233 = arith.cmpf oeq, %229, %232 : vector<64x64xf32>
    %c64_i32_72 = arith.constant 64 : i32
    %234 = vector.shape_cast %13 : vector<64x1xi32> to vector<64x1xi32>
    %235 = vector.broadcast %234 : vector<64x1xi32> to vector<64x64xi32>
    %236 = vector.broadcast %c64_i32_72 : i32 to vector<64x64xi32>
    %237 = arith.select %233, %235, %236 : vector<64x64xi1>, vector<64x64xi32>
    %cst_73 = arith.constant dense<2147483647> : vector<64xi32>
    %238 = vector.multi_reduction <minsi>, %237, %cst_73 [0] : vector<64x64xi32> to vector<64xi32>
    %239 = vector.shape_cast %238 : vector<64xi32> to vector<1x64xi32>
    %240 = vector.broadcast %13 : vector<64x1xi32> to vector<64x64xi32>
    %241 = vector.broadcast %239 : vector<1x64xi32> to vector<64x64xi32>
    %242 = arith.cmpi eq, %240, %241 : vector<64x64xi32>
    %cst_74 = arith.constant 0x7F800000 : f32
    %243 = vector.broadcast %cst_74 : f32 to vector<64x64xf32>
    %244 = arith.select %242, %243, %229 : vector<64x64xi1>, vector<64x64xf32>
    %cst_75 = arith.constant dense<0x7F800000> : vector<64xf32>
    %245 = vector.multi_reduction <minimumf>, %244, %cst_75 [0] : vector<64x64xf32> to vector<64xf32>
    %246 = vector.shape_cast %245 : vector<64xf32> to vector<1x64xf32>
    %247 = vector.broadcast %246 : vector<1x64xf32> to vector<64x64xf32>
    %248 = arith.cmpf oeq, %244, %247 : vector<64x64xf32>
    %c64_i32_76 = arith.constant 64 : i32
    %249 = vector.shape_cast %13 : vector<64x1xi32> to vector<64x1xi32>
    %250 = vector.broadcast %249 : vector<64x1xi32> to vector<64x64xi32>
    %251 = vector.broadcast %c64_i32_76 : i32 to vector<64x64xi32>
    %252 = arith.select %248, %250, %251 : vector<64x64xi1>, vector<64x64xi32>
    %cst_77 = arith.constant dense<2147483647> : vector<64xi32>
    %253 = vector.multi_reduction <minsi>, %252, %cst_77 [0] : vector<64x64xi32> to vector<64xi32>
    %254 = vector.shape_cast %253 : vector<64xi32> to vector<1x64xi32>
    %c0_78 = arith.constant 0 : index
    %c7 = arith.constant 7 : index
    %c0_79 = arith.constant 0 : index
    %255 = vector.load %arg3[%c0_78, %c7, %c0_79] : memref<1x9x64xi32, #tpu.memory_space<vmem>>, vector<1x1x64xi32>
    %256 = vector.shape_cast %255 : vector<1x1x64xi32> to vector<1x64xi32>
    %257 = vector.shape_cast %254 : vector<1x64xi32> to vector<1x1x64xi32>
    tpu.vector_store %arg3[%c0_78, %c7, %c0_79], %257 {strides = array<i32>} : memref<1x9x64xi32, #tpu.memory_space<vmem>>, vector<1x1x64xi32>,
    %258 = vector.broadcast %13 : vector<64x1xi32> to vector<64x64xi32>
    %259 = vector.broadcast %254 : vector<1x64xi32> to vector<64x64xi32>
    %260 = arith.cmpi eq, %258, %259 : vector<64x64xi32>
    %cst_80 = arith.constant 0x7F800000 : f32
    %261 = vector.broadcast %cst_80 : f32 to vector<64x64xf32>
    %262 = arith.select %260, %261, %244 : vector<64x64xi1>, vector<64x64xf32>
    %cst_81 = arith.constant dense<0x7F800000> : vector<64xf32>
    %263 = vector.multi_reduction <minimumf>, %262, %cst_81 [0] : vector<64x64xf32> to vector<64xf32>
    %264 = vector.shape_cast %263 : vector<64xf32> to vector<1x64xf32>
    %265 = vector.broadcast %264 : vector<1x64xf32> to vector<64x64xf32>
    %266 = arith.cmpf oeq, %262, %265 : vector<64x64xf32>
    %c64_i32_82 = arith.constant 64 : i32
    %267 = vector.shape_cast %13 : vector<64x1xi32> to vector<64x1xi32>
    %268 = vector.broadcast %267 : vector<64x1xi32> to vector<64x64xi32>
    %269 = vector.broadcast %c64_i32_82 : i32 to vector<64x64xi32>
    %270 = arith.select %266, %268, %269 : vector<64x64xi1>, vector<64x64xi32>
    %cst_83 = arith.constant dense<2147483647> : vector<64xi32>
    %271 = vector.multi_reduction <minsi>, %270, %cst_83 [0] : vector<64x64xi32> to vector<64xi32>
    %272 = vector.shape_cast %271 : vector<64xi32> to vector<1x64xi32>
    %273 = vector.broadcast %13 : vector<64x1xi32> to vector<64x64xi32>
    %274 = vector.broadcast %272 : vector<1x64xi32> to vector<64x64xi32>
    %275 = arith.cmpi eq, %273, %274 : vector<64x64xi32>
    %cst_84 = arith.constant 0x7F800000 : f32
    %276 = vector.broadcast %cst_84 : f32 to vector<64x64xf32>
    %277 = arith.select %275, %276, %262 : vector<64x64xi1>, vector<64x64xf32>
    %cst_85 = arith.constant dense<0x7F800000> : vector<64xf32>
    %278 = vector.multi_reduction <minimumf>, %277, %cst_85 [0] : vector<64x64xf32> to vector<64xf32>
    %279 = vector.shape_cast %278 : vector<64xf32> to vector<1x64xf32>
    %280 = vector.broadcast %279 : vector<1x64xf32> to vector<64x64xf32>
    %281 = arith.cmpf oeq, %277, %280 : vector<64x64xf32>
    %c64_i32_86 = arith.constant 64 : i32
    %282 = vector.shape_cast %13 : vector<64x1xi32> to vector<64x1xi32>
    %283 = vector.broadcast %282 : vector<64x1xi32> to vector<64x64xi32>
    %284 = vector.broadcast %c64_i32_86 : i32 to vector<64x64xi32>
    %285 = arith.select %281, %283, %284 : vector<64x64xi1>, vector<64x64xi32>
    %cst_87 = arith.constant dense<2147483647> : vector<64xi32>
    %286 = vector.multi_reduction <minsi>, %285, %cst_87 [0] : vector<64x64xi32> to vector<64xi32>
    %287 = vector.shape_cast %286 : vector<64xi32> to vector<1x64xi32>
    %c0_88 = arith.constant 0 : index
    %c8 = arith.constant 8 : index
    %c0_89 = arith.constant 0 : index
    %288 = vector.load %arg3[%c0_88, %c8, %c0_89] : memref<1x9x64xi32, #tpu.memory_space<vmem>>, vector<1x1x64xi32>
    %289 = vector.shape_cast %288 : vector<1x1x64xi32> to vector<1x64xi32>
    %290 = vector.shape_cast %287 : vector<1x64xi32> to vector<1x1x64xi32>
    tpu.vector_store %arg3[%c0_88, %c8, %c0_89], %290 {strides = array<i32>} : memref<1x9x64xi32, #tpu.memory_space<vmem>>, vector<1x1x64xi32>,
    return
  }
  func.func @transform_0(%arg0: i32, %arg1: i32) -> (i32, i32, i32) {
    %c0_i32 = arith.constant 0 : i32
    %c0_i32_0 = arith.constant 0 : i32
    return %arg0, %c0_i32, %arg1 : i32, i32, i32
  }
  func.func @transform_1(%arg0: i32, %arg1: i32) -> (i32, i32, i32) {
    %c0_i32 = arith.constant 0 : i32
    %c0_i32_0 = arith.constant 0 : i32
    return %arg0, %c0_i32, %arg1 : i32, i32, i32
  }
}

</mosaic_0001>

<bundles_post_ra>
// kernel: tpu_custom_call.1
= control target key start
LH: loop header
LB: loop body
LE: loop exit
PB: predicated region body
PF: predicated region fallthrough
CT: control target
= control target key end

     0   :  { %6 = vsyncpa [#allocation3], 0  ;;  %s3303_s0 = inlined_call_operand.hbm [shape: f32[2,4,64], index: 0, kind: input, shape index: {}]   ;;  %s3304_s1 = inlined_call_operand.vmem [shape: s32[2,9,64], index: 1, kind: output, shape index: {}]  }
   0x1   :  { %8 = vsyncpa [#allocation3 + $0x1], 0  ;;  %s1988_s6 = smov 0   ;;  %s1990_s7 = smov 0  }
   0x2   :  { %s1992_s8 = smov 0   ;;  %s1994_s9 = smov 0  }
   0x3   :  { %s1996_s10 = smov 0   ;;  %s1998_s11 = smov 0  }
   0x4 LB: > { %s1813_s12 = sadd.s32 4294967295, %s1976_s11   ;;  %s26_s13 = sadd.s32 1, %s1972_s10  ;;  %s1976_s11 = sphi %s1998_s11, %s14_s11   ;;  %s1972_s10 = sphi %s1996_s10, %s3311_s10   ;;  %s1968_s9 = sphi %s1994_s9, %s3310_s9   ;;  %s1964_s8 = sphi %s1992_s8, %s3309_s8   ;;  %s1960_s7 = sphi %s1990_s7, %s3308_s7   ;;  %s1956_s6 = sphi %s1988_s6, %s3307_s6  }
   0x5   : > { %p28_p0 = scmp.ge.s32.totalorder %s26_s13, 2  ;;  %s35_s14 = sadd.s32 1, %s1964_s8 }
   0x6   : > { %p42_p1 = scmp.ne.s32.totalorder %s1964_s8, %s1960_s7  ;;  %p43_p2 = scmp.eq.s32.totalorder %s1976_s11, 0 }
   0x7   : > { %s3313_s13 = smov (%p28_p0, %s26_s13), 0  ;;  %p48_p4 = scmp.ne.s32.totalorder %s1960_s7, %s1956_s6 }
   0x8   : > { %p2024_p3 = por %p43_p2, %p42_p1  ;;  %s30_s16 = ssub.s32 %s1972_s10, %s3313_s13 }
   0x9   : > { %p49_p5 = scmp.eq.s32.totalorder %s1813_s12, 0  ;;  %p33_p6 = scmp.eq.s32.totalorder %s30_s16, 0 }
   0xa   : > { %p1844_p8 = scmp.lt.s32.totalorder %s1976_s11, 2  ;;  %s100_s19 = sand.u32 1, %s1964_s8  }
   0xb   : > { %p2031_p7 = por %p49_p5, %p48_p4  ;;  %s1818_s20 = sshll.u32 %s1972_s10, 2 }
   0xc   : > { %s2037_s18 = scalar_select %p33_p6, %s1964_s8, %s35_s14  }
   0xd   : > { %s1817_s21 = sshll.u32 %s100_s19, 2  ;;  %s109_s24 = scalar_lea.hbm %s3303_s0, %s1818_s20 }
   0xe   : > { %s111_s25 = sshll.u32 %s109_s24, 4  ;;  %s104_s26 = scalar_lea.vmem [#allocation2], %s1817_s21  ;;  %s112_s25 = int_to_ptr.hbm [resolvable:$true] %s111_s25 }
   0xf   : > { %s113_s27 = sshll.u32 %s104_s26, 4  ;;  %p1841_p9 = pnand %p1844_p8, %p2024_p3  ;;  %s114_s27 = int_to_ptr.vmem [resolvable:$true] %s113_s27 }
  0x10   : > { %p1819_p10 = scmp.ge.s32.totalorder %s1976_s11, 1  ;;  %p118_p11 = scmp.lt.s32.totalorder %s1976_s11, 3 }
  0x11   : > { %s101_s28 = scalar_lea.sflag [#allocation3], %s100_s19 }
  0x12   : > { %1843 = dma.hbm_to_vmem [thread:$0]  (!%p1841_p9), %s112_s25, 64, %s114_s27, %s101_s28  }
  0x13   : > { %p119_p12 = pnand %p1819_p10, %p118_p11 }
  0x14   : > { %s124_s29 = sand.u32 (!%p119_p12), 1, %s1960_s7  }
  0x15   : > { %122 = sbr.rel (%p119_p12) target bundleno = 1249 (0x4e1), region = 24  ;;  %s1820_s30 = sshll.u32 (!%p119_p12), %s124_s29, 2 }
  0x16   : > { %s125_s2 = scalar_lea.sflag (!%p119_p12), [#allocation3], %s124_s29  ;;  %s128_s3 = scalar_lea.vmem (!%p119_p12), [#allocation2], %s1820_s30 }
  0x1a   : > { %1951 = dma.done.wait (%p2031_p7), %s125_s2, 64  }
  0x1b   : > { %1953 = vsyncadd (%p2031_p7), %s125_s2, 4294967232  ;;  %v159_v0 = vld [vmem:[%s128_s3] sm:$0xf]  ;;  %vm161_vm0 = vcmask 519168   ;;  %vm238_vm4 = vcmask 1043456   ;;  %vm213_vm5 = vcmask 31744   ;;  %v291_v58 = vlaneseq }
  0x1c   : > { %v160_v1 = vmul.f32 %v159_v0, %v159_v0  ;;  %vm300_vm6 = vcmask 523264   ;;  %p151_p13 = scmp.lt.s32.totalorder %s1968_s9, 1 }
  0x1d   : > { %v2093_v61 = vshrl.u32 %v291_v58, 7 }
  0x1e   : > { %v162_v2 = vsel %vm161_vm0, %v160_v1, 0.0  ;;  %s3315_s9 = smov (!%p151_p13, %s1968_s9), 1 }
  0x1f   : > { %v163_v3 = vrot.slane %v162_v2, 4  ;;  %v2099_v1 = vadd.s32 16, %v2093_v61  ;;  %s1834_s4 = sshll.u32 %s3315_s9, 4 }
  0x20   : > { %s2145_s12 = scalar_lea.vmem %s3304_s1, %s1834_s4 }
  0x21   : > { %v164_v4 = vadd.f32 %v163_v3, %v162_v2  ;;  %v2102_v2 = vadd.s32 24, %v2093_v61 }
  0x23   : > { %v165_v5 = vrot.slane %v164_v4, 2 }
  0x25   : > { %v166_v6 = vadd.f32 %v165_v5, %v164_v4  ;;  %v2105_v4 = vadd.s32 32, %v2093_v61  ;;  %v2108_v5 = vadd.s32 40, %v2093_v61 }
  0x27   : > { %v167_v7 = vrot.slane %v166_v6, 1 }
  0x29   : > { %v168_v8 = vadd.f32 %v167_v7, %v166_v6  ;;  %v2111_v6 = vadd.s32 48, %v2093_v61  ;;  %v2114_v7 = vadd.s32 56, %v2093_v61 }
  0x2b   : > { %v169_v9 = vmax.f32 %v168_v8, 1e-24 }
  0x2d   : > { %1894 = vrsqrt.f32 %v169_v9  ;;  %vm176_vm1 = vweird.f32 %v169_v9 }
  0x33   : > { %v1895_v10 = vpop.eup %1894 }
  0x34   : > { %v171_v11 = vmul.f32 %v1895_v10, %v169_v9  ;;  %vm177_vm2 = vweird.f32 %v1895_v10 }
  0x35   : > { %vm178_vm3 = vmor %vm176_vm1, %vm177_vm2 }
  0x36   : > { %v172_v12 = vmul.f32 %v1895_v10, %v171_v11 }
  0x38   : > { %v173_v13 = vmul.f32 0.5, %v172_v12 }
  0x3a   : > { %v174_v14 = vsub.f32 1.5, %v173_v13 }
  0x3c   : > { %v175_v15 = vmul.f32 %v1895_v10, %v174_v14 }
  0x3e   : > { %v179_v16 = vsel %vm178_vm3, %v1895_v10, %v175_v15 }
  0x3f   : > { %v180_v17 = vmul.f32 %v179_v16, %v159_v0  ;;  %v2096_v0 = vadd.s32 8, %v2093_v61 }
  0x41   : > { %181 = vxpose.xlu0.b32.start.end [1/1] (short) (narrow) %v180_v17, 64  ;;  %1823 = vmatpush.msk.msra.mxu0 %vm238_vm4, %v180_v17 }
  0x42   : > { %1835 = vmatpush.msk.msra.mxu1 %vm238_vm4, %v180_v17  ;;  %1836 = vmatpush.msk.msra.mxu2 %vm238_vm4, %v180_v17 }
  0x43   : > { %1837 = vmatpush.msk.msra.mxu3 %vm238_vm4, %v180_v17 }
  0xe5   : > { %v197_v18 = vpop.trf.xlu0 }
  0xe6   : > { %1824 = vmatmul.msk.f32.vlgmr.msra.gmra.mxu0 %vm213_vm5, %v197_v18 }
  0xed   : > { %v198_v19 = vpop.trf.xlu0 }
  0xee   : > { %1825 = vmatmul.msk.f32.gmra.mxu0 %vm213_vm5, %v198_v19 }
  0xf5   : > { %v199_v20 = vpop.trf.xlu0 }
  0xf6   : > { %1826 = vmatmul.msk.f32.vlgmr.msra.gmra.mxu1 %vm213_vm5, %v199_v20 }
  0xfd   : > { %v200_v21 = vpop.trf.xlu0 }
  0xfe   : > { %1827 = vmatmul.msk.f32.gmra.mxu1 %vm213_vm5, %v200_v21 }
 0x105   : > { %v201_v22 = vpop.trf.xlu0 }
 0x106   : > { %1828 = vmatmul.msk.f32.vlgmr.msra.gmra.mxu2 %vm213_vm5, %v201_v22 }
 0x10d   : > { %v202_v23 = vpop.trf.xlu0 }
 0x10e   : > { %1829 = vmatmul.msk.f32.gmra.mxu2 %vm213_vm5, %v202_v23 }
 0x115   : > { %v203_v24 = vpop.trf.xlu0 }
 0x116   : > { %1830 = vmatmul.msk.f32.vlgmr.msra.gmra.mxu3 %vm213_vm5, %v203_v24 }
 0x11d   : > { %v204_v25 = vpop.trf.xlu0 }
 0x11e   : > { %1831 = vmatmul.msk.f32.gmra.mxu3 %vm213_vm5, %v204_v25 }
 0x163   : > { %v259_v27 = vpop.f32.mrf.mxu0 }
 0x164   : > { %v2069_v37 = vsub.f32 0.0, %v259_v27 }
 0x166   : > { %v301_v47 = vsel %vm300_vm6, %v2069_v37, inf }
 0x16b   : > { %v262_v31 = vpop.f32.mrf.mxu0 }
 0x16c   : > { %v2063_v34 = vsub.f32 0.0, %v262_v31 }
 0x16e   : > { %v302_v42 = vsel %vm300_vm6, %v2063_v34, inf }
 0x173   : > { %v265_v28 = vpop.f32.mrf.mxu1 }
 0x174   : > { %v2071_v38 = vsub.f32 0.0, %v265_v28 }
 0x176   : > { %v303_v48 = vsel %vm300_vm6, %v2071_v38, inf }
 0x17b   : > { %v268_v33 = vpop.f32.mrf.mxu1 }
 0x17c   : > { %v2073_v39 = vsub.f32 0.0, %v268_v33 }
 0x17e   : > { %v304_v49 = vsel %vm300_vm6, %v2073_v39, inf }
 0x189   : > { %v271_v26 = vpop.f32.mrf.mxu2 }
 0x18a   : > { %v2065_v35 = vsub.f32 0.0, %v271_v26 }
 0x18c   : > { %v305_v43 = vsel %vm300_vm6, %v2065_v35, inf }
 0x18d   : > { %v306_v51 = vmin.f32 %v301_v47, %v305_v43 }
 0x191   : > { %v274_v29 = vpop.f32.mrf.mxu2 }
 0x192   : > { %v2061_v32 = vsub.f32 0.0, %v274_v29 }
 0x194   : > { %v307_v40 = vsel %vm300_vm6, %v2061_v32, inf }
 0x195   : > { %v308_v46 = vmin.f32 %v302_v42, %v307_v40 }
 0x197   : > { %v313_v54 = vmin.f32 %v306_v51, %v308_v46 }
 0x199   : > { %v277_v30 = vpop.f32.mrf.mxu3 }
 0x19a   : > { %v2067_v36 = vsub.f32 0.0, %v277_v30 }
 0x19c   : > { %v309_v44 = vsel %vm300_vm6, %v2067_v36, inf }
 0x19d   : > { %v310_v52 = vmin.f32 %v303_v48, %v309_v44 }
 0x1a1   : > { %v280_v41 = vpop.f32.mrf.mxu3 }
 0x1a2   : > { %v2083_v45 = vsub.f32 0.0, %v280_v41 }
 0x1a4   : > { %v311_v50 = vsel %vm300_vm6, %v2083_v45, inf }
 0x1a5   : > { %v312_v53 = vmin.f32 %v304_v49, %v311_v50 }
 0x1a7   : > { %v314_v55 = vmin.f32 %v310_v52, %v312_v53 }
 0x1a9   : > { %v315_v56 = vmin.f32 %v313_v54, %v314_v55 }
 0x1ab   : > { %v316_v57 = vrot.slane %v315_v56, 4 }
 0x1ad   : > { %v317_v59 = vmin.f32 %v315_v56, %v316_v57 }
 0x1af   : > { %v318_v60 = vrot.slane %v317_v59, 2 }
 0x1b1   : > { %v319_v62 = vmin.f32 %v317_v59, %v318_v60 }
 0x1b3   : > { %v320_v63 = vrot.slane %v319_v62, 1 }
 0x1b5   : > { %v321_v3 = vmin.f32 %v319_v62, %v320_v63 }
 0x1b7   : > { %vm322_vm7 = vcmp.eq.f32.partialorder %v2069_v37, %v321_v3  ;;  %vm323_vm8 = vcmp.eq.f32.partialorder %v2063_v34, %v321_v3  ;;  %vm324_vm9 = vcmp.eq.f32.partialorder %v2071_v38, %v321_v3  ;;  %vm325_vm10 = vcmp.eq.f32.partialorder %v2073_v39, %v321_v3 }
 0x1b8   : > { %vm326_vm11 = vcmp.eq.f32.partialorder %v2065_v35, %v321_v3  ;;  %vm327_vm12 = vcmp.eq.f32.partialorder %v2061_v32, %v321_v3  ;;  %vm328_vm13 = vcmp.eq.f32.partialorder %v2067_v36, %v321_v3  ;;  %vm329_vm14 = vcmp.eq.f32.partialorder %v2083_v45, %v321_v3 }
 0x1b9   : > { %v330_v8 = vsel %vm322_vm7, %v2093_v61, 64  ;;  %v331_v9 = vsel %vm323_vm8, %v2096_v0, 64  ;;  %v332_v10 = vsel %vm324_vm9, %v2099_v1, 64  ;;  %v333_v11 = vsel %vm325_vm10, %v2102_v2, 64 }
 0x1ba   : > { %v334_v12 = vsel %vm326_vm11, %v2105_v4, 64  ;;  %v335_v13 = vsel %vm327_vm12, %v2108_v5, 64  ;;  %v336_v14 = vsel %vm328_vm13, %v2111_v6, 64  ;;  %v337_v15 = vsel %vm329_vm14, %v2114_v7, 64 }
 0x1bb   : > { %v338_v16 = vsel %vm300_vm6, %v330_v8, 2147483647  ;;  %v339_v17 = vsel %vm300_vm6, %v331_v9, 2147483647  ;;  %v340_v18 = vsel %vm300_vm6, %v332_v10, 2147483647 }
 0x1bc   : > { %v341_v19 = vsel %vm300_vm6, %v333_v11, 2147483647  ;;  %v342_v20 = vsel %vm300_vm6, %v334_v12, 2147483647  ;;  %v345_v21 = vsel %vm300_vm6, %v335_v13, 2147483647 }
 0x1bd   : > { %vm343_vm15 = vcmp.lt.s32.totalorder %v338_v16, %v342_v20  ;;  %vm346_vm0 = vcmp.lt.s32.totalorder %v339_v17, %v345_v21  ;;  %v348_v22 = vsel %vm300_vm6, %v336_v14, 2147483647  ;;  %v351_v23 = vsel %vm300_vm6, %v337_v15, 2147483647 }
 0x1be   : > { %v344_v24 = vsel %vm343_vm15, %v338_v16, %v342_v20  ;;  %v347_v25 = vsel %vm346_vm0, %v339_v17, %v345_v21  ;;  %vm349_vm1 = vcmp.lt.s32.totalorder %v340_v18, %v348_v22  ;;  %vm352_vm2 = vcmp.lt.s32.totalorder %v341_v19, %v351_v23 }
 0x1bf   : > { %v350_v26 = vsel %vm349_vm1, %v340_v18, %v348_v22  ;;  %v353_v27 = vsel %vm352_vm2, %v341_v19, %v351_v23  ;;  %vm354_vm3 = vcmp.lt.s32.totalorder %v344_v24, %v347_v25  ;;  %vm369_vm9 = vcmask 516096  }
 0x1c0   : > { %v355_v28 = vsel %vm354_vm3, %v344_v24, %v347_v25  ;;  %vm356_vm4 = vcmp.lt.s32.totalorder %v350_v26, %v353_v27 }
 0x1c1   : > { %v357_v29 = vsel %vm356_vm4, %v350_v26, %v353_v27 }
 0x1c2   : > { %vm358_vm5 = vcmp.lt.s32.totalorder %v355_v28, %v357_v29 }
 0x1c3   : > { %v359_v30 = vsel %vm358_vm5, %v355_v28, %v357_v29 }
 0x1c4   : > { %v360_v31 = vrot.slane %v359_v30, 4 }
 0x1c6   : > { %vm361_vm7 = vcmp.lt.s32.totalorder %v359_v30, %v360_v31 }
 0x1c7   : > { %v362_v33 = vsel %vm361_vm7, %v359_v30, %v360_v31 }
 0x1c8   : > { %v363_v40 = vrot.slane %v362_v33, 2 }
 0x1ca   : > { %vm364_vm8 = vcmp.lt.s32.totalorder %v362_v33, %v363_v40 }
 0x1cb   : > { %v365_v41 = vsel %vm364_vm8, %v362_v33, %v363_v40 }
 0x1cc   : > { %v366_v42 = vrot.slane %v365_v41, 1 }
 0x1ce   : > { %vm367_vm10 = vcmp.lt.s32.totalorder %v365_v41, %v366_v42 }
 0x1cf   : > { %v368_v43 = vsel %vm367_vm10, %v365_v41, %v366_v42 }
 0x1d0   : > { %370 = vst.msk [vmem:[%s2145_s12] sm:$0x1] %vm369_vm9, %v368_v43  ;;  %vm371_vm11 = vcmp.eq.s32.totalorder %v2093_v61, %v368_v43  ;;  %vm372_vm12 = vcmp.eq.s32.totalorder %v2096_v0, %v368_v43  ;;  %vm373_vm13 = vcmp.eq.s32.totalorder %v2099_v1, %v368_v43  ;;  %vm374_vm14 = vcmp.eq.s32.totalorder %v2102_v2, %v368_v43 }
 0x1d1   : > { %vm375_vm15 = vcmp.eq.s32.totalorder %v2105_v4, %v368_v43  ;;  %vm376_vm0 = vcmp.eq.s32.totalorder %v2108_v5, %v368_v43  ;;  %vm377_vm1 = vcmp.eq.s32.totalorder %v2111_v6, %v368_v43  ;;  %vm378_vm2 = vcmp.eq.s32.totalorder %v2114_v7, %v368_v43 }
 0x1d2   : > { %v2158_v44 = vsel %vm371_vm11, inf, %v2069_v37  ;;  %v2161_v46 = vsel %vm372_vm12, inf, %v2063_v34  ;;  %v2164_v47 = vsel %vm373_vm13, inf, %v2071_v38  ;;  %v2167_v48 = vsel %vm374_vm14, inf, %v2073_v39 }
 0x1d3   : > { %v2170_v49 = vsel %vm375_vm15, inf, %v2065_v35  ;;  %v2173_v50 = vsel %vm376_vm0, inf, %v2061_v32  ;;  %v2176_v51 = vsel %vm377_vm1, inf, %v2067_v36  ;;  %v2179_v37 = vsel %vm378_vm2, inf, %v2083_v45 }
 0x1d4   : > { %v387_v34 = vsel %vm300_vm6, %v2158_v44, inf  ;;  %v388_v38 = vsel %vm300_vm6, %v2161_v46, inf  ;;  %v389_v39 = vsel %vm300_vm6, %v2164_v47, inf  ;;  %v390_v35 = vsel %vm300_vm6, %v2167_v48, inf }
 0x1d5   : > { %v391_v32 = vsel %vm300_vm6, %v2170_v49, inf  ;;  %v393_v36 = vsel %vm300_vm6, %v2173_v50, inf  ;;  %v395_v45 = vsel %vm300_vm6, %v2176_v51, inf  ;;  %v397_v52 = vsel %vm300_vm6, %v2179_v37, inf }
 0x1d6   : > { %v392_v53 = vmin.f32 %v387_v34, %v391_v32  ;;  %v394_v54 = vmin.f32 %v388_v38, %v393_v36  ;;  %v396_v55 = vmin.f32 %v389_v39, %v395_v45  ;;  %v398_v56 = vmin.f32 %v390_v35, %v397_v52 }
 0x1d8   : > { %v399_v57 = vmin.f32 %v392_v53, %v394_v54  ;;  %v400_v58 = vmin.f32 %v396_v55, %v398_v56 }
 0x1da   : > { %v401_v59 = vmin.f32 %v399_v57, %v400_v58 }
 0x1dc   : > { %v402_v60 = vrot.slane %v401_v59, 4 }
 0x1de   : > { %v403_v62 = vmin.f32 %v401_v59, %v402_v60 }
 0x1e0   : > { %v404_v63 = vrot.slane %v403_v62, 2 }
 0x1e2   : > { %v405_v3 = vmin.f32 %v403_v62, %v404_v63 }
 0x1e4   : > { %v406_v8 = vrot.slane %v405_v3, 1 }
 0x1e6   : > { %v407_v9 = vmin.f32 %v405_v3, %v406_v8 }
 0x1e8   : > { %vm408_vm3 = vcmp.eq.f32.partialorder %v2158_v44, %v407_v9  ;;  %vm409_vm4 = vcmp.eq.f32.partialorder %v2161_v46, %v407_v9  ;;  %vm410_vm5 = vcmp.eq.f32.partialorder %v2164_v47, %v407_v9  ;;  %vm411_vm7 = vcmp.eq.f32.partialorder %v2167_v48, %v407_v9 }
 0x1e9   : > { %vm412_vm8 = vcmp.eq.f32.partialorder %v2170_v49, %v407_v9  ;;  %vm413_vm10 = vcmp.eq.f32.partialorder %v2173_v50, %v407_v9  ;;  %vm414_vm11 = vcmp.eq.f32.partialorder %v2176_v51, %v407_v9  ;;  %vm415_vm12 = vcmp.eq.f32.partialorder %v2179_v37, %v407_v9 }
 0x1ea   : > { %v416_v10 = vsel %vm408_vm3, %v2093_v61, 64  ;;  %v417_v11 = vsel %vm409_vm4, %v2096_v0, 64  ;;  %v418_v12 = vsel %vm410_vm5, %v2099_v1, 64  ;;  %v419_v13 = vsel %vm411_vm7, %v2102_v2, 64 }
 0x1eb   : > { %v420_v14 = vsel %vm412_vm8, %v2105_v4, 64  ;;  %v421_v15 = vsel %vm413_vm10, %v2108_v5, 64  ;;  %v422_v16 = vsel %vm414_vm11, %v2111_v6, 64  ;;  %v423_v17 = vsel %vm415_vm12, %v2114_v7, 64 }
 0x1ec   : > { %v424_v18 = vsel %vm300_vm6, %v416_v10, 2147483647  ;;  %v425_v19 = vsel %vm300_vm6, %v417_v11, 2147483647  ;;  %v426_v20 = vsel %vm300_vm6, %v418_v12, 2147483647 }
 0x1ed   : > { %v427_v21 = vsel %vm300_vm6, %v419_v13, 2147483647  ;;  %v428_v22 = vsel %vm300_vm6, %v420_v14, 2147483647  ;;  %v431_v23 = vsel %vm300_vm6, %v421_v15, 2147483647 }
 0x1ee   : > { %vm429_vm13 = vcmp.lt.s32.totalorder %v424_v18, %v428_v22  ;;  %vm432_vm14 = vcmp.lt.s32.totalorder %v425_v19, %v431_v23  ;;  %v434_v24 = vsel %vm300_vm6, %v422_v16, 2147483647  ;;  %v437_v25 = vsel %vm300_vm6, %v423_v17, 2147483647 }
 0x1ef   : > { %v430_v26 = vsel %vm429_vm13, %v424_v18, %v428_v22  ;;  %v433_v27 = vsel %vm432_vm14, %v425_v19, %v431_v23  ;;  %vm435_vm15 = vcmp.lt.s32.totalorder %v426_v20, %v434_v24  ;;  %vm438_vm0 = vcmp.lt.s32.totalorder %v427_v21, %v437_v25 }
 0x1f0   : > { %v436_v28 = vsel %vm435_vm15, %v426_v20, %v434_v24  ;;  %v439_v29 = vsel %vm438_vm0, %v427_v21, %v437_v25  ;;  %vm440_vm1 = vcmp.lt.s32.totalorder %v430_v26, %v433_v27 }
 0x1f1   : > { %v441_v30 = vsel %vm440_vm1, %v430_v26, %v433_v27  ;;  %vm442_vm2 = vcmp.lt.s32.totalorder %v436_v28, %v439_v29 }
 0x1f2   : > { %v443_v31 = vsel %vm442_vm2, %v436_v28, %v439_v29 }
 0x1f3   : > { %vm444_vm3 = vcmp.lt.s32.totalorder %v441_v30, %v443_v31 }
 0x1f4   : > { %v445_v33 = vsel %vm444_vm3, %v441_v30, %v443_v31 }
 0x1f5   : > { %v446_v40 = vrot.slane %v445_v33, 4 }
 0x1f7   : > { %vm447_vm4 = vcmp.lt.s32.totalorder %v445_v33, %v446_v40 }
 0x1f8   : > { %v448_v41 = vsel %vm447_vm4, %v445_v33, %v446_v40 }
 0x1f9   : > { %v449_v42 = vrot.slane %v448_v41, 2 }
 0x1fb   : > { %vm450_vm5 = vcmp.lt.s32.totalorder %v448_v41, %v449_v42 }
 0x1fc   : > { %v451_v43 = vsel %vm450_vm5, %v448_v41, %v449_v42 }
 0x1fd   : > { %v452_v34 = vrot.slane %v451_v43, 1 }
 0x1ff   : > { %vm453_vm7 = vcmp.lt.s32.totalorder %v451_v43, %v452_v34 }
 0x200   : > { %v454_v38 = vsel %vm453_vm7, %v451_v43, %v452_v34 }
 0x201   : > { %vm455_vm8 = vcmp.eq.s32.totalorder %v2093_v61, %v454_v38  ;;  %vm456_vm10 = vcmp.eq.s32.totalorder %v2096_v0, %v454_v38  ;;  %vm457_vm11 = vcmp.eq.s32.totalorder %v2099_v1, %v454_v38  ;;  %vm458_vm12 = vcmp.eq.s32.totalorder %v2102_v2, %v454_v38 }
 0x202   : > { %vm459_vm13 = vcmp.eq.s32.totalorder %v2105_v4, %v454_v38  ;;  %vm460_vm14 = vcmp.eq.s32.totalorder %v2108_v5, %v454_v38  ;;  %vm461_vm15 = vcmp.eq.s32.totalorder %v2111_v6, %v454_v38  ;;  %vm462_vm0 = vcmp.eq.s32.totalorder %v2114_v7, %v454_v38 }
 0x203   : > { %v2230_v39 = vsel %vm455_vm8, inf, %v2158_v44  ;;  %v2233_v35 = vsel %vm456_vm10, inf, %v2161_v46  ;;  %v2236_v32 = vsel %vm457_vm11, inf, %v2164_v47  ;;  %v2239_v36 = vsel %vm458_vm12, inf, %v2167_v48 }
 0x204   : > { %v2242_v45 = vsel %vm459_vm13, inf, %v2170_v49  ;;  %v2245_v52 = vsel %vm460_vm14, inf, %v2173_v50  ;;  %v2248_v53 = vsel %vm461_vm15, inf, %v2176_v51  ;;  %v2251_v44 = vsel %vm462_vm0, inf, %v2179_v37 }
 0x205   : > { %v471_v46 = vsel %vm300_vm6, %v2230_v39, inf  ;;  %v472_v47 = vsel %vm300_vm6, %v2233_v35, inf  ;;  %v473_v48 = vsel %vm300_vm6, %v2236_v32, inf  ;;  %v474_v49 = vsel %vm300_vm6, %v2239_v36, inf }
 0x206   : > { %v475_v50 = vsel %vm300_vm6, %v2242_v45, inf  ;;  %v477_v51 = vsel %vm300_vm6, %v2245_v52, inf  ;;  %v479_v37 = vsel %vm300_vm6, %v2248_v53, inf  ;;  %v481_v54 = vsel %vm300_vm6, %v2251_v44, inf }
 0x207   : > { %v476_v55 = vmin.f32 %v471_v46, %v475_v50  ;;  %v478_v56 = vmin.f32 %v472_v47, %v477_v51  ;;  %v480_v57 = vmin.f32 %v473_v48, %v479_v37  ;;  %v482_v58 = vmin.f32 %v474_v49, %v481_v54 }
 0x209   : > { %v483_v59 = vmin.f32 %v476_v55, %v478_v56  ;;  %v484_v60 = vmin.f32 %v480_v57, %v482_v58 }
 0x20b   : > { %v485_v62 = vmin.f32 %v483_v59, %v484_v60 }
 0x20d   : > { %v486_v63 = vrot.slane %v485_v62, 4 }
 0x20f   : > { %v487_v3 = vmin.f32 %v485_v62, %v486_v63 }
 0x211   : > { %v488_v8 = vrot.slane %v487_v3, 2 }
 0x213   : > { %v489_v9 = vmin.f32 %v487_v3, %v488_v8 }
 0x215   : > { %v490_v10 = vrot.slane %v489_v9, 1 }
 0x217   : > { %v491_v11 = vmin.f32 %v489_v9, %v490_v10 }
 0x219   : > { %vm492_vm1 = vcmp.eq.f32.partialorder %v2230_v39, %v491_v11  ;;  %vm493_vm2 = vcmp.eq.f32.partialorder %v2233_v35, %v491_v11  ;;  %vm494_vm3 = vcmp.eq.f32.partialorder %v2236_v32, %v491_v11  ;;  %vm495_vm4 = vcmp.eq.f32.partialorder %v2239_v36, %v491_v11 }
 0x21a   : > { %vm496_vm5 = vcmp.eq.f32.partialorder %v2242_v45, %v491_v11  ;;  %vm497_vm7 = vcmp.eq.f32.partialorder %v2245_v52, %v491_v11  ;;  %vm498_vm8 = vcmp.eq.f32.partialorder %v2248_v53, %v491_v11  ;;  %vm499_vm10 = vcmp.eq.f32.partialorder %v2251_v44, %v491_v11 }
 0x21b   : > { %v500_v12 = vsel %vm492_vm1, %v2093_v61, 64  ;;  %v501_v13 = vsel %vm493_vm2, %v2096_v0, 64  ;;  %v502_v14 = vsel %vm494_vm3, %v2099_v1, 64  ;;  %v503_v15 = vsel %vm495_vm4, %v2102_v2, 64 }
 0x21c   : > { %v504_v16 = vsel %vm496_vm5, %v2105_v4, 64  ;;  %v505_v17 = vsel %vm497_vm7, %v2108_v5, 64  ;;  %v506_v18 = vsel %vm498_vm8, %v2111_v6, 64  ;;  %v507_v19 = vsel %vm499_vm10, %v2114_v7, 64 }
 0x21d   : > { %v508_v20 = vsel %vm300_vm6, %v500_v12, 2147483647  ;;  %v509_v21 = vsel %vm300_vm6, %v501_v13, 2147483647  ;;  %v510_v22 = vsel %vm300_vm6, %v502_v14, 2147483647 }
 0x21e   : > { %v511_v23 = vsel %vm300_vm6, %v503_v15, 2147483647  ;;  %v512_v24 = vsel %vm300_vm6, %v504_v16, 2147483647  ;;  %v515_v25 = vsel %vm300_vm6, %v505_v17, 2147483647 }
 0x21f   : > { %vm513_vm11 = vcmp.lt.s32.totalorder %v508_v20, %v512_v24  ;;  %vm516_vm12 = vcmp.lt.s32.totalorder %v509_v21, %v515_v25  ;;  %v518_v26 = vsel %vm300_vm6, %v506_v18, 2147483647  ;;  %v521_v27 = vsel %vm300_vm6, %v507_v19, 2147483647 }
 0x220   : > { %v514_v28 = vsel %vm513_vm11, %v508_v20, %v512_v24  ;;  %v517_v29 = vsel %vm516_vm12, %v509_v21, %v515_v25  ;;  %vm519_vm13 = vcmp.lt.s32.totalorder %v510_v22, %v518_v26  ;;  %vm522_vm14 = vcmp.lt.s32.totalorder %v511_v23, %v521_v27 }
 0x221   : > { %v520_v30 = vsel %vm519_vm13, %v510_v22, %v518_v26  ;;  %v523_v31 = vsel %vm522_vm14, %v511_v23, %v521_v27  ;;  %vm524_vm15 = vcmp.lt.s32.totalorder %v514_v28, %v517_v29 }
 0x222   : > { %v525_v33 = vsel %vm524_vm15, %v514_v28, %v517_v29  ;;  %vm526_vm0 = vcmp.lt.s32.totalorder %v520_v30, %v523_v31 }
 0x223   : > { %v527_v40 = vsel %vm526_vm0, %v520_v30, %v523_v31 }
 0x224   : > { %vm528_vm1 = vcmp.lt.s32.totalorder %v525_v33, %v527_v40 }
 0x225   : > { %v529_v41 = vsel %vm528_vm1, %v525_v33, %v527_v40 }
 0x226   : > { %v530_v42 = vrot.slane %v529_v41, 4 }
 0x228   : > { %vm531_vm2 = vcmp.lt.s32.totalorder %v529_v41, %v530_v42 }
 0x229   : > { %v532_v43 = vsel %vm531_vm2, %v529_v41, %v530_v42 }
 0x22a   : > { %v533_v34 = vrot.slane %v532_v43, 2 }
 0x22c   : > { %vm534_vm3 = vcmp.lt.s32.totalorder %v532_v43, %v533_v34 }
 0x22d   : > { %v535_v38 = vsel %vm534_vm3, %v532_v43, %v533_v34 }
 0x22e   : > { %v536_v46 = vrot.slane %v535_v38, 1 }
 0x230   : > { %vm537_vm4 = vcmp.lt.s32.totalorder %v535_v38, %v536_v46 }
 0x231   : > { %v538_v47 = vsel %vm537_vm4, %v535_v38, %v536_v46 }
 0x232   : > { %539 = vst.msk [vmem:[%s2145_s12 + $0x1] sm:$0x1] %vm369_vm9, %v538_v47  ;;  %vm540_vm5 = vcmp.eq.s32.totalorder %v2093_v61, %v538_v47  ;;  %vm541_vm7 = vcmp.eq.s32.totalorder %v2096_v0, %v538_v47  ;;  %vm542_vm8 = vcmp.eq.s32.totalorder %v2099_v1, %v538_v47  ;;  %vm543_vm10 = vcmp.eq.s32.totalorder %v2102_v2, %v538_v47 }
 0x233   : > { %vm544_vm11 = vcmp.eq.s32.totalorder %v2105_v4, %v538_v47  ;;  %vm545_vm12 = vcmp.eq.s32.totalorder %v2108_v5, %v538_v47  ;;  %vm546_vm13 = vcmp.eq.s32.totalorder %v2111_v6, %v538_v47  ;;  %vm547_vm14 = vcmp.eq.s32.totalorder %v2114_v7, %v538_v47 }
 0x234   : > { %v2304_v48 = vsel %vm540_vm5, inf, %v2230_v39  ;;  %v2307_v49 = vsel %vm541_vm7, inf, %v2233_v35  ;;  %v2310_v50 = vsel %vm542_vm8, inf, %v2236_v32  ;;  %v2313_v51 = vsel %vm543_vm10, inf, %v2239_v36 }
 0x235   : > { %v2316_v37 = vsel %vm544_vm11, inf, %v2242_v45  ;;  %v2319_v54 = vsel %vm545_vm12, inf, %v2245_v52  ;;  %v2322_v55 = vsel %vm546_vm13, inf, %v2248_v53  ;;  %v2325_v39 = vsel %vm547_vm14, inf, %v2251_v44 }
 0x236   : > { %v556_v35 = vsel %vm300_vm6, %v2304_v48, inf  ;;  %v557_v32 = vsel %vm300_vm6, %v2307_v49, inf  ;;  %v558_v36 = vsel %vm300_vm6, %v2310_v50, inf  ;;  %v559_v45 = vsel %vm300_vm6, %v2313_v51, inf }
 0x237   : > { %v560_v52 = vsel %vm300_vm6, %v2316_v37, inf  ;;  %v562_v53 = vsel %vm300_vm6, %v2319_v54, inf  ;;  %v564_v44 = vsel %vm300_vm6, %v2322_v55, inf  ;;  %v566_v56 = vsel %vm300_vm6, %v2325_v39, inf }
 0x238   : > { %v561_v57 = vmin.f32 %v556_v35, %v560_v52  ;;  %v563_v58 = vmin.f32 %v557_v32, %v562_v53  ;;  %v565_v59 = vmin.f32 %v558_v36, %v564_v44  ;;  %v567_v60 = vmin.f32 %v559_v45, %v566_v56 }
 0x23a   : > { %v568_v62 = vmin.f32 %v561_v57, %v563_v58  ;;  %v569_v63 = vmin.f32 %v565_v59, %v567_v60 }
 0x23c   : > { %v570_v3 = vmin.f32 %v568_v62, %v569_v63 }
 0x23e   : > { %v571_v8 = vrot.slane %v570_v3, 4 }
 0x240   : > { %v572_v9 = vmin.f32 %v570_v3, %v571_v8 }
 0x242   : > { %v573_v10 = vrot.slane %v572_v9, 2 }
 0x244   : > { %v574_v11 = vmin.f32 %v572_v9, %v573_v10 }
 0x246   : > { %v575_v12 = vrot.slane %v574_v11, 1 }
 0x248   : > { %v576_v13 = vmin.f32 %v574_v11, %v575_v12 }
 0x24a   : > { %vm577_vm15 = vcmp.eq.f32.partialorder %v2304_v48, %v576_v13  ;;  %vm578_vm0 = vcmp.eq.f32.partialorder %v2307_v49, %v576_v13  ;;  %vm579_vm1 = vcmp.eq.f32.partialorder %v2310_v50, %v576_v13  ;;  %vm580_vm2 = vcmp.eq.f32.partialorder %v2313_v51, %v576_v13 }
 0x24b   : > { %vm581_vm3 = vcmp.eq.f32.partialorder %v2316_v37, %v576_v13  ;;  %vm582_vm4 = vcmp.eq.f32.partialorder %v2319_v54, %v576_v13  ;;  %vm583_vm5 = vcmp.eq.f32.partialorder %v2322_v55, %v576_v13  ;;  %vm584_vm7 = vcmp.eq.f32.partialorder %v2325_v39, %v576_v13 }
 0x24c   : > { %v585_v14 = vsel %vm577_vm15, %v2093_v61, 64  ;;  %v586_v15 = vsel %vm578_vm0, %v2096_v0, 64  ;;  %v587_v16 = vsel %vm579_vm1, %v2099_v1, 64  ;;  %v588_v17 = vsel %vm580_vm2, %v2102_v2, 64 }
 0x24d   : > { %v589_v18 = vsel %vm581_vm3, %v2105_v4, 64  ;;  %v590_v19 = vsel %vm582_vm4, %v2108_v5, 64  ;;  %v591_v20 = vsel %vm583_vm5, %v2111_v6, 64  ;;  %v592_v21 = vsel %vm584_vm7, %v2114_v7, 64 }
 0x24e   : > { %v593_v22 = vsel %vm300_vm6, %v585_v14, 2147483647  ;;  %v594_v23 = vsel %vm300_vm6, %v586_v15, 2147483647  ;;  %v595_v24 = vsel %vm300_vm6, %v587_v16, 2147483647 }
 0x24f   : > { %v596_v25 = vsel %vm300_vm6, %v588_v17, 2147483647  ;;  %v597_v26 = vsel %vm300_vm6, %v589_v18, 2147483647  ;;  %v600_v27 = vsel %vm300_vm6, %v590_v19, 2147483647 }
 0x250   : > { %vm598_vm8 = vcmp.lt.s32.totalorder %v593_v22, %v597_v26  ;;  %vm601_vm10 = vcmp.lt.s32.totalorder %v594_v23, %v600_v27  ;;  %v603_v28 = vsel %vm300_vm6, %v591_v20, 2147483647  ;;  %v606_v29 = vsel %vm300_vm6, %v592_v21, 2147483647 }
 0x251   : > { %v599_v30 = vsel %vm598_vm8, %v593_v22, %v597_v26  ;;  %v602_v31 = vsel %vm601_vm10, %v594_v23, %v600_v27  ;;  %vm604_vm11 = vcmp.lt.s32.totalorder %v595_v24, %v603_v28  ;;  %vm607_vm12 = vcmp.lt.s32.totalorder %v596_v25, %v606_v29 }
 0x252   : > { %v605_v33 = vsel %vm604_vm11, %v595_v24, %v603_v28  ;;  %v608_v40 = vsel %vm607_vm12, %v596_v25, %v606_v29  ;;  %vm609_vm13 = vcmp.lt.s32.totalorder %v599_v30, %v602_v31 }
 0x253   : > { %v610_v41 = vsel %vm609_vm13, %v599_v30, %v602_v31  ;;  %vm611_vm14 = vcmp.lt.s32.totalorder %v605_v33, %v608_v40 }
 0x254   : > { %v612_v42 = vsel %vm611_vm14, %v605_v33, %v608_v40 }
 0x255   : > { %vm613_vm15 = vcmp.lt.s32.totalorder %v610_v41, %v612_v42 }
 0x256   : > { %v614_v43 = vsel %vm613_vm15, %v610_v41, %v612_v42 }
 0x257   : > { %v615_v34 = vrot.slane %v614_v43, 4 }
 0x259   : > { %vm616_vm0 = vcmp.lt.s32.totalorder %v614_v43, %v615_v34 }
 0x25a   : > { %v617_v38 = vsel %vm616_vm0, %v614_v43, %v615_v34 }
 0x25b   : > { %v618_v46 = vrot.slane %v617_v38, 2 }
 0x25d   : > { %vm619_vm1 = vcmp.lt.s32.totalorder %v617_v38, %v618_v46 }
 0x25e   : > { %v620_v47 = vsel %vm619_vm1, %v617_v38, %v618_v46 }
 0x25f   : > { %v621_v35 = vrot.slane %v620_v47, 1 }
 0x261   : > { %vm622_vm2 = vcmp.lt.s32.totalorder %v620_v47, %v621_v35 }
 0x262   : > { %v623_v32 = vsel %vm622_vm2, %v620_v47, %v621_v35 }
 0x263   : > { %vm624_vm3 = vcmp.eq.s32.totalorder %v2093_v61, %v623_v32  ;;  %vm625_vm4 = vcmp.eq.s32.totalorder %v2096_v0, %v623_v32  ;;  %vm626_vm5 = vcmp.eq.s32.totalorder %v2099_v1, %v623_v32  ;;  %vm627_vm7 = vcmp.eq.s32.totalorder %v2102_v2, %v623_v32 }
 0x264   : > { %vm628_vm8 = vcmp.eq.s32.totalorder %v2105_v4, %v623_v32  ;;  %vm629_vm10 = vcmp.eq.s32.totalorder %v2108_v5, %v623_v32  ;;  %vm630_vm11 = vcmp.eq.s32.totalorder %v2111_v6, %v623_v32  ;;  %vm631_vm12 = vcmp.eq.s32.totalorder %v2114_v7, %v623_v32 }
 0x265   : > { %v2376_v36 = vsel %vm624_vm3, inf, %v2304_v48  ;;  %v2379_v45 = vsel %vm625_vm4, inf, %v2307_v49  ;;  %v2382_v52 = vsel %vm626_vm5, inf, %v2310_v50  ;;  %v2385_v53 = vsel %vm627_vm7, inf, %v2313_v51 }
 0x266   : > { %v2388_v44 = vsel %vm628_vm8, inf, %v2316_v37  ;;  %v2391_v56 = vsel %vm629_vm10, inf, %v2319_v54  ;;  %v2394_v57 = vsel %vm630_vm11, inf, %v2322_v55  ;;  %v2397_v48 = vsel %vm631_vm12, inf, %v2325_v39 }
 0x267   : > { %v640_v49 = vsel %vm300_vm6, %v2376_v36, inf  ;;  %v641_v50 = vsel %vm300_vm6, %v2379_v45, inf  ;;  %v642_v51 = vsel %vm300_vm6, %v2382_v52, inf  ;;  %v643_v37 = vsel %vm300_vm6, %v2385_v53, inf }
 0x268   : > { %v644_v54 = vsel %vm300_vm6, %v2388_v44, inf  ;;  %v646_v55 = vsel %vm300_vm6, %v2391_v56, inf  ;;  %v648_v39 = vsel %vm300_vm6, %v2394_v57, inf  ;;  %v650_v58 = vsel %vm300_vm6, %v2397_v48, inf }
 0x269   : > { %v645_v59 = vmin.f32 %v640_v49, %v644_v54  ;;  %v647_v60 = vmin.f32 %v641_v50, %v646_v55  ;;  %v649_v62 = vmin.f32 %v642_v51, %v648_v39  ;;  %v651_v63 = vmin.f32 %v643_v37, %v650_v58 }
 0x26b   : > { %v652_v3 = vmin.f32 %v645_v59, %v647_v60  ;;  %v653_v8 = vmin.f32 %v649_v62, %v651_v63 }
 0x26d   : > { %v654_v9 = vmin.f32 %v652_v3, %v653_v8 }
 0x26f   : > { %v655_v10 = vrot.slane %v654_v9, 4 }
 0x271   : > { %v656_v11 = vmin.f32 %v654_v9, %v655_v10 }
 0x273   : > { %v657_v12 = vrot.slane %v656_v11, 2 }
 0x275   : > { %v658_v13 = vmin.f32 %v656_v11, %v657_v12 }
 0x277   : > { %v659_v14 = vrot.slane %v658_v13, 1 }
 0x279   : > { %v660_v15 = vmin.f32 %v658_v13, %v659_v14 }
 0x27b   : > { %vm661_vm13 = vcmp.eq.f32.partialorder %v2376_v36, %v660_v15  ;;  %vm662_vm14 = vcmp.eq.f32.partialorder %v2379_v45, %v660_v15  ;;  %vm663_vm15 = vcmp.eq.f32.partialorder %v2382_v52, %v660_v15  ;;  %vm664_vm0 = vcmp.eq.f32.partialorder %v2385_v53, %v660_v15 }
 0x27c   : > { %vm665_vm1 = vcmp.eq.f32.partialorder %v2388_v44, %v660_v15  ;;  %vm666_vm2 = vcmp.eq.f32.partialorder %v2391_v56, %v660_v15  ;;  %vm667_vm3 = vcmp.eq.f32.partialorder %v2394_v57, %v660_v15  ;;  %vm668_vm4 = vcmp.eq.f32.partialorder %v2397_v48, %v660_v15 }
 0x27d   : > { %v669_v16 = vsel %vm661_vm13, %v2093_v61, 64  ;;  %v670_v17 = vsel %vm662_vm14, %v2096_v0, 64  ;;  %v671_v18 = vsel %vm663_vm15, %v2099_v1, 64  ;;  %v672_v19 = vsel %vm664_vm0, %v2102_v2, 64 }
 0x27e   : > { %v673_v20 = vsel %vm665_vm1, %v2105_v4, 64  ;;  %v674_v21 = vsel %vm666_vm2, %v2108_v5, 64  ;;  %v675_v22 = vsel %vm667_vm3, %v2111_v6, 64  ;;  %v676_v23 = vsel %vm668_vm4, %v2114_v7, 64 }
 0x27f   : > { %v677_v24 = vsel %vm300_vm6, %v669_v16, 2147483647  ;;  %v678_v25 = vsel %vm300_vm6, %v670_v17, 2147483647  ;;  %v679_v26 = vsel %vm300_vm6, %v671_v18, 2147483647 }
 0x280   : > { %v680_v27 = vsel %vm300_vm6, %v672_v19, 2147483647  ;;  %v681_v28 = vsel %vm300_vm6, %v673_v20, 2147483647  ;;  %v684_v29 = vsel %vm300_vm6, %v674_v21, 2147483647 }
 0x281   : > { %vm682_vm5 = vcmp.lt.s32.totalorder %v677_v24, %v681_v28  ;;  %vm685_vm7 = vcmp.lt.s32.totalorder %v678_v25, %v684_v29  ;;  %v687_v30 = vsel %vm300_vm6, %v675_v22, 2147483647  ;;  %v690_v31 = vsel %vm300_vm6, %v676_v23, 2147483647 }
 0x282   : > { %v683_v33 = vsel %vm682_vm5, %v677_v24, %v681_v28  ;;  %v686_v40 = vsel %vm685_vm7, %v678_v25, %v684_v29  ;;  %vm688_vm8 = vcmp.lt.s32.totalorder %v679_v26, %v687_v30  ;;  %vm691_vm10 = vcmp.lt.s32.totalorder %v680_v27, %v690_v31 }
 0x283   : > { %v689_v41 = vsel %vm688_vm8, %v679_v26, %v687_v30  ;;  %v692_v42 = vsel %vm691_vm10, %v680_v27, %v690_v31  ;;  %vm693_vm11 = vcmp.lt.s32.totalorder %v683_v33, %v686_v40 }
 0x284   : > { %v694_v43 = vsel %vm693_vm11, %v683_v33, %v686_v40  ;;  %vm695_vm12 = vcmp.lt.s32.totalorder %v689_v41, %v692_v42 }
 0x285   : > { %v696_v34 = vsel %vm695_vm12, %v689_v41, %v692_v42 }
 0x286   : > { %vm697_vm13 = vcmp.lt.s32.totalorder %v694_v43, %v696_v34 }
 0x287   : > { %v698_v38 = vsel %vm697_vm13, %v694_v43, %v696_v34 }
 0x288   : > { %v699_v46 = vrot.slane %v698_v38, 4 }
 0x28a   : > { %vm700_vm14 = vcmp.lt.s32.totalorder %v698_v38, %v699_v46 }
 0x28b   : > { %v701_v47 = vsel %vm700_vm14, %v698_v38, %v699_v46 }
 0x28c   : > { %v702_v35 = vrot.slane %v701_v47, 2 }
 0x28e   : > { %vm703_vm15 = vcmp.lt.s32.totalorder %v701_v47, %v702_v35 }
 0x28f   : > { %v704_v32 = vsel %vm703_vm15, %v701_v47, %v702_v35 }
 0x290   : > { %v705_v49 = vrot.slane %v704_v32, 1 }
 0x292   : > { %vm706_vm0 = vcmp.lt.s32.totalorder %v704_v32, %v705_v49 }
 0x293   : > { %v707_v50 = vsel %vm706_vm0, %v704_v32, %v705_v49 }
 0x294   : > { %708 = vst.msk [vmem:[%s2145_s12 + $0x2] sm:$0x1] %vm369_vm9, %v707_v50  ;;  %vm709_vm1 = vcmp.eq.s32.totalorder %v2093_v61, %v707_v50  ;;  %vm710_vm2 = vcmp.eq.s32.totalorder %v2096_v0, %v707_v50  ;;  %vm711_vm3 = vcmp.eq.s32.totalorder %v2099_v1, %v707_v50  ;;  %vm712_vm4 = vcmp.eq.s32.totalorder %v2102_v2, %v707_v50 }
 0x295   : > { %vm713_vm5 = vcmp.eq.s32.totalorder %v2105_v4, %v707_v50  ;;  %vm714_vm7 = vcmp.eq.s32.totalorder %v2108_v5, %v707_v50  ;;  %vm715_vm8 = vcmp.eq.s32.totalorder %v2111_v6, %v707_v50  ;;  %vm716_vm10 = vcmp.eq.s32.totalorder %v2114_v7, %v707_v50 }
 0x296   : > { %v2450_v51 = vsel %vm709_vm1, inf, %v2376_v36  ;;  %v2453_v37 = vsel %vm710_vm2, inf, %v2379_v45  ;;  %v2456_v54 = vsel %vm711_vm3, inf, %v2382_v52  ;;  %v2459_v55 = vsel %vm712_vm4, inf, %v2385_v53 }
 0x297   : > { %v2462_v39 = vsel %vm713_vm5, inf, %v2388_v44  ;;  %v2465_v58 = vsel %vm714_vm7, inf, %v2391_v56  ;;  %v2468_v59 = vsel %vm715_vm8, inf, %v2394_v57  ;;  %v2471_v36 = vsel %vm716_vm10, inf, %v2397_v48 }
 0x298   : > { %v725_v45 = vsel %vm300_vm6, %v2450_v51, inf  ;;  %v726_v52 = vsel %vm300_vm6, %v2453_v37, inf  ;;  %v727_v53 = vsel %vm300_vm6, %v2456_v54, inf  ;;  %v728_v44 = vsel %vm300_vm6, %v2459_v55, inf }
 0x299   : > { %v729_v56 = vsel %vm300_vm6, %v2462_v39, inf  ;;  %v731_v57 = vsel %vm300_vm6, %v2465_v58, inf  ;;  %v733_v48 = vsel %vm300_vm6, %v2468_v59, inf  ;;  %v735_v60 = vsel %vm300_vm6, %v2471_v36, inf }
 0x29a   : > { %v730_v62 = vmin.f32 %v725_v45, %v729_v56  ;;  %v732_v63 = vmin.f32 %v726_v52, %v731_v57  ;;  %v734_v3 = vmin.f32 %v727_v53, %v733_v48  ;;  %v736_v8 = vmin.f32 %v728_v44, %v735_v60 }
 0x29c   : > { %v737_v9 = vmin.f32 %v730_v62, %v732_v63  ;;  %v738_v10 = vmin.f32 %v734_v3, %v736_v8 }
 0x29e   : > { %v739_v11 = vmin.f32 %v737_v9, %v738_v10 }
 0x2a0   : > { %v740_v12 = vrot.slane %v739_v11, 4 }
 0x2a2   : > { %v741_v13 = vmin.f32 %v739_v11, %v740_v12 }
 0x2a4   : > { %v742_v14 = vrot.slane %v741_v13, 2 }
 0x2a6   : > { %v743_v15 = vmin.f32 %v741_v13, %v742_v14 }
 0x2a8   : > { %v744_v16 = vrot.slane %v743_v15, 1 }
 0x2aa   : > { %v745_v17 = vmin.f32 %v743_v15, %v744_v16 }
 0x2ac   : > { %vm746_vm11 = vcmp.eq.f32.partialorder %v2450_v51, %v745_v17  ;;  %vm747_vm12 = vcmp.eq.f32.partialorder %v2453_v37, %v745_v17  ;;  %vm748_vm13 = vcmp.eq.f32.partialorder %v2456_v54, %v745_v17  ;;  %vm749_vm14 = vcmp.eq.f32.partialorder %v2459_v55, %v745_v17 }
 0x2ad   : > { %vm750_vm15 = vcmp.eq.f32.partialorder %v2462_v39, %v745_v17  ;;  %vm751_vm0 = vcmp.eq.f32.partialorder %v2465_v58, %v745_v17  ;;  %vm752_vm1 = vcmp.eq.f32.partialorder %v2468_v59, %v745_v17  ;;  %vm753_vm2 = vcmp.eq.f32.partialorder %v2471_v36, %v745_v17 }
 0x2ae   : > { %v754_v18 = vsel %vm746_vm11, %v2093_v61, 64  ;;  %v755_v19 = vsel %vm747_vm12, %v2096_v0, 64  ;;  %v756_v20 = vsel %vm748_vm13, %v2099_v1, 64  ;;  %v757_v21 = vsel %vm749_vm14, %v2102_v2, 64 }
 0x2af   : > { %v758_v22 = vsel %vm750_vm15, %v2105_v4, 64  ;;  %v759_v23 = vsel %vm751_vm0, %v2108_v5, 64  ;;  %v760_v24 = vsel %vm752_vm1, %v2111_v6, 64  ;;  %v761_v25 = vsel %vm753_vm2, %v2114_v7, 64 }
 0x2b0   : > { %v762_v26 = vsel %vm300_vm6, %v754_v18, 2147483647  ;;  %v763_v27 = vsel %vm300_vm6, %v755_v19, 2147483647  ;;  %v764_v28 = vsel %vm300_vm6, %v756_v20, 2147483647 }
 0x2b1   : > { %v765_v29 = vsel %vm300_vm6, %v757_v21, 2147483647  ;;  %v766_v30 = vsel %vm300_vm6, %v758_v22, 2147483647  ;;  %v769_v31 = vsel %vm300_vm6, %v759_v23, 2147483647 }
 0x2b2   : > { %vm767_vm3 = vcmp.lt.s32.totalorder %v762_v26, %v766_v30  ;;  %vm770_vm4 = vcmp.lt.s32.totalorder %v763_v27, %v769_v31  ;;  %v772_v33 = vsel %vm300_vm6, %v760_v24, 2147483647  ;;  %v775_v40 = vsel %vm300_vm6, %v761_v25, 2147483647 }
 0x2b3   : > { %v768_v41 = vsel %vm767_vm3, %v762_v26, %v766_v30  ;;  %v771_v42 = vsel %vm770_vm4, %v763_v27, %v769_v31  ;;  %vm773_vm5 = vcmp.lt.s32.totalorder %v764_v28, %v772_v33  ;;  %vm776_vm7 = vcmp.lt.s32.totalorder %v765_v29, %v775_v40 }
 0x2b4   : > { %v774_v43 = vsel %vm773_vm5, %v764_v28, %v772_v33  ;;  %v777_v34 = vsel %vm776_vm7, %v765_v29, %v775_v40  ;;  %vm778_vm8 = vcmp.lt.s32.totalorder %v768_v41, %v771_v42 }
 0x2b5   : > { %v779_v38 = vsel %vm778_vm8, %v768_v41, %v771_v42  ;;  %vm780_vm10 = vcmp.lt.s32.totalorder %v774_v43, %v777_v34 }
 0x2b6   : > { %v781_v46 = vsel %vm780_vm10, %v774_v43, %v777_v34 }
 0x2b7   : > { %vm782_vm11 = vcmp.lt.s32.totalorder %v779_v38, %v781_v46 }
 0x2b8   : > { %v783_v47 = vsel %vm782_vm11, %v779_v38, %v781_v46 }
 0x2b9   : > { %v784_v35 = vrot.slane %v783_v47, 4 }
 0x2bb   : > { %vm785_vm12 = vcmp.lt.s32.totalorder %v783_v47, %v784_v35 }
 0x2bc   : > { %v786_v32 = vsel %vm785_vm12, %v783_v47, %v784_v35 }
 0x2bd   : > { %v787_v49 = vrot.slane %v786_v32, 2 }
 0x2bf   : > { %vm788_vm13 = vcmp.lt.s32.totalorder %v786_v32, %v787_v49 }
 0x2c0   : > { %v789_v50 = vsel %vm788_vm13, %v786_v32, %v787_v49 }
 0x2c1   : > { %v790_v45 = vrot.slane %v789_v50, 1 }
 0x2c3   : > { %vm791_vm14 = vcmp.lt.s32.totalorder %v789_v50, %v790_v45 }
 0x2c4   : > { %v792_v52 = vsel %vm791_vm14, %v789_v50, %v790_v45 }
 0x2c5   : > { %vm793_vm15 = vcmp.eq.s32.totalorder %v2093_v61, %v792_v52  ;;  %vm794_vm0 = vcmp.eq.s32.totalorder %v2096_v0, %v792_v52  ;;  %vm795_vm1 = vcmp.eq.s32.totalorder %v2099_v1, %v792_v52  ;;  %vm796_vm2 = vcmp.eq.s32.totalorder %v2102_v2, %v792_v52 }
 0x2c6   : > { %vm797_vm3 = vcmp.eq.s32.totalorder %v2105_v4, %v792_v52  ;;  %vm798_vm4 = vcmp.eq.s32.totalorder %v2108_v5, %v792_v52  ;;  %vm799_vm5 = vcmp.eq.s32.totalorder %v2111_v6, %v792_v52  ;;  %vm800_vm7 = vcmp.eq.s32.totalorder %v2114_v7, %v792_v52 }
 0x2c7   : > { %v2522_v53 = vsel %vm793_vm15, inf, %v2450_v51  ;;  %v2525_v44 = vsel %vm794_vm0, inf, %v2453_v37  ;;  %v2528_v56 = vsel %vm795_vm1, inf, %v2456_v54  ;;  %v2531_v57 = vsel %vm796_vm2, inf, %v2459_v55 }
 0x2c8   : > { %v2534_v48 = vsel %vm797_vm3, inf, %v2462_v39  ;;  %v2537_v60 = vsel %vm798_vm4, inf, %v2465_v58  ;;  %v2540_v62 = vsel %vm799_vm5, inf, %v2468_v59  ;;  %v2543_v51 = vsel %vm800_vm7, inf, %v2471_v36 }
 0x2c9   : > { %v809_v37 = vsel %vm300_vm6, %v2522_v53, inf  ;;  %v810_v54 = vsel %vm300_vm6, %v2525_v44, inf  ;;  %v811_v55 = vsel %vm300_vm6, %v2528_v56, inf  ;;  %v812_v39 = vsel %vm300_vm6, %v2531_v57, inf }
 0x2ca   : > { %v813_v58 = vsel %vm300_vm6, %v2534_v48, inf  ;;  %v815_v59 = vsel %vm300_vm6, %v2537_v60, inf  ;;  %v817_v36 = vsel %vm300_vm6, %v2540_v62, inf  ;;  %v819_v63 = vsel %vm300_vm6, %v2543_v51, inf }
 0x2cb   : > { %v814_v3 = vmin.f32 %v809_v37, %v813_v58  ;;  %v816_v8 = vmin.f32 %v810_v54, %v815_v59  ;;  %v818_v9 = vmin.f32 %v811_v55, %v817_v36  ;;  %v820_v10 = vmin.f32 %v812_v39, %v819_v63 }
 0x2cd   : > { %v821_v11 = vmin.f32 %v814_v3, %v816_v8  ;;  %v822_v12 = vmin.f32 %v818_v9, %v820_v10 }
 0x2cf   : > { %v823_v13 = vmin.f32 %v821_v11, %v822_v12 }
 0x2d1   : > { %v824_v14 = vrot.slane %v823_v13, 4 }
 0x2d3   : > { %v825_v15 = vmin.f32 %v823_v13, %v824_v14 }
 0x2d5   : > { %v826_v16 = vrot.slane %v825_v15, 2 }
 0x2d7   : > { %v827_v17 = vmin.f32 %v825_v15, %v826_v16 }
 0x2d9   : > { %v828_v18 = vrot.slane %v827_v17, 1 }
 0x2db   : > { %v829_v19 = vmin.f32 %v827_v17, %v828_v18 }
 0x2dd   : > { %vm830_vm8 = vcmp.eq.f32.partialorder %v2522_v53, %v829_v19  ;;  %vm831_vm10 = vcmp.eq.f32.partialorder %v2525_v44, %v829_v19  ;;  %vm832_vm11 = vcmp.eq.f32.partialorder %v2528_v56, %v829_v19  ;;  %vm833_vm12 = vcmp.eq.f32.partialorder %v2531_v57, %v829_v19 }
 0x2de   : > { %vm834_vm13 = vcmp.eq.f32.partialorder %v2534_v48, %v829_v19  ;;  %vm835_vm14 = vcmp.eq.f32.partialorder %v2537_v60, %v829_v19  ;;  %vm836_vm15 = vcmp.eq.f32.partialorder %v2540_v62, %v829_v19  ;;  %vm837_vm0 = vcmp.eq.f32.partialorder %v2543_v51, %v829_v19 }
 0x2df   : > { %v838_v20 = vsel %vm830_vm8, %v2093_v61, 64  ;;  %v839_v21 = vsel %vm831_vm10, %v2096_v0, 64  ;;  %v840_v22 = vsel %vm832_vm11, %v2099_v1, 64  ;;  %v841_v23 = vsel %vm833_vm12, %v2102_v2, 64 }
 0x2e0   : > { %v842_v24 = vsel %vm834_vm13, %v2105_v4, 64  ;;  %v843_v25 = vsel %vm835_vm14, %v2108_v5, 64  ;;  %v844_v26 = vsel %vm836_vm15, %v2111_v6, 64  ;;  %v845_v27 = vsel %vm837_vm0, %v2114_v7, 64 }
 0x2e1   : > { %v846_v28 = vsel %vm300_vm6, %v838_v20, 2147483647  ;;  %v847_v29 = vsel %vm300_vm6, %v839_v21, 2147483647  ;;  %v848_v30 = vsel %vm300_vm6, %v840_v22, 2147483647 }
 0x2e2   : > { %v849_v31 = vsel %vm300_vm6, %v841_v23, 2147483647  ;;  %v850_v33 = vsel %vm300_vm6, %v842_v24, 2147483647  ;;  %v853_v40 = vsel %vm300_vm6, %v843_v25, 2147483647 }
 0x2e3   : > { %vm851_vm1 = vcmp.lt.s32.totalorder %v846_v28, %v850_v33  ;;  %vm854_vm2 = vcmp.lt.s32.totalorder %v847_v29, %v853_v40  ;;  %v856_v41 = vsel %vm300_vm6, %v844_v26, 2147483647  ;;  %v859_v42 = vsel %vm300_vm6, %v845_v27, 2147483647 }
 0x2e4   : > { %v852_v43 = vsel %vm851_vm1, %v846_v28, %v850_v33  ;;  %v855_v34 = vsel %vm854_vm2, %v847_v29, %v853_v40  ;;  %vm857_vm3 = vcmp.lt.s32.totalorder %v848_v30, %v856_v41  ;;  %vm860_vm4 = vcmp.lt.s32.totalorder %v849_v31, %v859_v42 }
 0x2e5   : > { %v858_v38 = vsel %vm857_vm3, %v848_v30, %v856_v41  ;;  %v861_v46 = vsel %vm860_vm4, %v849_v31, %v859_v42  ;;  %vm862_vm5 = vcmp.lt.s32.totalorder %v852_v43, %v855_v34 }
 0x2e6   : > { %v863_v47 = vsel %vm862_vm5, %v852_v43, %v855_v34  ;;  %vm864_vm7 = vcmp.lt.s32.totalorder %v858_v38, %v861_v46 }
 0x2e7   : > { %v865_v35 = vsel %vm864_vm7, %v858_v38, %v861_v46 }
 0x2e8   : > { %vm866_vm8 = vcmp.lt.s32.totalorder %v863_v47, %v865_v35 }
 0x2e9   : > { %v867_v32 = vsel %vm866_vm8, %v863_v47, %v865_v35 }
 0x2ea   : > { %v868_v49 = vrot.slane %v867_v32, 4 }
 0x2ec   : > { %vm869_vm10 = vcmp.lt.s32.totalorder %v867_v32, %v868_v49 }
 0x2ed   : > { %v870_v50 = vsel %vm869_vm10, %v867_v32, %v868_v49 }
 0x2ee   : > { %v871_v45 = vrot.slane %v870_v50, 2 }
 0x2f0   : > { %vm872_vm11 = vcmp.lt.s32.totalorder %v870_v50, %v871_v45 }
 0x2f1   : > { %v873_v52 = vsel %vm872_vm11, %v870_v50, %v871_v45 }
 0x2f2   : > { %v874_v37 = vrot.slane %v873_v52, 1 }
 0x2f4   : > { %vm875_vm12 = vcmp.lt.s32.totalorder %v873_v52, %v874_v37 }
 0x2f5   : > { %v876_v54 = vsel %vm875_vm12, %v873_v52, %v874_v37 }
 0x2f6   : > { %877 = vst.msk [vmem:[%s2145_s12 + $0x3] sm:$0x1] %vm369_vm9, %v876_v54  ;;  %vm878_vm13 = vcmp.eq.s32.totalorder %v2093_v61, %v876_v54  ;;  %vm879_vm14 = vcmp.eq.s32.totalorder %v2096_v0, %v876_v54  ;;  %vm880_vm15 = vcmp.eq.s32.totalorder %v2099_v1, %v876_v54  ;;  %vm881_vm0 = vcmp.eq.s32.totalorder %v2102_v2, %v876_v54 }
 0x2f7   : > { %vm882_vm1 = vcmp.eq.s32.totalorder %v2105_v4, %v876_v54  ;;  %vm883_vm2 = vcmp.eq.s32.totalorder %v2108_v5, %v876_v54  ;;  %vm884_vm3 = vcmp.eq.s32.totalorder %v2111_v6, %v876_v54  ;;  %vm885_vm4 = vcmp.eq.s32.totalorder %v2114_v7, %v876_v54 }
 0x2f8   : > { %v2596_v55 = vsel %vm878_vm13, inf, %v2522_v53  ;;  %v2599_v39 = vsel %vm879_vm14, inf, %v2525_v44  ;;  %v2602_v58 = vsel %vm880_vm15, inf, %v2528_v56  ;;  %v2605_v59 = vsel %vm881_vm0, inf, %v2531_v57 }
 0x2f9   : > { %v2608_v36 = vsel %vm882_vm1, inf, %v2534_v48  ;;  %v2611_v63 = vsel %vm883_vm2, inf, %v2537_v60  ;;  %v2614_v3 = vsel %vm884_vm3, inf, %v2540_v62  ;;  %v2617_v53 = vsel %vm885_vm4, inf, %v2543_v51 }
 0x2fa   : > { %v894_v44 = vsel %vm300_vm6, %v2596_v55, inf  ;;  %v895_v56 = vsel %vm300_vm6, %v2599_v39, inf  ;;  %v896_v57 = vsel %vm300_vm6, %v2602_v58, inf  ;;  %v897_v48 = vsel %vm300_vm6, %v2605_v59, inf }
 0x2fb   : > { %v898_v60 = vsel %vm300_vm6, %v2608_v36, inf  ;;  %v900_v62 = vsel %vm300_vm6, %v2611_v63, inf  ;;  %v902_v51 = vsel %vm300_vm6, %v2614_v3, inf  ;;  %v904_v8 = vsel %vm300_vm6, %v2617_v53, inf }
 0x2fc   : > { %v899_v9 = vmin.f32 %v894_v44, %v898_v60  ;;  %v901_v10 = vmin.f32 %v895_v56, %v900_v62  ;;  %v903_v11 = vmin.f32 %v896_v57, %v902_v51  ;;  %v905_v12 = vmin.f32 %v897_v48, %v904_v8 }
 0x2fe   : > { %v906_v13 = vmin.f32 %v899_v9, %v901_v10  ;;  %v907_v14 = vmin.f32 %v903_v11, %v905_v12 }
 0x300   : > { %v908_v15 = vmin.f32 %v906_v13, %v907_v14 }
 0x302   : > { %v909_v16 = vrot.slane %v908_v15, 4 }
 0x304   : > { %v910_v17 = vmin.f32 %v908_v15, %v909_v16 }
 0x306   : > { %v911_v18 = vrot.slane %v910_v17, 2 }
 0x308   : > { %v912_v19 = vmin.f32 %v910_v17, %v911_v18 }
 0x30a   : > { %v913_v20 = vrot.slane %v912_v19, 1 }
 0x30c   : > { %v914_v21 = vmin.f32 %v912_v19, %v913_v20 }
 0x30e   : > { %vm915_vm5 = vcmp.eq.f32.partialorder %v2596_v55, %v914_v21  ;;  %vm916_vm7 = vcmp.eq.f32.partialorder %v2599_v39, %v914_v21  ;;  %vm917_vm8 = vcmp.eq.f32.partialorder %v2602_v58, %v914_v21  ;;  %vm918_vm10 = vcmp.eq.f32.partialorder %v2605_v59, %v914_v21 }
 0x30f   : > { %vm919_vm11 = vcmp.eq.f32.partialorder %v2608_v36, %v914_v21  ;;  %vm920_vm12 = vcmp.eq.f32.partialorder %v2611_v63, %v914_v21  ;;  %vm921_vm13 = vcmp.eq.f32.partialorder %v2614_v3, %v914_v21  ;;  %vm922_vm14 = vcmp.eq.f32.partialorder %v2617_v53, %v914_v21 }
 0x310   : > { %v923_v22 = vsel %vm915_vm5, %v2093_v61, 64  ;;  %v924_v23 = vsel %vm916_vm7, %v2096_v0, 64  ;;  %v925_v24 = vsel %vm917_vm8, %v2099_v1, 64  ;;  %v926_v25 = vsel %vm918_vm10, %v2102_v2, 64 }
 0x311   : > { %v927_v26 = vsel %vm919_vm11, %v2105_v4, 64  ;;  %v928_v27 = vsel %vm920_vm12, %v2108_v5, 64  ;;  %v929_v28 = vsel %vm921_vm13, %v2111_v6, 64  ;;  %v930_v29 = vsel %vm922_vm14, %v2114_v7, 64 }
 0x312   : > { %v931_v30 = vsel %vm300_vm6, %v923_v22, 2147483647  ;;  %v932_v31 = vsel %vm300_vm6, %v924_v23, 2147483647  ;;  %v933_v33 = vsel %vm300_vm6, %v925_v24, 2147483647 }
 0x313   : > { %v934_v40 = vsel %vm300_vm6, %v926_v25, 2147483647  ;;  %v935_v41 = vsel %vm300_vm6, %v927_v26, 2147483647  ;;  %v938_v42 = vsel %vm300_vm6, %v928_v27, 2147483647 }
 0x314   : > { %vm936_vm15 = vcmp.lt.s32.totalorder %v931_v30, %v935_v41  ;;  %vm939_vm0 = vcmp.lt.s32.totalorder %v932_v31, %v938_v42  ;;  %v941_v43 = vsel %vm300_vm6, %v929_v28, 2147483647  ;;  %v944_v34 = vsel %vm300_vm6, %v930_v29, 2147483647 }
 0x315   : > { %v937_v38 = vsel %vm936_vm15, %v931_v30, %v935_v41  ;;  %v940_v46 = vsel %vm939_vm0, %v932_v31, %v938_v42  ;;  %vm942_vm1 = vcmp.lt.s32.totalorder %v933_v33, %v941_v43  ;;  %vm945_vm2 = vcmp.lt.s32.totalorder %v934_v40, %v944_v34 }
 0x316   : > { %v943_v47 = vsel %vm942_vm1, %v933_v33, %v941_v43  ;;  %v946_v35 = vsel %vm945_vm2, %v934_v40, %v944_v34  ;;  %vm947_vm3 = vcmp.lt.s32.totalorder %v937_v38, %v940_v46 }
 0x317   : > { %v948_v32 = vsel %vm947_vm3, %v937_v38, %v940_v46  ;;  %vm949_vm4 = vcmp.lt.s32.totalorder %v943_v47, %v946_v35 }
 0x318   : > { %v950_v49 = vsel %vm949_vm4, %v943_v47, %v946_v35 }
 0x319   : > { %vm951_vm5 = vcmp.lt.s32.totalorder %v948_v32, %v950_v49 }
 0x31a   : > { %v952_v50 = vsel %vm951_vm5, %v948_v32, %v950_v49 }
 0x31b   : > { %v953_v45 = vrot.slane %v952_v50, 4 }
 0x31d   : > { %vm954_vm7 = vcmp.lt.s32.totalorder %v952_v50, %v953_v45 }
 0x31e   : > { %v955_v52 = vsel %vm954_vm7, %v952_v50, %v953_v45 }
 0x31f   : > { %v956_v37 = vrot.slane %v955_v52, 2 }
 0x321   : > { %vm957_vm8 = vcmp.lt.s32.totalorder %v955_v52, %v956_v37 }
 0x322   : > { %v958_v54 = vsel %vm957_vm8, %v955_v52, %v956_v37 }
 0x323   : > { %v959_v44 = vrot.slane %v958_v54, 1 }
 0x325   : > { %vm960_vm10 = vcmp.lt.s32.totalorder %v958_v54, %v959_v44 }
 0x326   : > { %v961_v56 = vsel %vm960_vm10, %v958_v54, %v959_v44 }
 0x327   : > { %vm962_vm11 = vcmp.eq.s32.totalorder %v2093_v61, %v961_v56  ;;  %vm963_vm12 = vcmp.eq.s32.totalorder %v2096_v0, %v961_v56  ;;  %vm964_vm13 = vcmp.eq.s32.totalorder %v2099_v1, %v961_v56  ;;  %vm965_vm14 = vcmp.eq.s32.totalorder %v2102_v2, %v961_v56 }
 0x328   : > { %vm966_vm15 = vcmp.eq.s32.totalorder %v2105_v4, %v961_v56  ;;  %vm967_vm0 = vcmp.eq.s32.totalorder %v2108_v5, %v961_v56  ;;  %vm968_vm1 = vcmp.eq.s32.totalorder %v2111_v6, %v961_v56  ;;  %vm969_vm2 = vcmp.eq.s32.totalorder %v2114_v7, %v961_v56 }
 0x329   : > { %v2668_v57 = vsel %vm962_vm11, inf, %v2596_v55  ;;  %v2671_v48 = vsel %vm963_vm12, inf, %v2599_v39  ;;  %v2674_v60 = vsel %vm964_vm13, inf, %v2602_v58  ;;  %v2677_v62 = vsel %vm965_vm14, inf, %v2605_v59 }
 0x32a   : > { %v2680_v51 = vsel %vm966_vm15, inf, %v2608_v36  ;;  %v2683_v8 = vsel %vm967_vm0, inf, %v2611_v63  ;;  %v2686_v9 = vsel %vm968_vm1, inf, %v2614_v3  ;;  %v2689_v55 = vsel %vm969_vm2, inf, %v2617_v53 }
 0x32b   : > { %v978_v39 = vsel %vm300_vm6, %v2668_v57, inf  ;;  %v979_v58 = vsel %vm300_vm6, %v2671_v48, inf  ;;  %v980_v59 = vsel %vm300_vm6, %v2674_v60, inf  ;;  %v981_v36 = vsel %vm300_vm6, %v2677_v62, inf }
 0x32c   : > { %v982_v63 = vsel %vm300_vm6, %v2680_v51, inf  ;;  %v984_v3 = vsel %vm300_vm6, %v2683_v8, inf  ;;  %v986_v53 = vsel %vm300_vm6, %v2686_v9, inf  ;;  %v988_v10 = vsel %vm300_vm6, %v2689_v55, inf }
 0x32d   : > { %v983_v11 = vmin.f32 %v978_v39, %v982_v63  ;;  %v985_v12 = vmin.f32 %v979_v58, %v984_v3  ;;  %v987_v13 = vmin.f32 %v980_v59, %v986_v53  ;;  %v989_v14 = vmin.f32 %v981_v36, %v988_v10 }
 0x32f   : > { %v990_v15 = vmin.f32 %v983_v11, %v985_v12  ;;  %v991_v16 = vmin.f32 %v987_v13, %v989_v14 }
 0x331   : > { %v992_v17 = vmin.f32 %v990_v15, %v991_v16 }
 0x333   : > { %v993_v18 = vrot.slane %v992_v17, 4 }
 0x335   : > { %v994_v19 = vmin.f32 %v992_v17, %v993_v18 }
 0x337   : > { %v995_v20 = vrot.slane %v994_v19, 2 }
 0x339   : > { %v996_v21 = vmin.f32 %v994_v19, %v995_v20 }
 0x33b   : > { %v997_v22 = vrot.slane %v996_v21, 1 }
 0x33d   : > { %v998_v23 = vmin.f32 %v996_v21, %v997_v22 }
 0x33f   : > { %vm999_vm3 = vcmp.eq.f32.partialorder %v2668_v57, %v998_v23  ;;  %vm1000_vm4 = vcmp.eq.f32.partialorder %v2671_v48, %v998_v23  ;;  %vm1001_vm5 = vcmp.eq.f32.partialorder %v2674_v60, %v998_v23  ;;  %vm1002_vm7 = vcmp.eq.f32.partialorder %v2677_v62, %v998_v23 }
 0x340   : > { %vm1003_vm8 = vcmp.eq.f32.partialorder %v2680_v51, %v998_v23  ;;  %vm1004_vm10 = vcmp.eq.f32.partialorder %v2683_v8, %v998_v23  ;;  %vm1005_vm11 = vcmp.eq.f32.partialorder %v2686_v9, %v998_v23  ;;  %vm1006_vm12 = vcmp.eq.f32.partialorder %v2689_v55, %v998_v23 }
 0x341   : > { %v1007_v24 = vsel %vm999_vm3, %v2093_v61, 64  ;;  %v1008_v25 = vsel %vm1000_vm4, %v2096_v0, 64  ;;  %v1009_v26 = vsel %vm1001_vm5, %v2099_v1, 64  ;;  %v1010_v27 = vsel %vm1002_vm7, %v2102_v2, 64 }
 0x342   : > { %v1011_v28 = vsel %vm1003_vm8, %v2105_v4, 64  ;;  %v1012_v29 = vsel %vm1004_vm10, %v2108_v5, 64  ;;  %v1013_v30 = vsel %vm1005_vm11, %v2111_v6, 64  ;;  %v1014_v31 = vsel %vm1006_vm12, %v2114_v7, 64 }
 0x343   : > { %v1015_v33 = vsel %vm300_vm6, %v1007_v24, 2147483647  ;;  %v1016_v40 = vsel %vm300_vm6, %v1008_v25, 2147483647  ;;  %v1017_v41 = vsel %vm300_vm6, %v1009_v26, 2147483647 }
 0x344   : > { %v1018_v42 = vsel %vm300_vm6, %v1010_v27, 2147483647  ;;  %v1019_v43 = vsel %vm300_vm6, %v1011_v28, 2147483647  ;;  %v1022_v34 = vsel %vm300_vm6, %v1012_v29, 2147483647 }
 0x345   : > { %vm1020_vm13 = vcmp.lt.s32.totalorder %v1015_v33, %v1019_v43  ;;  %vm1023_vm14 = vcmp.lt.s32.totalorder %v1016_v40, %v1022_v34  ;;  %v1025_v38 = vsel %vm300_vm6, %v1013_v30, 2147483647  ;;  %v1028_v46 = vsel %vm300_vm6, %v1014_v31, 2147483647 }
 0x346   : > { %v1021_v47 = vsel %vm1020_vm13, %v1015_v33, %v1019_v43  ;;  %v1024_v35 = vsel %vm1023_vm14, %v1016_v40, %v1022_v34  ;;  %vm1026_vm15 = vcmp.lt.s32.totalorder %v1017_v41, %v1025_v38  ;;  %vm1029_vm0 = vcmp.lt.s32.totalorder %v1018_v42, %v1028_v46 }
 0x347   : > { %v1027_v32 = vsel %vm1026_vm15, %v1017_v41, %v1025_v38  ;;  %v1030_v49 = vsel %vm1029_vm0, %v1018_v42, %v1028_v46  ;;  %vm1031_vm1 = vcmp.lt.s32.totalorder %v1021_v47, %v1024_v35 }
 0x348   : > { %v1032_v50 = vsel %vm1031_vm1, %v1021_v47, %v1024_v35  ;;  %vm1033_vm2 = vcmp.lt.s32.totalorder %v1027_v32, %v1030_v49 }
 0x349   : > { %v1034_v45 = vsel %vm1033_vm2, %v1027_v32, %v1030_v49 }
 0x34a   : > { %vm1035_vm3 = vcmp.lt.s32.totalorder %v1032_v50, %v1034_v45 }
 0x34b   : > { %v1036_v52 = vsel %vm1035_vm3, %v1032_v50, %v1034_v45 }
 0x34c   : > { %v1037_v37 = vrot.slane %v1036_v52, 4 }
 0x34e   : > { %vm1038_vm4 = vcmp.lt.s32.totalorder %v1036_v52, %v1037_v37 }
 0x34f   : > { %v1039_v54 = vsel %vm1038_vm4, %v1036_v52, %v1037_v37 }
 0x350   : > { %v1040_v44 = vrot.slane %v1039_v54, 2 }
 0x352   : > { %vm1041_vm5 = vcmp.lt.s32.totalorder %v1039_v54, %v1040_v44 }
 0x353   : > { %v1042_v56 = vsel %vm1041_vm5, %v1039_v54, %v1040_v44 }
 0x354   : > { %v1043_v39 = vrot.slane %v1042_v56, 1 }
 0x356   : > { %vm1044_vm7 = vcmp.lt.s32.totalorder %v1042_v56, %v1043_v39 }
 0x357   : > { %v1045_v58 = vsel %vm1044_vm7, %v1042_v56, %v1043_v39 }
 0x358   : > { %1046 = vst.msk [vmem:[%s2145_s12 + $0x4] sm:$0x1] %vm369_vm9, %v1045_v58  ;;  %vm1047_vm8 = vcmp.eq.s32.totalorder %v2093_v61, %v1045_v58  ;;  %vm1048_vm10 = vcmp.eq.s32.totalorder %v2096_v0, %v1045_v58  ;;  %vm1049_vm11 = vcmp.eq.s32.totalorder %v2099_v1, %v1045_v58  ;;  %vm1050_vm12 = vcmp.eq.s32.totalorder %v2102_v2, %v1045_v58 }
 0x359   : > { %vm1051_vm13 = vcmp.eq.s32.totalorder %v2105_v4, %v1045_v58  ;;  %vm1052_vm14 = vcmp.eq.s32.totalorder %v2108_v5, %v1045_v58  ;;  %vm1053_vm15 = vcmp.eq.s32.totalorder %v2111_v6, %v1045_v58  ;;  %vm1054_vm0 = vcmp.eq.s32.totalorder %v2114_v7, %v1045_v58 }
 0x35a   : > { %v2742_v59 = vsel %vm1047_vm8, inf, %v2668_v57  ;;  %v2745_v36 = vsel %vm1048_vm10, inf, %v2671_v48  ;;  %v2748_v63 = vsel %vm1049_vm11, inf, %v2674_v60  ;;  %v2751_v3 = vsel %vm1050_vm12, inf, %v2677_v62 }
 0x35b   : > { %v2754_v53 = vsel %vm1051_vm13, inf, %v2680_v51  ;;  %v2757_v10 = vsel %vm1052_vm14, inf, %v2683_v8  ;;  %v2760_v11 = vsel %vm1053_vm15, inf, %v2686_v9  ;;  %v2763_v57 = vsel %vm1054_vm0, inf, %v2689_v55 }
 0x35c   : > { %v1063_v48 = vsel %vm300_vm6, %v2742_v59, inf  ;;  %v1064_v60 = vsel %vm300_vm6, %v2745_v36, inf  ;;  %v1065_v62 = vsel %vm300_vm6, %v2748_v63, inf  ;;  %v1066_v51 = vsel %vm300_vm6, %v2751_v3, inf }
 0x35d   : > { %v1067_v8 = vsel %vm300_vm6, %v2754_v53, inf  ;;  %v1069_v9 = vsel %vm300_vm6, %v2757_v10, inf  ;;  %v1071_v55 = vsel %vm300_vm6, %v2760_v11, inf  ;;  %v1073_v12 = vsel %vm300_vm6, %v2763_v57, inf }
 0x35e   : > { %v1068_v13 = vmin.f32 %v1063_v48, %v1067_v8  ;;  %v1070_v14 = vmin.f32 %v1064_v60, %v1069_v9  ;;  %v1072_v15 = vmin.f32 %v1065_v62, %v1071_v55  ;;  %v1074_v16 = vmin.f32 %v1066_v51, %v1073_v12 }
 0x360   : > { %v1075_v17 = vmin.f32 %v1068_v13, %v1070_v14  ;;  %v1076_v18 = vmin.f32 %v1072_v15, %v1074_v16 }
 0x362   : > { %v1077_v19 = vmin.f32 %v1075_v17, %v1076_v18 }
 0x364   : > { %v1078_v20 = vrot.slane %v1077_v19, 4 }
 0x366   : > { %v1079_v21 = vmin.f32 %v1077_v19, %v1078_v20 }
 0x368   : > { %v1080_v22 = vrot.slane %v1079_v21, 2 }
 0x36a   : > { %v1081_v23 = vmin.f32 %v1079_v21, %v1080_v22 }
 0x36c   : > { %v1082_v24 = vrot.slane %v1081_v23, 1 }
 0x36e   : > { %v1083_v25 = vmin.f32 %v1081_v23, %v1082_v24 }
 0x370   : > { %vm1084_vm1 = vcmp.eq.f32.partialorder %v2742_v59, %v1083_v25  ;;  %vm1085_vm2 = vcmp.eq.f32.partialorder %v2745_v36, %v1083_v25  ;;  %vm1086_vm3 = vcmp.eq.f32.partialorder %v2748_v63, %v1083_v25  ;;  %vm1087_vm4 = vcmp.eq.f32.partialorder %v2751_v3, %v1083_v25 }
 0x371   : > { %vm1088_vm5 = vcmp.eq.f32.partialorder %v2754_v53, %v1083_v25  ;;  %vm1089_vm7 = vcmp.eq.f32.partialorder %v2757_v10, %v1083_v25  ;;  %vm1090_vm8 = vcmp.eq.f32.partialorder %v2760_v11, %v1083_v25  ;;  %vm1091_vm10 = vcmp.eq.f32.partialorder %v2763_v57, %v1083_v25 }
 0x372   : > { %v1092_v26 = vsel %vm1084_vm1, %v2093_v61, 64  ;;  %v1093_v27 = vsel %vm1085_vm2, %v2096_v0, 64  ;;  %v1094_v28 = vsel %vm1086_vm3, %v2099_v1, 64  ;;  %v1095_v29 = vsel %vm1087_vm4, %v2102_v2, 64 }
 0x373   : > { %v1096_v30 = vsel %vm1088_vm5, %v2105_v4, 64  ;;  %v1097_v31 = vsel %vm1089_vm7, %v2108_v5, 64  ;;  %v1098_v33 = vsel %vm1090_vm8, %v2111_v6, 64  ;;  %v1099_v40 = vsel %vm1091_vm10, %v2114_v7, 64 }
 0x374   : > { %v1100_v41 = vsel %vm300_vm6, %v1092_v26, 2147483647  ;;  %v1101_v42 = vsel %vm300_vm6, %v1093_v27, 2147483647  ;;  %v1102_v43 = vsel %vm300_vm6, %v1094_v28, 2147483647 }
 0x375   : > { %v1103_v34 = vsel %vm300_vm6, %v1095_v29, 2147483647  ;;  %v1104_v38 = vsel %vm300_vm6, %v1096_v30, 2147483647  ;;  %v1107_v46 = vsel %vm300_vm6, %v1097_v31, 2147483647 }
 0x376   : > { %vm1105_vm11 = vcmp.lt.s32.totalorder %v1100_v41, %v1104_v38  ;;  %vm1108_vm12 = vcmp.lt.s32.totalorder %v1101_v42, %v1107_v46  ;;  %v1110_v47 = vsel %vm300_vm6, %v1098_v33, 2147483647  ;;  %v1113_v35 = vsel %vm300_vm6, %v1099_v40, 2147483647 }
 0x377   : > { %v1106_v32 = vsel %vm1105_vm11, %v1100_v41, %v1104_v38  ;;  %v1109_v49 = vsel %vm1108_vm12, %v1101_v42, %v1107_v46  ;;  %vm1111_vm13 = vcmp.lt.s32.totalorder %v1102_v43, %v1110_v47  ;;  %vm1114_vm14 = vcmp.lt.s32.totalorder %v1103_v34, %v1113_v35 }
 0x378   : > { %v1112_v50 = vsel %vm1111_vm13, %v1102_v43, %v1110_v47  ;;  %v1115_v45 = vsel %vm1114_vm14, %v1103_v34, %v1113_v35  ;;  %vm1116_vm15 = vcmp.lt.s32.totalorder %v1106_v32, %v1109_v49 }
 0x379   : > { %v1117_v52 = vsel %vm1116_vm15, %v1106_v32, %v1109_v49  ;;  %vm1118_vm0 = vcmp.lt.s32.totalorder %v1112_v50, %v1115_v45 }
 0x37a   : > { %v1119_v37 = vsel %vm1118_vm0, %v1112_v50, %v1115_v45 }
 0x37b   : > { %vm1120_vm1 = vcmp.lt.s32.totalorder %v1117_v52, %v1119_v37 }
 0x37c   : > { %v1121_v54 = vsel %vm1120_vm1, %v1117_v52, %v1119_v37 }
 0x37d   : > { %v1122_v44 = vrot.slane %v1121_v54, 4 }
 0x37f   : > { %vm1123_vm2 = vcmp.lt.s32.totalorder %v1121_v54, %v1122_v44 }
 0x380   : > { %v1124_v56 = vsel %vm1123_vm2, %v1121_v54, %v1122_v44 }
 0x381   : > { %v1125_v39 = vrot.slane %v1124_v56, 2 }
 0x383   : > { %vm1126_vm3 = vcmp.lt.s32.totalorder %v1124_v56, %v1125_v39 }
 0x384   : > { %v1127_v58 = vsel %vm1126_vm3, %v1124_v56, %v1125_v39 }
 0x385   : > { %v1128_v48 = vrot.slane %v1127_v58, 1 }
 0x387   : > { %vm1129_vm4 = vcmp.lt.s32.totalorder %v1127_v58, %v1128_v48 }
 0x388   : > { %v1130_v60 = vsel %vm1129_vm4, %v1127_v58, %v1128_v48 }
 0x389   : > { %vm1131_vm5 = vcmp.eq.s32.totalorder %v2093_v61, %v1130_v60  ;;  %vm1132_vm7 = vcmp.eq.s32.totalorder %v2096_v0, %v1130_v60  ;;  %vm1133_vm8 = vcmp.eq.s32.totalorder %v2099_v1, %v1130_v60  ;;  %vm1134_vm10 = vcmp.eq.s32.totalorder %v2102_v2, %v1130_v60 }
 0x38a   : > { %vm1135_vm11 = vcmp.eq.s32.totalorder %v2105_v4, %v1130_v60  ;;  %vm1136_vm12 = vcmp.eq.s32.totalorder %v2108_v5, %v1130_v60  ;;  %vm1137_vm13 = vcmp.eq.s32.totalorder %v2111_v6, %v1130_v60  ;;  %vm1138_vm14 = vcmp.eq.s32.totalorder %v2114_v7, %v1130_v60 }
 0x38b   : > { %v2814_v62 = vsel %vm1131_vm5, inf, %v2742_v59  ;;  %v2817_v51 = vsel %vm1132_vm7, inf, %v2745_v36  ;;  %v2820_v8 = vsel %vm1133_vm8, inf, %v2748_v63  ;;  %v2823_v9 = vsel %vm1134_vm10, inf, %v2751_v3 }
 0x38c   : > { %v2826_v55 = vsel %vm1135_vm11, inf, %v2754_v53  ;;  %v2829_v12 = vsel %vm1136_vm12, inf, %v2757_v10  ;;  %v2832_v13 = vsel %vm1137_vm13, inf, %v2760_v11  ;;  %v2835_v59 = vsel %vm1138_vm14, inf, %v2763_v57 }
 0x38d   : > { %v1147_v36 = vsel %vm300_vm6, %v2814_v62, inf  ;;  %v1148_v63 = vsel %vm300_vm6, %v2817_v51, inf  ;;  %v1149_v3 = vsel %vm300_vm6, %v2820_v8, inf  ;;  %v1150_v53 = vsel %vm300_vm6, %v2823_v9, inf }
 0x38e   : > { %v1151_v10 = vsel %vm300_vm6, %v2826_v55, inf  ;;  %v1153_v11 = vsel %vm300_vm6, %v2829_v12, inf  ;;  %v1155_v57 = vsel %vm300_vm6, %v2832_v13, inf  ;;  %v1157_v14 = vsel %vm300_vm6, %v2835_v59, inf }
 0x38f   : > { %v1152_v15 = vmin.f32 %v1147_v36, %v1151_v10  ;;  %v1154_v16 = vmin.f32 %v1148_v63, %v1153_v11  ;;  %v1156_v17 = vmin.f32 %v1149_v3, %v1155_v57  ;;  %v1158_v18 = vmin.f32 %v1150_v53, %v1157_v14 }
 0x391   : > { %v1159_v19 = vmin.f32 %v1152_v15, %v1154_v16  ;;  %v1160_v20 = vmin.f32 %v1156_v17, %v1158_v18 }
 0x393   : > { %v1161_v21 = vmin.f32 %v1159_v19, %v1160_v20 }
 0x395   : > { %v1162_v22 = vrot.slane %v1161_v21, 4 }
 0x397   : > { %v1163_v23 = vmin.f32 %v1161_v21, %v1162_v22 }
 0x399   : > { %v1164_v24 = vrot.slane %v1163_v23, 2 }
 0x39b   : > { %v1165_v25 = vmin.f32 %v1163_v23, %v1164_v24 }
 0x39d   : > { %v1166_v26 = vrot.slane %v1165_v25, 1 }
 0x39f   : > { %v1167_v27 = vmin.f32 %v1165_v25, %v1166_v26 }
 0x3a1   : > { %vm1168_vm15 = vcmp.eq.f32.partialorder %v2814_v62, %v1167_v27  ;;  %vm1169_vm0 = vcmp.eq.f32.partialorder %v2817_v51, %v1167_v27  ;;  %vm1170_vm1 = vcmp.eq.f32.partialorder %v2820_v8, %v1167_v27  ;;  %vm1171_vm2 = vcmp.eq.f32.partialorder %v2823_v9, %v1167_v27 }
 0x3a2   : > { %vm1172_vm3 = vcmp.eq.f32.partialorder %v2826_v55, %v1167_v27  ;;  %vm1173_vm4 = vcmp.eq.f32.partialorder %v2829_v12, %v1167_v27  ;;  %vm1174_vm5 = vcmp.eq.f32.partialorder %v2832_v13, %v1167_v27  ;;  %vm1175_vm7 = vcmp.eq.f32.partialorder %v2835_v59, %v1167_v27 }
 0x3a3   : > { %v1176_v28 = vsel %vm1168_vm15, %v2093_v61, 64  ;;  %v1177_v29 = vsel %vm1169_vm0, %v2096_v0, 64  ;;  %v1178_v30 = vsel %vm1170_vm1, %v2099_v1, 64  ;;  %v1179_v31 = vsel %vm1171_vm2, %v2102_v2, 64 }
 0x3a4   : > { %v1180_v33 = vsel %vm1172_vm3, %v2105_v4, 64  ;;  %v1181_v40 = vsel %vm1173_vm4, %v2108_v5, 64  ;;  %v1182_v41 = vsel %vm1174_vm5, %v2111_v6, 64  ;;  %v1183_v42 = vsel %vm1175_vm7, %v2114_v7, 64 }
 0x3a5   : > { %v1184_v43 = vsel %vm300_vm6, %v1176_v28, 2147483647  ;;  %v1185_v34 = vsel %vm300_vm6, %v1177_v29, 2147483647  ;;  %v1186_v38 = vsel %vm300_vm6, %v1178_v30, 2147483647 }
 0x3a6   : > { %v1187_v46 = vsel %vm300_vm6, %v1179_v31, 2147483647  ;;  %v1188_v47 = vsel %vm300_vm6, %v1180_v33, 2147483647  ;;  %v1191_v35 = vsel %vm300_vm6, %v1181_v40, 2147483647 }
 0x3a7   : > { %vm1189_vm8 = vcmp.lt.s32.totalorder %v1184_v43, %v1188_v47  ;;  %vm1192_vm10 = vcmp.lt.s32.totalorder %v1185_v34, %v1191_v35  ;;  %v1194_v32 = vsel %vm300_vm6, %v1182_v41, 2147483647  ;;  %v1197_v49 = vsel %vm300_vm6, %v1183_v42, 2147483647 }
 0x3a8   : > { %v1190_v50 = vsel %vm1189_vm8, %v1184_v43, %v1188_v47  ;;  %v1193_v45 = vsel %vm1192_vm10, %v1185_v34, %v1191_v35  ;;  %vm1195_vm11 = vcmp.lt.s32.totalorder %v1186_v38, %v1194_v32  ;;  %vm1198_vm12 = vcmp.lt.s32.totalorder %v1187_v46, %v1197_v49 }
 0x3a9   : > { %v1196_v52 = vsel %vm1195_vm11, %v1186_v38, %v1194_v32  ;;  %v1199_v37 = vsel %vm1198_vm12, %v1187_v46, %v1197_v49  ;;  %vm1200_vm13 = vcmp.lt.s32.totalorder %v1190_v50, %v1193_v45 }
 0x3aa   : > { %v1201_v54 = vsel %vm1200_vm13, %v1190_v50, %v1193_v45  ;;  %vm1202_vm14 = vcmp.lt.s32.totalorder %v1196_v52, %v1199_v37 }
 0x3ab   : > { %v1203_v44 = vsel %vm1202_vm14, %v1196_v52, %v1199_v37 }
 0x3ac   : > { %vm1204_vm15 = vcmp.lt.s32.totalorder %v1201_v54, %v1203_v44 }
 0x3ad   : > { %v1205_v56 = vsel %vm1204_vm15, %v1201_v54, %v1203_v44 }
 0x3ae   : > { %v1206_v39 = vrot.slane %v1205_v56, 4 }
 0x3b0   : > { %vm1207_vm0 = vcmp.lt.s32.totalorder %v1205_v56, %v1206_v39 }
 0x3b1   : > { %v1208_v58 = vsel %vm1207_vm0, %v1205_v56, %v1206_v39 }
 0x3b2   : > { %v1209_v48 = vrot.slane %v1208_v58, 2 }
 0x3b4   : > { %vm1210_vm1 = vcmp.lt.s32.totalorder %v1208_v58, %v1209_v48 }
 0x3b5   : > { %v1211_v60 = vsel %vm1210_vm1, %v1208_v58, %v1209_v48 }
 0x3b6   : > { %v1212_v36 = vrot.slane %v1211_v60, 1 }
 0x3b8   : > { %vm1213_vm2 = vcmp.lt.s32.totalorder %v1211_v60, %v1212_v36 }
 0x3b9   : > { %v1214_v63 = vsel %vm1213_vm2, %v1211_v60, %v1212_v36 }
 0x3ba   : > { %1215 = vst.msk [vmem:[%s2145_s12 + $0x5] sm:$0x1] %vm369_vm9, %v1214_v63  ;;  %vm1216_vm3 = vcmp.eq.s32.totalorder %v2093_v61, %v1214_v63  ;;  %vm1217_vm4 = vcmp.eq.s32.totalorder %v2096_v0, %v1214_v63  ;;  %vm1218_vm5 = vcmp.eq.s32.totalorder %v2099_v1, %v1214_v63  ;;  %vm1219_vm7 = vcmp.eq.s32.totalorder %v2102_v2, %v1214_v63 }
 0x3bb   : > { %vm1220_vm8 = vcmp.eq.s32.totalorder %v2105_v4, %v1214_v63  ;;  %vm1221_vm10 = vcmp.eq.s32.totalorder %v2108_v5, %v1214_v63  ;;  %vm1222_vm11 = vcmp.eq.s32.totalorder %v2111_v6, %v1214_v63  ;;  %vm1223_vm12 = vcmp.eq.s32.totalorder %v2114_v7, %v1214_v63 }
 0x3bc   : > { %v2888_v3 = vsel %vm1216_vm3, inf, %v2814_v62  ;;  %v2891_v53 = vsel %vm1217_vm4, inf, %v2817_v51  ;;  %v2894_v10 = vsel %vm1218_vm5, inf, %v2820_v8  ;;  %v2897_v11 = vsel %vm1219_vm7, inf, %v2823_v9 }
 0x3bd   : > { %v2900_v57 = vsel %vm1220_vm8, inf, %v2826_v55  ;;  %v2903_v14 = vsel %vm1221_vm10, inf, %v2829_v12  ;;  %v2906_v15 = vsel %vm1222_vm11, inf, %v2832_v13  ;;  %v2909_v62 = vsel %vm1223_vm12, inf, %v2835_v59 }
 0x3be   : > { %v1232_v51 = vsel %vm300_vm6, %v2888_v3, inf  ;;  %v1233_v8 = vsel %vm300_vm6, %v2891_v53, inf  ;;  %v1234_v9 = vsel %vm300_vm6, %v2894_v10, inf  ;;  %v1235_v55 = vsel %vm300_vm6, %v2897_v11, inf }
 0x3bf   : > { %v1236_v12 = vsel %vm300_vm6, %v2900_v57, inf  ;;  %v1238_v13 = vsel %vm300_vm6, %v2903_v14, inf  ;;  %v1240_v59 = vsel %vm300_vm6, %v2906_v15, inf  ;;  %v1242_v16 = vsel %vm300_vm6, %v2909_v62, inf }
 0x3c0   : > { %v1237_v17 = vmin.f32 %v1232_v51, %v1236_v12  ;;  %v1239_v18 = vmin.f32 %v1233_v8, %v1238_v13  ;;  %v1241_v19 = vmin.f32 %v1234_v9, %v1240_v59  ;;  %v1243_v20 = vmin.f32 %v1235_v55, %v1242_v16 }
 0x3c2   : > { %v1244_v21 = vmin.f32 %v1237_v17, %v1239_v18  ;;  %v1245_v22 = vmin.f32 %v1241_v19, %v1243_v20 }
 0x3c4   : > { %v1246_v23 = vmin.f32 %v1244_v21, %v1245_v22 }
 0x3c6   : > { %v1247_v24 = vrot.slane %v1246_v23, 4 }
 0x3c8   : > { %v1248_v25 = vmin.f32 %v1246_v23, %v1247_v24 }
 0x3ca   : > { %v1249_v26 = vrot.slane %v1248_v25, 2 }
 0x3cc   : > { %v1250_v27 = vmin.f32 %v1248_v25, %v1249_v26 }
 0x3ce   : > { %v1251_v28 = vrot.slane %v1250_v27, 1 }
 0x3d0   : > { %v1252_v29 = vmin.f32 %v1250_v27, %v1251_v28 }
 0x3d2   : > { %vm1253_vm13 = vcmp.eq.f32.partialorder %v2888_v3, %v1252_v29  ;;  %vm1254_vm14 = vcmp.eq.f32.partialorder %v2891_v53, %v1252_v29  ;;  %vm1255_vm15 = vcmp.eq.f32.partialorder %v2894_v10, %v1252_v29  ;;  %vm1256_vm0 = vcmp.eq.f32.partialorder %v2897_v11, %v1252_v29 }
 0x3d3   : > { %vm1257_vm1 = vcmp.eq.f32.partialorder %v2900_v57, %v1252_v29  ;;  %vm1258_vm2 = vcmp.eq.f32.partialorder %v2903_v14, %v1252_v29  ;;  %vm1259_vm3 = vcmp.eq.f32.partialorder %v2906_v15, %v1252_v29  ;;  %vm1260_vm4 = vcmp.eq.f32.partialorder %v2909_v62, %v1252_v29 }
 0x3d4   : > { %v1261_v30 = vsel %vm1253_vm13, %v2093_v61, 64  ;;  %v1262_v31 = vsel %vm1254_vm14, %v2096_v0, 64  ;;  %v1263_v33 = vsel %vm1255_vm15, %v2099_v1, 64  ;;  %v1264_v40 = vsel %vm1256_vm0, %v2102_v2, 64 }
 0x3d5   : > { %v1265_v41 = vsel %vm1257_vm1, %v2105_v4, 64  ;;  %v1266_v42 = vsel %vm1258_vm2, %v2108_v5, 64  ;;  %v1267_v43 = vsel %vm1259_vm3, %v2111_v6, 64  ;;  %v1268_v34 = vsel %vm1260_vm4, %v2114_v7, 64 }
 0x3d6   : > { %v1269_v38 = vsel %vm300_vm6, %v1261_v30, 2147483647  ;;  %v1270_v46 = vsel %vm300_vm6, %v1262_v31, 2147483647  ;;  %v1271_v47 = vsel %vm300_vm6, %v1263_v33, 2147483647 }
 0x3d7   : > { %v1272_v35 = vsel %vm300_vm6, %v1264_v40, 2147483647  ;;  %v1273_v32 = vsel %vm300_vm6, %v1265_v41, 2147483647  ;;  %v1276_v49 = vsel %vm300_vm6, %v1266_v42, 2147483647 }
 0x3d8   : > { %vm1274_vm5 = vcmp.lt.s32.totalorder %v1269_v38, %v1273_v32  ;;  %vm1277_vm7 = vcmp.lt.s32.totalorder %v1270_v46, %v1276_v49  ;;  %v1279_v50 = vsel %vm300_vm6, %v1267_v43, 2147483647  ;;  %v1282_v45 = vsel %vm300_vm6, %v1268_v34, 2147483647 }
 0x3d9   : > { %v1275_v52 = vsel %vm1274_vm5, %v1269_v38, %v1273_v32  ;;  %v1278_v37 = vsel %vm1277_vm7, %v1270_v46, %v1276_v49  ;;  %vm1280_vm8 = vcmp.lt.s32.totalorder %v1271_v47, %v1279_v50  ;;  %vm1283_vm10 = vcmp.lt.s32.totalorder %v1272_v35, %v1282_v45 }
 0x3da   : > { %v1281_v54 = vsel %vm1280_vm8, %v1271_v47, %v1279_v50  ;;  %v1284_v44 = vsel %vm1283_vm10, %v1272_v35, %v1282_v45  ;;  %vm1285_vm11 = vcmp.lt.s32.totalorder %v1275_v52, %v1278_v37 }
 0x3db   : > { %v1286_v56 = vsel %vm1285_vm11, %v1275_v52, %v1278_v37  ;;  %vm1287_vm12 = vcmp.lt.s32.totalorder %v1281_v54, %v1284_v44 }
 0x3dc   : > { %v1288_v39 = vsel %vm1287_vm12, %v1281_v54, %v1284_v44 }
 0x3dd   : > { %vm1289_vm13 = vcmp.lt.s32.totalorder %v1286_v56, %v1288_v39 }
 0x3de   : > { %v1290_v58 = vsel %vm1289_vm13, %v1286_v56, %v1288_v39 }
 0x3df   : > { %v1291_v48 = vrot.slane %v1290_v58, 4 }
 0x3e1   : > { %vm1292_vm14 = vcmp.lt.s32.totalorder %v1290_v58, %v1291_v48 }
 0x3e2   : > { %v1293_v60 = vsel %vm1292_vm14, %v1290_v58, %v1291_v48 }
 0x3e3   : > { %v1294_v36 = vrot.slane %v1293_v60, 2 }
 0x3e5   : > { %vm1295_vm15 = vcmp.lt.s32.totalorder %v1293_v60, %v1294_v36 }
 0x3e6   : > { %v1296_v63 = vsel %vm1295_vm15, %v1293_v60, %v1294_v36 }
 0x3e7   : > { %v1297_v51 = vrot.slane %v1296_v63, 1 }
 0x3e9   : > { %vm1298_vm0 = vcmp.lt.s32.totalorder %v1296_v63, %v1297_v51 }
 0x3ea   : > { %v1299_v8 = vsel %vm1298_vm0, %v1296_v63, %v1297_v51 }
 0x3eb   : > { %vm1300_vm1 = vcmp.eq.s32.totalorder %v2093_v61, %v1299_v8  ;;  %vm1301_vm2 = vcmp.eq.s32.totalorder %v2096_v0, %v1299_v8  ;;  %vm1302_vm3 = vcmp.eq.s32.totalorder %v2099_v1, %v1299_v8  ;;  %vm1303_vm4 = vcmp.eq.s32.totalorder %v2102_v2, %v1299_v8 }
 0x3ec   : > { %vm1304_vm5 = vcmp.eq.s32.totalorder %v2105_v4, %v1299_v8  ;;  %vm1305_vm7 = vcmp.eq.s32.totalorder %v2108_v5, %v1299_v8  ;;  %vm1306_vm8 = vcmp.eq.s32.totalorder %v2111_v6, %v1299_v8  ;;  %vm1307_vm10 = vcmp.eq.s32.totalorder %v2114_v7, %v1299_v8 }
 0x3ed   : > { %v2960_v9 = vsel %vm1300_vm1, inf, %v2888_v3  ;;  %v2963_v55 = vsel %vm1301_vm2, inf, %v2891_v53  ;;  %v2966_v12 = vsel %vm1302_vm3, inf, %v2894_v10  ;;  %v2969_v13 = vsel %vm1303_vm4, inf, %v2897_v11 }
 0x3ee   : > { %v2972_v59 = vsel %vm1304_vm5, inf, %v2900_v57  ;;  %v2975_v16 = vsel %vm1305_vm7, inf, %v2903_v14  ;;  %v2978_v17 = vsel %vm1306_vm8, inf, %v2906_v15  ;;  %v2981_v3 = vsel %vm1307_vm10, inf, %v2909_v62 }
 0x3ef   : > { %v1316_v53 = vsel %vm300_vm6, %v2960_v9, inf  ;;  %v1317_v10 = vsel %vm300_vm6, %v2963_v55, inf  ;;  %v1318_v11 = vsel %vm300_vm6, %v2966_v12, inf  ;;  %v1319_v57 = vsel %vm300_vm6, %v2969_v13, inf }
 0x3f0   : > { %v1320_v14 = vsel %vm300_vm6, %v2972_v59, inf  ;;  %v1322_v15 = vsel %vm300_vm6, %v2975_v16, inf  ;;  %v1324_v62 = vsel %vm300_vm6, %v2978_v17, inf  ;;  %v1326_v18 = vsel %vm300_vm6, %v2981_v3, inf }
 0x3f1   : > { %v1321_v19 = vmin.f32 %v1316_v53, %v1320_v14  ;;  %v1323_v20 = vmin.f32 %v1317_v10, %v1322_v15  ;;  %v1325_v21 = vmin.f32 %v1318_v11, %v1324_v62  ;;  %v1327_v22 = vmin.f32 %v1319_v57, %v1326_v18 }
 0x3f3   : > { %v1328_v23 = vmin.f32 %v1321_v19, %v1323_v20  ;;  %v1329_v24 = vmin.f32 %v1325_v21, %v1327_v22 }
 0x3f5   : > { %v1330_v25 = vmin.f32 %v1328_v23, %v1329_v24 }
 0x3f7   : > { %v1331_v26 = vrot.slane %v1330_v25, 4 }
 0x3f9   : > { %v1332_v27 = vmin.f32 %v1330_v25, %v1331_v26 }
 0x3fb   : > { %v1333_v28 = vrot.slane %v1332_v27, 2 }
 0x3fd   : > { %v1334_v29 = vmin.f32 %v1332_v27, %v1333_v28 }
 0x3ff   : > { %v1335_v30 = vrot.slane %v1334_v29, 1 }
 0x401   : > { %v1336_v31 = vmin.f32 %v1334_v29, %v1335_v30 }
 0x403   : > { %vm1337_vm11 = vcmp.eq.f32.partialorder %v2960_v9, %v1336_v31  ;;  %vm1338_vm12 = vcmp.eq.f32.partialorder %v2963_v55, %v1336_v31  ;;  %vm1339_vm13 = vcmp.eq.f32.partialorder %v2966_v12, %v1336_v31  ;;  %vm1340_vm14 = vcmp.eq.f32.partialorder %v2969_v13, %v1336_v31 }
 0x404   : > { %vm1341_vm15 = vcmp.eq.f32.partialorder %v2972_v59, %v1336_v31  ;;  %vm1342_vm0 = vcmp.eq.f32.partialorder %v2975_v16, %v1336_v31  ;;  %vm1343_vm1 = vcmp.eq.f32.partialorder %v2978_v17, %v1336_v31  ;;  %vm1344_vm2 = vcmp.eq.f32.partialorder %v2981_v3, %v1336_v31 }
 0x405   : > { %v1345_v33 = vsel %vm1337_vm11, %v2093_v61, 64  ;;  %v1346_v40 = vsel %vm1338_vm12, %v2096_v0, 64  ;;  %v1347_v41 = vsel %vm1339_vm13, %v2099_v1, 64  ;;  %v1348_v42 = vsel %vm1340_vm14, %v2102_v2, 64 }
 0x406   : > { %v1349_v43 = vsel %vm1341_vm15, %v2105_v4, 64  ;;  %v1350_v34 = vsel %vm1342_vm0, %v2108_v5, 64  ;;  %v1351_v38 = vsel %vm1343_vm1, %v2111_v6, 64  ;;  %v1352_v46 = vsel %vm1344_vm2, %v2114_v7, 64 }
 0x407   : > { %v1353_v47 = vsel %vm300_vm6, %v1345_v33, 2147483647  ;;  %v1354_v35 = vsel %vm300_vm6, %v1346_v40, 2147483647  ;;  %v1355_v32 = vsel %vm300_vm6, %v1347_v41, 2147483647 }
 0x408   : > { %v1356_v49 = vsel %vm300_vm6, %v1348_v42, 2147483647  ;;  %v1357_v50 = vsel %vm300_vm6, %v1349_v43, 2147483647  ;;  %v1360_v45 = vsel %vm300_vm6, %v1350_v34, 2147483647 }
 0x409   : > { %vm1358_vm3 = vcmp.lt.s32.totalorder %v1353_v47, %v1357_v50  ;;  %vm1361_vm4 = vcmp.lt.s32.totalorder %v1354_v35, %v1360_v45  ;;  %v1363_v52 = vsel %vm300_vm6, %v1351_v38, 2147483647  ;;  %v1366_v37 = vsel %vm300_vm6, %v1352_v46, 2147483647 }
 0x40a   : > { %v1359_v54 = vsel %vm1358_vm3, %v1353_v47, %v1357_v50  ;;  %v1362_v44 = vsel %vm1361_vm4, %v1354_v35, %v1360_v45  ;;  %vm1364_vm5 = vcmp.lt.s32.totalorder %v1355_v32, %v1363_v52  ;;  %vm1367_vm7 = vcmp.lt.s32.totalorder %v1356_v49, %v1366_v37 }
 0x40b   : > { %v1365_v56 = vsel %vm1364_vm5, %v1355_v32, %v1363_v52  ;;  %v1368_v39 = vsel %vm1367_vm7, %v1356_v49, %v1366_v37  ;;  %vm1369_vm8 = vcmp.lt.s32.totalorder %v1359_v54, %v1362_v44 }
 0x40c   : > { %v1370_v58 = vsel %vm1369_vm8, %v1359_v54, %v1362_v44  ;;  %vm1371_vm10 = vcmp.lt.s32.totalorder %v1365_v56, %v1368_v39 }
 0x40d   : > { %v1372_v48 = vsel %vm1371_vm10, %v1365_v56, %v1368_v39 }
 0x40e   : > { %vm1373_vm11 = vcmp.lt.s32.totalorder %v1370_v58, %v1372_v48 }
 0x40f   : > { %v1374_v60 = vsel %vm1373_vm11, %v1370_v58, %v1372_v48 }
 0x410   : > { %v1375_v36 = vrot.slane %v1374_v60, 4 }
 0x412   : > { %vm1376_vm12 = vcmp.lt.s32.totalorder %v1374_v60, %v1375_v36 }
 0x413   : > { %v1377_v63 = vsel %vm1376_vm12, %v1374_v60, %v1375_v36 }
 0x414   : > { %v1378_v51 = vrot.slane %v1377_v63, 2 }
 0x416   : > { %vm1379_vm13 = vcmp.lt.s32.totalorder %v1377_v63, %v1378_v51 }
 0x417   : > { %v1380_v8 = vsel %vm1379_vm13, %v1377_v63, %v1378_v51 }
 0x418   : > { %v1381_v53 = vrot.slane %v1380_v8, 1 }
 0x41a   : > { %vm1382_vm14 = vcmp.lt.s32.totalorder %v1380_v8, %v1381_v53 }
 0x41b   : > { %v1383_v10 = vsel %vm1382_vm14, %v1380_v8, %v1381_v53 }
 0x41c   : > { %1384 = vst.msk [vmem:[%s2145_s12 + $0x6] sm:$0x1] %vm369_vm9, %v1383_v10  ;;  %vm1385_vm15 = vcmp.eq.s32.totalorder %v2093_v61, %v1383_v10  ;;  %vm1386_vm0 = vcmp.eq.s32.totalorder %v2096_v0, %v1383_v10  ;;  %vm1387_vm1 = vcmp.eq.s32.totalorder %v2099_v1, %v1383_v10  ;;  %vm1388_vm2 = vcmp.eq.s32.totalorder %v2102_v2, %v1383_v10 }
 0x41d   : > { %vm1389_vm3 = vcmp.eq.s32.totalorder %v2105_v4, %v1383_v10  ;;  %vm1390_vm4 = vcmp.eq.s32.totalorder %v2108_v5, %v1383_v10  ;;  %vm1391_vm5 = vcmp.eq.s32.totalorder %v2111_v6, %v1383_v10  ;;  %vm1392_vm7 = vcmp.eq.s32.totalorder %v2114_v7, %v1383_v10 }
 0x41e   : > { %v3034_v11 = vsel %vm1385_vm15, inf, %v2960_v9  ;;  %v3037_v57 = vsel %vm1386_vm0, inf, %v2963_v55  ;;  %v3040_v14 = vsel %vm1387_vm1, inf, %v2966_v12  ;;  %v3043_v15 = vsel %vm1388_vm2, inf, %v2969_v13 }
 0x41f   : > { %v3046_v62 = vsel %vm1389_vm3, inf, %v2972_v59  ;;  %v3049_v18 = vsel %vm1390_vm4, inf, %v2975_v16  ;;  %v3052_v19 = vsel %vm1391_vm5, inf, %v2978_v17  ;;  %v3055_v9 = vsel %vm1392_vm7, inf, %v2981_v3 }
 0x420   : > { %v1401_v55 = vsel %vm300_vm6, %v3034_v11, inf  ;;  %v1402_v12 = vsel %vm300_vm6, %v3037_v57, inf  ;;  %v1403_v13 = vsel %vm300_vm6, %v3040_v14, inf  ;;  %v1404_v59 = vsel %vm300_vm6, %v3043_v15, inf }
 0x421   : > { %v1405_v16 = vsel %vm300_vm6, %v3046_v62, inf  ;;  %v1407_v17 = vsel %vm300_vm6, %v3049_v18, inf  ;;  %v1409_v3 = vsel %vm300_vm6, %v3052_v19, inf  ;;  %v1411_v20 = vsel %vm300_vm6, %v3055_v9, inf }
 0x422   : > { %v1406_v21 = vmin.f32 %v1401_v55, %v1405_v16  ;;  %v1408_v22 = vmin.f32 %v1402_v12, %v1407_v17  ;;  %v1410_v23 = vmin.f32 %v1403_v13, %v1409_v3  ;;  %v1412_v24 = vmin.f32 %v1404_v59, %v1411_v20 }
 0x424   : > { %v1413_v25 = vmin.f32 %v1406_v21, %v1408_v22  ;;  %v1414_v26 = vmin.f32 %v1410_v23, %v1412_v24 }
 0x426   : > { %v1415_v27 = vmin.f32 %v1413_v25, %v1414_v26 }
 0x428   : > { %v1416_v28 = vrot.slane %v1415_v27, 4 }
 0x42a   : > { %v1417_v29 = vmin.f32 %v1415_v27, %v1416_v28 }
 0x42c   : > { %v1418_v30 = vrot.slane %v1417_v29, 2 }
 0x42e   : > { %v1419_v31 = vmin.f32 %v1417_v29, %v1418_v30 }
 0x430   : > { %v1420_v33 = vrot.slane %v1419_v31, 1 }
 0x432   : > { %v1421_v40 = vmin.f32 %v1419_v31, %v1420_v33 }
 0x434   : > { %vm1422_vm8 = vcmp.eq.f32.partialorder %v3034_v11, %v1421_v40  ;;  %vm1423_vm10 = vcmp.eq.f32.partialorder %v3037_v57, %v1421_v40  ;;  %vm1424_vm11 = vcmp.eq.f32.partialorder %v3040_v14, %v1421_v40  ;;  %vm1425_vm12 = vcmp.eq.f32.partialorder %v3043_v15, %v1421_v40 }
 0x435   : > { %vm1426_vm13 = vcmp.eq.f32.partialorder %v3046_v62, %v1421_v40  ;;  %vm1427_vm14 = vcmp.eq.f32.partialorder %v3049_v18, %v1421_v40  ;;  %vm1428_vm15 = vcmp.eq.f32.partialorder %v3052_v19, %v1421_v40  ;;  %vm1429_vm0 = vcmp.eq.f32.partialorder %v3055_v9, %v1421_v40 }
 0x436   : > { %v1430_v41 = vsel %vm1422_vm8, %v2093_v61, 64  ;;  %v1431_v42 = vsel %vm1423_vm10, %v2096_v0, 64  ;;  %v1432_v43 = vsel %vm1424_vm11, %v2099_v1, 64  ;;  %v1433_v34 = vsel %vm1425_vm12, %v2102_v2, 64 }
 0x437   : > { %v1434_v38 = vsel %vm1426_vm13, %v2105_v4, 64  ;;  %v1435_v46 = vsel %vm1427_vm14, %v2108_v5, 64  ;;  %v1436_v47 = vsel %vm1428_vm15, %v2111_v6, 64  ;;  %v1437_v35 = vsel %vm1429_vm0, %v2114_v7, 64 }
 0x438   : > { %v1438_v32 = vsel %vm300_vm6, %v1430_v41, 2147483647  ;;  %v1439_v49 = vsel %vm300_vm6, %v1431_v42, 2147483647  ;;  %v1440_v50 = vsel %vm300_vm6, %v1432_v43, 2147483647 }
 0x439   : > { %v1441_v45 = vsel %vm300_vm6, %v1433_v34, 2147483647  ;;  %v1442_v52 = vsel %vm300_vm6, %v1434_v38, 2147483647  ;;  %v1445_v37 = vsel %vm300_vm6, %v1435_v46, 2147483647 }
 0x43a   : > { %vm1443_vm1 = vcmp.lt.s32.totalorder %v1438_v32, %v1442_v52  ;;  %vm1446_vm2 = vcmp.lt.s32.totalorder %v1439_v49, %v1445_v37  ;;  %v1448_v54 = vsel %vm300_vm6, %v1436_v47, 2147483647  ;;  %v1451_v44 = vsel %vm300_vm6, %v1437_v35, 2147483647 }
 0x43b   : > { %v1444_v56 = vsel %vm1443_vm1, %v1438_v32, %v1442_v52  ;;  %v1447_v39 = vsel %vm1446_vm2, %v1439_v49, %v1445_v37  ;;  %vm1449_vm3 = vcmp.lt.s32.totalorder %v1440_v50, %v1448_v54  ;;  %vm1452_vm4 = vcmp.lt.s32.totalorder %v1441_v45, %v1451_v44 }
 0x43c   : > { %v1450_v58 = vsel %vm1449_vm3, %v1440_v50, %v1448_v54  ;;  %v1453_v48 = vsel %vm1452_vm4, %v1441_v45, %v1451_v44  ;;  %vm1454_vm5 = vcmp.lt.s32.totalorder %v1444_v56, %v1447_v39 }
 0x43d   : > { %v1455_v60 = vsel %vm1454_vm5, %v1444_v56, %v1447_v39  ;;  %vm1456_vm7 = vcmp.lt.s32.totalorder %v1450_v58, %v1453_v48 }
 0x43e   : > { %v1457_v36 = vsel %vm1456_vm7, %v1450_v58, %v1453_v48 }
 0x43f   : > { %vm1458_vm8 = vcmp.lt.s32.totalorder %v1455_v60, %v1457_v36 }
 0x440   : > { %v1459_v63 = vsel %vm1458_vm8, %v1455_v60, %v1457_v36 }
 0x441   : > { %v1460_v51 = vrot.slane %v1459_v63, 4 }
 0x443   : > { %vm1461_vm10 = vcmp.lt.s32.totalorder %v1459_v63, %v1460_v51 }
 0x444   : > { %v1462_v8 = vsel %vm1461_vm10, %v1459_v63, %v1460_v51 }
 0x445   : > { %v1463_v53 = vrot.slane %v1462_v8, 2 }
 0x447   : > { %vm1464_vm11 = vcmp.lt.s32.totalorder %v1462_v8, %v1463_v53 }
 0x448   : > { %v1465_v10 = vsel %vm1464_vm11, %v1462_v8, %v1463_v53 }
 0x449   : > { %v1466_v55 = vrot.slane %v1465_v10, 1 }
 0x44b   : > { %vm1467_vm12 = vcmp.lt.s32.totalorder %v1465_v10, %v1466_v55 }
 0x44c   : > { %v1468_v12 = vsel %vm1467_vm12, %v1465_v10, %v1466_v55 }
 0x44d   : > { %vm1469_vm13 = vcmp.eq.s32.totalorder %v2093_v61, %v1468_v12  ;;  %vm1470_vm14 = vcmp.eq.s32.totalorder %v2096_v0, %v1468_v12  ;;  %vm1471_vm15 = vcmp.eq.s32.totalorder %v2099_v1, %v1468_v12  ;;  %vm1472_vm0 = vcmp.eq.s32.totalorder %v2102_v2, %v1468_v12 }
 0x44e   : > { %vm1473_vm1 = vcmp.eq.s32.totalorder %v2105_v4, %v1468_v12  ;;  %vm1474_vm2 = vcmp.eq.s32.totalorder %v2108_v5, %v1468_v12  ;;  %vm1475_vm3 = vcmp.eq.s32.totalorder %v2111_v6, %v1468_v12  ;;  %vm1476_vm4 = vcmp.eq.s32.totalorder %v2114_v7, %v1468_v12 }
 0x44f   : > { %v3106_v13 = vsel %vm1469_vm13, inf, %v3034_v11  ;;  %v3109_v59 = vsel %vm1470_vm14, inf, %v3037_v57  ;;  %v3112_v16 = vsel %vm1471_vm15, inf, %v3040_v14  ;;  %v3115_v17 = vsel %vm1472_vm0, inf, %v3043_v15 }
 0x450   : > { %v3118_v3 = vsel %vm1473_vm1, inf, %v3046_v62  ;;  %v3121_v20 = vsel %vm1474_vm2, inf, %v3049_v18  ;;  %v3124_v21 = vsel %vm1475_vm3, inf, %v3052_v19  ;;  %v3127_v11 = vsel %vm1476_vm4, inf, %v3055_v9 }
 0x451   : > { %v1485_v57 = vsel %vm300_vm6, %v3106_v13, inf  ;;  %v1486_v14 = vsel %vm300_vm6, %v3109_v59, inf  ;;  %v1487_v15 = vsel %vm300_vm6, %v3112_v16, inf  ;;  %v1488_v62 = vsel %vm300_vm6, %v3115_v17, inf }
 0x452   : > { %v1489_v18 = vsel %vm300_vm6, %v3118_v3, inf  ;;  %v1491_v19 = vsel %vm300_vm6, %v3121_v20, inf  ;;  %v1493_v9 = vsel %vm300_vm6, %v3124_v21, inf  ;;  %v1495_v22 = vsel %vm300_vm6, %v3127_v11, inf }
 0x453   : > { %v1490_v23 = vmin.f32 %v1485_v57, %v1489_v18  ;;  %v1492_v24 = vmin.f32 %v1486_v14, %v1491_v19  ;;  %v1494_v25 = vmin.f32 %v1487_v15, %v1493_v9  ;;  %v1496_v26 = vmin.f32 %v1488_v62, %v1495_v22 }
 0x455   : > { %v1497_v27 = vmin.f32 %v1490_v23, %v1492_v24  ;;  %v1498_v28 = vmin.f32 %v1494_v25, %v1496_v26 }
 0x457   : > { %v1499_v29 = vmin.f32 %v1497_v27, %v1498_v28 }
 0x459   : > { %v1500_v30 = vrot.slane %v1499_v29, 4 }
 0x45b   : > { %v1501_v31 = vmin.f32 %v1499_v29, %v1500_v30 }
 0x45d   : > { %v1502_v33 = vrot.slane %v1501_v31, 2 }
 0x45f   : > { %v1503_v40 = vmin.f32 %v1501_v31, %v1502_v33 }
 0x461   : > { %v1504_v41 = vrot.slane %v1503_v40, 1 }
 0x463   : > { %v1505_v42 = vmin.f32 %v1503_v40, %v1504_v41 }
 0x465   : > { %vm1506_vm5 = vcmp.eq.f32.partialorder %v3106_v13, %v1505_v42  ;;  %vm1507_vm7 = vcmp.eq.f32.partialorder %v3109_v59, %v1505_v42  ;;  %vm1508_vm8 = vcmp.eq.f32.partialorder %v3112_v16, %v1505_v42  ;;  %vm1509_vm10 = vcmp.eq.f32.partialorder %v3115_v17, %v1505_v42 }
 0x466   : > { %vm1510_vm11 = vcmp.eq.f32.partialorder %v3118_v3, %v1505_v42  ;;  %vm1511_vm12 = vcmp.eq.f32.partialorder %v3121_v20, %v1505_v42  ;;  %vm1512_vm13 = vcmp.eq.f32.partialorder %v3124_v21, %v1505_v42  ;;  %vm1513_vm14 = vcmp.eq.f32.partialorder %v3127_v11, %v1505_v42 }
 0x467   : > { %v1514_v43 = vsel %vm1506_vm5, %v2093_v61, 64  ;;  %v1515_v34 = vsel %vm1507_vm7, %v2096_v0, 64  ;;  %v1516_v38 = vsel %vm1508_vm8, %v2099_v1, 64  ;;  %v1517_v46 = vsel %vm1509_vm10, %v2102_v2, 64 }
 0x468   : > { %v1518_v47 = vsel %vm1510_vm11, %v2105_v4, 64  ;;  %v1519_v35 = vsel %vm1511_vm12, %v2108_v5, 64  ;;  %v1520_v32 = vsel %vm1512_vm13, %v2111_v6, 64  ;;  %v1521_v49 = vsel %vm1513_vm14, %v2114_v7, 64 }
 0x469   : > { %v1522_v50 = vsel %vm300_vm6, %v1514_v43, 2147483647  ;;  %v1523_v45 = vsel %vm300_vm6, %v1515_v34, 2147483647  ;;  %v1524_v52 = vsel %vm300_vm6, %v1516_v38, 2147483647 }
 0x46a   : > { %v1525_v37 = vsel %vm300_vm6, %v1517_v46, 2147483647  ;;  %v1526_v54 = vsel %vm300_vm6, %v1518_v47, 2147483647  ;;  %v1529_v44 = vsel %vm300_vm6, %v1519_v35, 2147483647 }
 0x46b   : > { %vm1527_vm15 = vcmp.lt.s32.totalorder %v1522_v50, %v1526_v54  ;;  %vm1530_vm0 = vcmp.lt.s32.totalorder %v1523_v45, %v1529_v44  ;;  %v1532_v56 = vsel %vm300_vm6, %v1520_v32, 2147483647  ;;  %v1535_v39 = vsel %vm300_vm6, %v1521_v49, 2147483647 }
 0x46c   : > { %v1528_v58 = vsel %vm1527_vm15, %v1522_v50, %v1526_v54  ;;  %v1531_v48 = vsel %vm1530_vm0, %v1523_v45, %v1529_v44  ;;  %vm1533_vm1 = vcmp.lt.s32.totalorder %v1524_v52, %v1532_v56  ;;  %vm1536_vm2 = vcmp.lt.s32.totalorder %v1525_v37, %v1535_v39 }
 0x46d   : > { %v1534_v60 = vsel %vm1533_vm1, %v1524_v52, %v1532_v56  ;;  %v1537_v36 = vsel %vm1536_vm2, %v1525_v37, %v1535_v39  ;;  %vm1538_vm3 = vcmp.lt.s32.totalorder %v1528_v58, %v1531_v48 }
 0x46e   : > { %v1539_v63 = vsel %vm1538_vm3, %v1528_v58, %v1531_v48  ;;  %vm1540_vm4 = vcmp.lt.s32.totalorder %v1534_v60, %v1537_v36 }
 0x46f   : > { %v1541_v51 = vsel %vm1540_vm4, %v1534_v60, %v1537_v36 }
 0x470   : > { %vm1542_vm5 = vcmp.lt.s32.totalorder %v1539_v63, %v1541_v51 }
 0x471   : > { %v1543_v8 = vsel %vm1542_vm5, %v1539_v63, %v1541_v51 }
 0x472   : > { %v1544_v53 = vrot.slane %v1543_v8, 4 }
 0x474   : > { %vm1545_vm7 = vcmp.lt.s32.totalorder %v1543_v8, %v1544_v53 }
 0x475   : > { %v1546_v10 = vsel %vm1545_vm7, %v1543_v8, %v1544_v53 }
 0x476   : > { %v1547_v55 = vrot.slane %v1546_v10, 2 }
 0x478   : > { %vm1548_vm8 = vcmp.lt.s32.totalorder %v1546_v10, %v1547_v55 }
 0x479   : > { %v1549_v12 = vsel %vm1548_vm8, %v1546_v10, %v1547_v55 }
 0x47a   : > { %v1550_v57 = vrot.slane %v1549_v12, 1 }
 0x47c   : > { %vm1551_vm10 = vcmp.lt.s32.totalorder %v1549_v12, %v1550_v57 }
 0x47d   : > { %v1552_v14 = vsel %vm1551_vm10, %v1549_v12, %v1550_v57 }
 0x47e   : > { %1553 = vst.msk [vmem:[%s2145_s12 + $0x7] sm:$0x1] %vm369_vm9, %v1552_v14  ;;  %vm1554_vm11 = vcmp.eq.s32.totalorder %v2093_v61, %v1552_v14  ;;  %vm1555_vm12 = vcmp.eq.s32.totalorder %v2096_v0, %v1552_v14  ;;  %vm1556_vm13 = vcmp.eq.s32.totalorder %v2099_v1, %v1552_v14  ;;  %vm1557_vm14 = vcmp.eq.s32.totalorder %v2102_v2, %v1552_v14 }
 0x47f   : > { %vm1558_vm15 = vcmp.eq.s32.totalorder %v2105_v4, %v1552_v14  ;;  %vm1559_vm0 = vcmp.eq.s32.totalorder %v2108_v5, %v1552_v14  ;;  %vm1560_vm1 = vcmp.eq.s32.totalorder %v2111_v6, %v1552_v14  ;;  %vm1561_vm2 = vcmp.eq.s32.totalorder %v2114_v7, %v1552_v14 }
 0x480   : > { %v3180_v15 = vsel %vm1554_vm11, inf, %v3106_v13  ;;  %v3183_v62 = vsel %vm1555_vm12, inf, %v3109_v59  ;;  %v3186_v18 = vsel %vm1556_vm13, inf, %v3112_v16  ;;  %v3189_v19 = vsel %vm1557_vm14, inf, %v3115_v17 }
 0x481   : > { %v3192_v9 = vsel %vm1558_vm15, inf, %v3118_v3  ;;  %v3195_v22 = vsel %vm1559_vm0, inf, %v3121_v20  ;;  %v3198_v23 = vsel %vm1560_vm1, inf, %v3124_v21  ;;  %v3201_v13 = vsel %vm1561_vm2, inf, %v3127_v11 }
 0x482   : > { %v1570_v59 = vsel %vm300_vm6, %v3180_v15, inf  ;;  %v1571_v16 = vsel %vm300_vm6, %v3183_v62, inf  ;;  %v1572_v17 = vsel %vm300_vm6, %v3186_v18, inf  ;;  %v1573_v3 = vsel %vm300_vm6, %v3189_v19, inf }
 0x483   : > { %v1574_v20 = vsel %vm300_vm6, %v3192_v9, inf  ;;  %v1576_v21 = vsel %vm300_vm6, %v3195_v22, inf  ;;  %v1578_v11 = vsel %vm300_vm6, %v3198_v23, inf  ;;  %v1580_v24 = vsel %vm300_vm6, %v3201_v13, inf }
 0x484   : > { %v1575_v25 = vmin.f32 %v1570_v59, %v1574_v20  ;;  %v1577_v26 = vmin.f32 %v1571_v16, %v1576_v21  ;;  %v1579_v27 = vmin.f32 %v1572_v17, %v1578_v11  ;;  %v1581_v28 = vmin.f32 %v1573_v3, %v1580_v24 }
 0x486   : > { %v1582_v29 = vmin.f32 %v1575_v25, %v1577_v26  ;;  %v1583_v30 = vmin.f32 %v1579_v27, %v1581_v28 }
 0x488   : > { %v1584_v31 = vmin.f32 %v1582_v29, %v1583_v30 }
 0x48a   : > { %v1585_v33 = vrot.slane %v1584_v31, 4 }
 0x48c   : > { %v1586_v40 = vmin.f32 %v1584_v31, %v1585_v33 }
 0x48e   : > { %v1587_v41 = vrot.slane %v1586_v40, 2 }
 0x490   : > { %v1588_v42 = vmin.f32 %v1586_v40, %v1587_v41 }
 0x492   : > { %v1589_v43 = vrot.slane %v1588_v42, 1 }
 0x494   : > { %v1590_v34 = vmin.f32 %v1588_v42, %v1589_v43 }
 0x496   : > { %vm1591_vm3 = vcmp.eq.f32.partialorder %v3180_v15, %v1590_v34  ;;  %vm1592_vm4 = vcmp.eq.f32.partialorder %v3183_v62, %v1590_v34  ;;  %vm1593_vm5 = vcmp.eq.f32.partialorder %v3186_v18, %v1590_v34  ;;  %vm1594_vm7 = vcmp.eq.f32.partialorder %v3189_v19, %v1590_v34 }
 0x497   : > { %vm1595_vm8 = vcmp.eq.f32.partialorder %v3192_v9, %v1590_v34  ;;  %vm1596_vm10 = vcmp.eq.f32.partialorder %v3195_v22, %v1590_v34  ;;  %vm1597_vm11 = vcmp.eq.f32.partialorder %v3198_v23, %v1590_v34  ;;  %vm1598_vm12 = vcmp.eq.f32.partialorder %v3201_v13, %v1590_v34 }
 0x498   : > { %v1599_v38 = vsel %vm1591_vm3, %v2093_v61, 64  ;;  %v1600_v46 = vsel %vm1592_vm4, %v2096_v0, 64  ;;  %v1601_v47 = vsel %vm1593_vm5, %v2099_v1, 64  ;;  %v1602_v35 = vsel %vm1594_vm7, %v2102_v2, 64 }
 0x499   : > { %v1603_v32 = vsel %vm1595_vm8, %v2105_v4, 64  ;;  %v1604_v49 = vsel %vm1596_vm10, %v2108_v5, 64  ;;  %v1605_v50 = vsel %vm1597_vm11, %v2111_v6, 64  ;;  %v1606_v45 = vsel %vm1598_vm12, %v2114_v7, 64 }
 0x49a   : > { %v1607_v52 = vsel %vm300_vm6, %v1599_v38, 2147483647  ;;  %v1608_v37 = vsel %vm300_vm6, %v1600_v46, 2147483647  ;;  %v1609_v54 = vsel %vm300_vm6, %v1601_v47, 2147483647 }
 0x49b   : > { %v1610_v44 = vsel %vm300_vm6, %v1602_v35, 2147483647  ;;  %v1611_v56 = vsel %vm300_vm6, %v1603_v32, 2147483647  ;;  %v1614_v39 = vsel %vm300_vm6, %v1604_v49, 2147483647 }
 0x49c   : > { %vm1612_vm13 = vcmp.lt.s32.totalorder %v1607_v52, %v1611_v56  ;;  %vm1615_vm14 = vcmp.lt.s32.totalorder %v1608_v37, %v1614_v39  ;;  %v1617_v58 = vsel %vm300_vm6, %v1605_v50, 2147483647  ;;  %v1620_v48 = vsel %vm300_vm6, %v1606_v45, 2147483647 }
 0x49d   : > { %v1613_v60 = vsel %vm1612_vm13, %v1607_v52, %v1611_v56  ;;  %v1616_v36 = vsel %vm1615_vm14, %v1608_v37, %v1614_v39  ;;  %vm1618_vm15 = vcmp.lt.s32.totalorder %v1609_v54, %v1617_v58  ;;  %vm1621_vm0 = vcmp.lt.s32.totalorder %v1610_v44, %v1620_v48 }
 0x49e   : > { %v1619_v63 = vsel %vm1618_vm15, %v1609_v54, %v1617_v58  ;;  %v1622_v51 = vsel %vm1621_vm0, %v1610_v44, %v1620_v48  ;;  %vm1623_vm1 = vcmp.lt.s32.totalorder %v1613_v60, %v1616_v36 }
 0x49f   : > { %v1624_v8 = vsel %vm1623_vm1, %v1613_v60, %v1616_v36  ;;  %vm1625_vm2 = vcmp.lt.s32.totalorder %v1619_v63, %v1622_v51 }
 0x4a0   : > { %v1626_v53 = vsel %vm1625_vm2, %v1619_v63, %v1622_v51 }
 0x4a1   : > { %vm1627_vm3 = vcmp.lt.s32.totalorder %v1624_v8, %v1626_v53 }
 0x4a2   : > { %v1628_v10 = vsel %vm1627_vm3, %v1624_v8, %v1626_v53 }
 0x4a3   : > { %v1629_v55 = vrot.slane %v1628_v10, 4 }
 0x4a5   : > { %vm1630_vm4 = vcmp.lt.s32.totalorder %v1628_v10, %v1629_v55 }
 0x4a6   : > { %v1631_v12 = vsel %vm1630_vm4, %v1628_v10, %v1629_v55 }
 0x4a7   : > { %v1632_v57 = vrot.slane %v1631_v12, 2 }
 0x4a9   : > { %vm1633_vm5 = vcmp.lt.s32.totalorder %v1631_v12, %v1632_v57 }
 0x4aa   : > { %v1634_v14 = vsel %vm1633_vm5, %v1631_v12, %v1632_v57 }
 0x4ab   : > { %v1635_v59 = vrot.slane %v1634_v14, 1 }
 0x4ad   : > { %vm1636_vm7 = vcmp.lt.s32.totalorder %v1634_v14, %v1635_v59 }
 0x4ae   : > { %v1637_v16 = vsel %vm1636_vm7, %v1634_v14, %v1635_v59 }
 0x4af   : > { %vm1638_vm8 = vcmp.eq.s32.totalorder %v2093_v61, %v1637_v16  ;;  %vm1639_vm10 = vcmp.eq.s32.totalorder %v2096_v0, %v1637_v16  ;;  %vm1640_vm11 = vcmp.eq.s32.totalorder %v2099_v1, %v1637_v16  ;;  %vm1641_vm12 = vcmp.eq.s32.totalorder %v2102_v2, %v1637_v16 }
 0x4b0   : > { %vm1642_vm13 = vcmp.eq.s32.totalorder %v2105_v4, %v1637_v16  ;;  %vm1643_vm14 = vcmp.eq.s32.totalorder %v2108_v5, %v1637_v16  ;;  %vm1644_vm15 = vcmp.eq.s32.totalorder %v2111_v6, %v1637_v16  ;;  %vm1645_vm0 = vcmp.eq.s32.totalorder %v2114_v7, %v1637_v16 }
 0x4b1   : > { %v1646_v17 = vsel %vm1638_vm8, inf, %v3180_v15  ;;  %v1647_v3 = vsel %vm1639_vm10, inf, %v3183_v62  ;;  %v1648_v20 = vsel %vm1640_vm11, inf, %v3186_v18  ;;  %v1649_v21 = vsel %vm1641_vm12, inf, %v3189_v19 }
 0x4b2   : > { %v1650_v11 = vsel %vm1642_vm13, inf, %v3192_v9  ;;  %v1651_v24 = vsel %vm1643_vm14, inf, %v3195_v22  ;;  %v1652_v25 = vsel %vm1644_vm15, inf, %v3198_v23  ;;  %v1653_v26 = vsel %vm1645_vm0, inf, %v3201_v13 }
 0x4b3   : > { %v1654_v27 = vsel %vm300_vm6, %v1646_v17, inf  ;;  %v1655_v28 = vsel %vm300_vm6, %v1647_v3, inf  ;;  %v1656_v15 = vsel %vm300_vm6, %v1648_v20, inf  ;;  %v1657_v62 = vsel %vm300_vm6, %v1649_v21, inf }
 0x4b4   : > { %v1658_v18 = vsel %vm300_vm6, %v1650_v11, inf  ;;  %v1660_v19 = vsel %vm300_vm6, %v1651_v24, inf  ;;  %v1662_v9 = vsel %vm300_vm6, %v1652_v25, inf  ;;  %v1664_v22 = vsel %vm300_vm6, %v1653_v26, inf }
 0x4b5   : > { %v1659_v29 = vmin.f32 %v1654_v27, %v1658_v18  ;;  %v1661_v23 = vmin.f32 %v1655_v28, %v1660_v19  ;;  %v1663_v30 = vmin.f32 %v1656_v15, %v1662_v9  ;;  %v1665_v13 = vmin.f32 %v1657_v62, %v1664_v22 }
 0x4b7   : > { %v1666_v31 = vmin.f32 %v1659_v29, %v1661_v23  ;;  %v1667_v33 = vmin.f32 %v1663_v30, %v1665_v13 }
 0x4b9   : > { %v1668_v40 = vmin.f32 %v1666_v31, %v1667_v33 }
 0x4bb   : > { %v1669_v41 = vrot.slane %v1668_v40, 4 }
 0x4bd   : > { %v1670_v42 = vmin.f32 %v1668_v40, %v1669_v41 }
 0x4bf   : > { %v1671_v43 = vrot.slane %v1670_v42, 2 }
 0x4c1   : > { %v1672_v34 = vmin.f32 %v1670_v42, %v1671_v43 }
 0x4c3   : > { %v1673_v38 = vrot.slane %v1672_v34, 1 }
 0x4c5   : > { %v1674_v46 = vmin.f32 %v1672_v34, %v1673_v38 }
 0x4c7   : > { %vm1675_vm1 = vcmp.eq.f32.partialorder %v1646_v17, %v1674_v46  ;;  %vm1676_vm2 = vcmp.eq.f32.partialorder %v1647_v3, %v1674_v46  ;;  %vm1677_vm3 = vcmp.eq.f32.partialorder %v1648_v20, %v1674_v46  ;;  %vm1678_vm4 = vcmp.eq.f32.partialorder %v1649_v21, %v1674_v46 }
 0x4c8   : > { %vm1679_vm5 = vcmp.eq.f32.partialorder %v1650_v11, %v1674_v46  ;;  %vm1680_vm7 = vcmp.eq.f32.partialorder %v1651_v24, %v1674_v46  ;;  %vm1681_vm8 = vcmp.eq.f32.partialorder %v1652_v25, %v1674_v46  ;;  %vm1682_vm10 = vcmp.eq.f32.partialorder %v1653_v26, %v1674_v46 }
 0x4c9   : > { %v1683_v47 = vsel %vm1675_vm1, %v2093_v61, 64  ;;  %v1684_v35 = vsel %vm1676_vm2, %v2096_v0, 64  ;;  %v1685_v32 = vsel %vm1677_vm3, %v2099_v1, 64  ;;  %v1686_v49 = vsel %vm1678_vm4, %v2102_v2, 64 }
 0x4ca   : > { %v1687_v50 = vsel %vm1679_vm5, %v2105_v4, 64  ;;  %v1688_v45 = vsel %vm1680_vm7, %v2108_v5, 64  ;;  %v1689_v52 = vsel %vm1681_vm8, %v2111_v6, 64  ;;  %v1690_v37 = vsel %vm1682_vm10, %v2114_v7, 64 }
 0x4cb   : > { %v1691_v54 = vsel %vm300_vm6, %v1683_v47, 2147483647  ;;  %v1692_v44 = vsel %vm300_vm6, %v1684_v35, 2147483647  ;;  %v1693_v61 = vsel %vm300_vm6, %v1685_v32, 2147483647 }
 0x4cc   : > { %v1694_v0 = vsel %vm300_vm6, %v1686_v49, 2147483647  ;;  %v1695_v1 = vsel %vm300_vm6, %v1687_v50, 2147483647  ;;  %v1698_v2 = vsel %vm300_vm6, %v1688_v45, 2147483647 }
 0x4cd   : > { %vm1696_vm11 = vcmp.lt.s32.totalorder %v1691_v54, %v1695_v1  ;;  %vm1699_vm12 = vcmp.lt.s32.totalorder %v1692_v44, %v1698_v2  ;;  %v1701_v4 = vsel %vm300_vm6, %v1689_v52, 2147483647  ;;  %v1704_v5 = vsel %vm300_vm6, %v1690_v37, 2147483647 }
 0x4ce   : > { %v1697_v6 = vsel %vm1696_vm11, %v1691_v54, %v1695_v1  ;;  %v1700_v7 = vsel %vm1699_vm12, %v1692_v44, %v1698_v2  ;;  %vm1702_vm13 = vcmp.lt.s32.totalorder %v1693_v61, %v1701_v4  ;;  %vm1705_vm14 = vcmp.lt.s32.totalorder %v1694_v0, %v1704_v5 }
 0x4cf   : > { %v1703_v56 = vsel %vm1702_vm13, %v1693_v61, %v1701_v4  ;;  %v1706_v39 = vsel %vm1705_vm14, %v1694_v0, %v1704_v5  ;;  %vm1707_vm15 = vcmp.lt.s32.totalorder %v1697_v6, %v1700_v7 }
 0x4d0   : > { %v1708_v58 = vsel %vm1707_vm15, %v1697_v6, %v1700_v7  ;;  %vm1709_vm0 = vcmp.lt.s32.totalorder %v1703_v56, %v1706_v39 }
 0x4d1   : > { %v1710_v48 = vsel %vm1709_vm0, %v1703_v56, %v1706_v39 }
 0x4d2   : > { %vm1711_vm1 = vcmp.lt.s32.totalorder %v1708_v58, %v1710_v48 }
 0x4d3   : > { %v1712_v60 = vsel %vm1711_vm1, %v1708_v58, %v1710_v48 }
 0x4d4   : > { %v1713_v36 = vrot.slane %v1712_v60, 4 }
 0x4d6   : > { %vm1714_vm2 = vcmp.lt.s32.totalorder %v1712_v60, %v1713_v36 }
 0x4d7   : > { %v1715_v63 = vsel %vm1714_vm2, %v1712_v60, %v1713_v36 }
 0x4d8   : > { %v1716_v51 = vrot.slane %v1715_v63, 2 }
 0x4da   : > { %vm1717_vm3 = vcmp.lt.s32.totalorder %v1715_v63, %v1716_v51 }
 0x4db   : > { %v1718_v8 = vsel %vm1717_vm3, %v1715_v63, %v1716_v51 }
 0x4dc   : > { %v1719_v53 = vrot.slane %v1718_v8, 1 }
 0x4de   : > { %vm1720_vm6 = vcmp.lt.s32.totalorder %v1718_v8, %v1719_v53 }
 0x4df   : > { %v1721_v10 = vsel %vm1720_vm6, %v1718_v8, %v1719_v53 }
 0x4e0   : > { %1722 = vst.msk [vmem:[%s2145_s12 + $0x8] sm:$0x1] %vm369_vm9, %v1721_v10 }
 0x4e1 PF: > { %s14_s11 = sadd.s32 1, %s1976_s11   ;;  %s3307_s6 = smov %s1960_s7 }
 0x4e2   : > { %p11_p0 = scmp.ge.s32.totalorder %s14_s11, 4   ;;  %s3308_s7 = smov %s1964_s8 }
 0x4e3   : > { %s3309_s8 = smov %s2037_s18  ;;  %s3310_s9 = smov %s1972_s10 }
 0x4e4   : > { %s3311_s10 = smov %s3313_s13  ;;  %13 = sbr.rel (!%p11_p0) target bundleno = 4 (0x4), region = 64 }
 0x4e9   :  { %1750 = vsyncpa [#allocation3], 1 }
 0x4ea   :  { %1752 = vsyncpa [#allocation3 + $0x1], 1 }

</bundles_post_ra>
